<compile_context>
chip_gen: v5e
topology: v5e:2x2
jax: 0.10.0
libtpu: 0.0.40
codegen_flags: <defaults>
</compile_context>

<pallas_src>
import functools

import jax
import jax.numpy as jnp
from jax.experimental import pallas as pl
from jax.experimental.pallas import tpu as pltpu


def _round_up(x, m):
    return ((x + m - 1) // m) * m


def _tile(extent, requested):
    """Tile length (multiple of 16 for bf16 sublane packing) and padded extent."""
    t = _round_up(min(requested, extent), 16)
    return t, _round_up(extent, t)


def _nonlocal_flash_kernel(theta_ref, phi_ref, g_ref, xq_ref, ww_ref, bw_ref,
                           o_ref, m_sc, l_sc, acc_sc,
                           *, hw, t_kv, needs_mask):
    """One (batch, q_tile, kv_tile) grid step of the non-local block."""
    ki = pl.program_id(2)
    nk = pl.num_programs(2)

    # --- per-(batch, q_tile) init of the online-softmax state ---
    @pl.when(ki == 0)
    def _init():
        m_sc[...] = jnp.full(m_sc.shape, -1e30, m_sc.dtype)
        l_sc[...] = jnp.zeros(l_sc.shape, l_sc.dtype)
        acc_sc[...] = jnp.zeros(acc_sc.shape, acc_sc.dtype)

    # --- affinity scores: contract channel (last) dims, bf16 operands,
    #     f32 accumulation; no transpose inside the kernel ---
    s = jax.lax.dot_general(
        theta_ref[0], phi_ref[0], (((1,), (1,)), ((), ())),
        preferred_element_type=jnp.float32)                         # (tq, tkv)

    # Static skip: only emitted when HW is not a multiple of the kv tile.
    if needs_mask:
        kv_idx = ki * t_kv + jax.lax.broadcasted_iota(jnp.int32, (1, t_kv), 1)
        s = jnp.where(kv_idx < hw, s, -1e30)

    # --- online softmax update (f32 vector math; normalization deferred) ---
    m_prev = m_sc[...]
    m_new = jnp.maximum(m_prev, jnp.max(s, axis=-1, keepdims=True))
    alpha = jnp.exp(m_prev - m_new)
    p = jnp.exp(s - m_new)                                          # (tq, tkv)
    l_sc[...] = alpha * l_sc[...] + jnp.sum(p, axis=-1, keepdims=True)
    acc_sc[...] = alpha * acc_sc[...] + jnp.dot(
        p.astype(jnp.bfloat16), g_ref[0],
        preferred_element_type=jnp.float32)                         # (tq, Cip)
    m_sc[...] = m_new

    # --- finalize: normalize, W projection, residual add ---
    @pl.when(ki == nk - 1)
    def _finalize():
        y = acc_sc[...] * (1.0 / l_sc[...])                         # (tq, Cip)
        w_y = jnp.dot(y.astype(jnp.bfloat16), ww_ref[...],
                      preferred_element_type=jnp.float32) + bw_ref[...]
        o_ref[0] = (w_y + xq_ref[0]).astype(o_ref.dtype)


def nonlocal_embedded_gaussian(x_nchw, params, *, tile_q=512, tile_kv=512):
    """NonLocal (EmbeddedGaussian) forward.

    x_nchw: (N, C, H, W) float32.
    params: dict with wg/wt/wp of shape (Ci, C), ww of shape (C, Ci) and
            biases bg/bt/bp (Ci,), bw (C,).
    tile_q / tile_kv: query / kv tile lengths along the flattened spatial
            axis.  Bigger tile_q cuts kv re-streaming (v5e/v6e: up to 1024
            fits 128 MiB VMEM); keep tile_q <= 512-768 on v7x (64 MiB/TC).
    """
    n, c, h, w = x_nchw.shape
    hw = h * w
    ci = params["wg"].shape[0]

    cp = _round_up(c, 128)          # lane-dense channel padding
    cip = _round_up(ci, 128)
    t_q, hwp_q = _tile(hw, tile_q)
    t_kv, hwp_kv = _tile(hw, tile_kv)
    nq, nk = hwp_q // t_q, hwp_kv // t_kv
    needs_mask = hwp_kv != hw

    # NCHW -> (N, HW, C) once; the 1x1-conv projections are applied here in a
    # single XLA pass (no per-kv-tile redundancy) and streamed as bf16.
    x_flat = jnp.transpose(x_nchw.reshape(n, c, hw), (0, 2, 1)).astype(jnp.float32)
    theta = jnp.einsum("npc,ic->npi", x_flat, params["wt"]) + params["bt"]
    phi = jnp.einsum("npc,ic->npi", x_flat, params["wp"]) + params["bp"]
    g = jnp.einsum("npc,ic->npi", x_flat, params["wg"]) + params["bg"]

    def pad3(a, rows, cols, dtype):
        return jnp.pad(a, ((0, 0), (0, rows - a.shape[1]),
                           (0, cols - a.shape[2]))).astype(dtype)

    theta_p = pad3(theta, hwp_q, cip, jnp.bfloat16)     # (N, HWq, Cip)
    phi_p = pad3(phi, hwp_kv, cip, jnp.bfloat16)        # (N, HWk, Cip)
    g_p = pad3(g, hwp_kv, cip, jnp.bfloat16)            # (N, HWk, Cip)
    xq_p = pad3(x_flat, hwp_q, cp, jnp.float32)         # residual stays f32

    ww_t = jnp.pad(params["ww"].T.astype(jnp.float32),
                   ((0, cip - ci), (0, cp - c))).astype(jnp.bfloat16)  # (Cip, Cp)
    bw = jnp.pad(params["bw"].astype(jnp.float32), (0, cp - c)).reshape(1, cp)

    # VMEM budget: double-buffered streamed blocks + scratch + live temporaries.
    blk = (t_q * cip * 2            # theta tile (bf16)
           + 2 * t_kv * cip * 2     # phi + g tiles (bf16)
           + t_q * cp * 4           # residual x tile (f32)
           + t_q * cp * 4           # output tile (f32)
           + cip * cp * 2           # W weight (bf16)
           + cp * 4)                # W bias (f32)
    scratch = t_q * cip * 4 + 2 * t_q * 4
    temps = 2 * t_q * t_kv * 4      # scores + probabilities (f32)
    vmem_limit = min(int(1.5 * (2 * blk + scratch + temps)) + (8 << 20), 100 << 20)

    # Advisory cost estimate so XLA schedules around the custom call.
    flops = int(n) * (2 * 2 * hwp_q * hwp_kv * cip + 2 * hwp_q * cip * cp)
    transcendentals = int(n) * hwp_q * hwp_kv
    bytes_accessed = int(
        n * (hwp_q * cip * 2                 # theta (streamed once)
             + nq * 2 * hwp_kv * cip * 2     # phi + g re-streamed per q tile
             + hwp_q * cp * 4                # residual x
             + hwp_q * cp * 4)               # output
        + cip * cp * 2 + cp * 4)
    cost = pl.CostEstimate(flops=flops, transcendentals=transcendentals,
                           bytes_accessed=bytes_accessed)

    kernel = functools.partial(_nonlocal_flash_kernel,
                               hw=hw, t_kv=t_kv, needs_mask=needs_mask)

    out_mat = pl.pallas_call(
        kernel,
        out_shape=jax.ShapeDtypeStruct((n, hwp_q, cp), jnp.float32),
        grid_spec=pltpu.PrefetchScalarGridSpec(
            num_scalar_prefetch=0,
            grid=(n, nq, nk),
            in_specs=[
                pl.BlockSpec((1, t_q, cip), lambda b, qi, ki: (b, qi, 0)),   # theta
                pl.BlockSpec((1, t_kv, cip), lambda b, qi, ki: (b, ki, 0)),  # phi
                pl.BlockSpec((1, t_kv, cip), lambda b, qi, ki: (b, ki, 0)),  # g
                pl.BlockSpec((1, t_q, cp), lambda b, qi, ki: (b, qi, 0)),    # x residual
                pl.BlockSpec((cip, cp), lambda b, qi, ki: (0, 0)),           # W weight
                pl.BlockSpec((1, cp), lambda b, qi, ki: (0, 0)),             # W bias
            ],
            out_specs=pl.BlockSpec((1, t_q, cp), lambda b, qi, ki: (b, qi, 0)),
            scratch_shapes=[
                pltpu.VMEM((t_q, 1), jnp.float32),     # running max m
                pltpu.VMEM((t_q, 1), jnp.float32),     # running sum l
                pltpu.VMEM((t_q, cip), jnp.float32),   # un-normalized y acc
            ],
        ),
        compiler_params=pltpu.CompilerParams(
            dimension_semantics=("parallel", "parallel", "arbitrary"),
            vmem_limit_bytes=vmem_limit),
        cost_estimate=cost,
    )(theta_p, phi_p, g_p, xq_p, ww_t, bw)

    # Drop padding, (N, HW, C) -> NCHW.  (For end-to-end pipelines, consider
    # consuming the (N, HW, C) layout directly to save an HBM round-trip.)
    out_mat = out_mat[:, :hw, :c]
    return jnp.transpose(out_mat, (0, 2, 1)).reshape(n, c, h, w)


def _reference_jax(x_nchw, params):
    """Pure-JAX f32 reference of the same forward (for correctness check)."""
    n, c, h, w = x_nchw.shape
    hw = h * w
    x = jnp.transpose(x_nchw.reshape(n, c, hw), (0, 2, 1)).astype(jnp.float32)
    g = jnp.einsum("npc,ic->npi", x, params["wg"]) + params["bg"]
    th = jnp.einsum("npc,ic->npi", x, params["wt"]) + params["bt"]
    ph = jnp.einsum("npc,ic->npi", x, params["wp"]) + params["bp"]
    f = jnp.einsum("npi,nqi->npq", th, ph)
    f = jax.nn.softmax(f, axis=-1)
    y = jnp.einsum("npq,nqi->npi", f, g)
    wy = jnp.einsum("npi,ci->npc", y, params["ww"]) + params["bw"]
    z = wy + x
    return jnp.transpose(z, (0, 2, 1)).reshape(n, c, h, w)


def make_params(key, in_channels, *, zero_w=True):
    """Parameter init matching the module's shapes.

    g / theta / phi: Conv2d(C, Ci, 1) -> (Ci, C) weight + (Ci,) bias.
    W: Conv2d(Ci, C, 1); the module zero-initializes it (bn_layer=False);
    set zero_w=False to exercise the full attention path numerically.
    """
    inter_channels = max(in_channels // 2, 1)
    k = jax.random.split(key, 8)
    scale = 1.0 / jnp.sqrt(in_channels)
    u = lambda kk, shape: jax.random.uniform(kk, shape, jnp.float32, -scale, scale)
    params = {
        "wg": u(k[0], (inter_channels, in_channels)),
        "bg": u(k[1], (inter_channels,)),
        "wt": u(k[2], (inter_channels, in_channels)),
        "bt": u(k[3], (inter_channels,)),
        "wp": u(k[4], (inter_channels, in_channels)),
        "bp": u(k[5], (inter_channels,)),
    }
    if zero_w:
        params["ww"] = jnp.zeros((in_channels, inter_channels), jnp.float32)
        params["bw"] = jnp.zeros((in_channels,), jnp.float32)
    else:
        params["ww"] = u(k[6], (in_channels, inter_channels))
        params["bw"] = u(k[7], (in_channels,))
    return params


if __name__ == "__main__":
    key = jax.random.PRNGKey(0)
    kx, kp1, kp2, kx2 = jax.random.split(key, 4)

    N, C, H, W = 2, 4, 16, 16
    x = jax.random.normal(kx, (N, C, H, W), jnp.float32)

    # Tolerance sized for the bf16 theta/phi/g/W operand streams (f32 accumulate).
    tol = dict(atol=3e-2, rtol=3e-2)
    ok = True

    # (a) Module-default params (W conv zero-initialized), single-tile path.
    params0 = make_params(kp1, C, zero_w=True)
    fwd0 = jax.jit(functools.partial(nonlocal_embedded_gaussian, params=params0))
    z0 = jax.block_until_ready(fwd0(x))
    ok &= z0.shape == (N, C, H, W)
    ok &= bool(jnp.allclose(z0, _reference_jax(x, params0), **tol))

    # (b) Non-zero W and small tiles so the multi-step kv reduction /
    #     online-softmax accumulation path is actually exercised.
    params1 = make_params(kp2, C, zero_w=False)
    fwd1 = jax.jit(functools.partial(nonlocal_embedded_gaussian, params=params1,
                                     tile_q=64, tile_kv=64))
    z1 = jax.block_until_ready(fwd1(x))
    ok &= bool(jnp.allclose(z1, _reference_jax(x, params1), **tol))

    # (c) Non-tile-aligned spatial extent -> exercises the kv padding mask.
    Hc, Wc = 10, 13
    xc = jax.random.normal(kx2, (N, C, Hc, Wc), jnp.float32)
    fwd2 = jax.jit(functools.partial(nonlocal_embedded_gaussian, params=params1,
                                     tile_q=64, tile_kv=64))
    z2 = jax.block_until_ready(fwd2(xc))
    ok &= bool(jnp.allclose(z2, _reference_jax(xc, params1), **tol))

    assert ok, "mismatch vs reference"
    print("KERNEL_OK")
</pallas_src>

<mosaic_0001>
module attributes {stable_mosaic.version = 11 : i64} {
  func.func @_nonlocal_flash_kernel(%arg0: i32, %arg1: i32, %arg2: i32, %arg3: memref<1x256x128xbf16, #tpu.memory_space<vmem>>, %arg4: memref<1x256x128xbf16, #tpu.memory_space<vmem>>, %arg5: memref<1x256x128xbf16, #tpu.memory_space<vmem>>, %arg6: memref<1x256x128xf32, #tpu.memory_space<vmem>>, %arg7: memref<128x128xbf16, #tpu.memory_space<vmem>>, %arg8: memref<1x128xf32, #tpu.memory_space<vmem>>, %arg9: memref<1x256x128xf32, #tpu.memory_space<vmem>>, %arg10: memref<256x1xf32, #tpu.memory_space<vmem>>, %arg11: memref<256x1xf32, #tpu.memory_space<vmem>>, %arg12: memref<256x128xf32, #tpu.memory_space<vmem>>) attributes {dimension_semantics = [#tpu.dimension_semantics<parallel>, #tpu.dimension_semantics<parallel>, #tpu.dimension_semantics<arbitrary>], iteration_bounds = array<i64: 2, 1, 1>, scalar_prefetch = 0 : i64, scratch_operands = 3 : i64, tpu.core_type = #tpu.core_type<tc>, window_params = [{transform_indices = @transform_0, window_bounds = array<i64: 1, 256, 128>}, {transform_indices = @transform_1, window_bounds = array<i64: 1, 256, 128>}, {transform_indices = @transform_2, window_bounds = array<i64: 1, 256, 128>}, {transform_indices = @transform_3, window_bounds = array<i64: 1, 256, 128>}, {pipeline_mode = #tpu.pipeline_mode<synchronous>, transform_indices = @transform_4, window_bounds = array<i64: 128, 128>}, {pipeline_mode = #tpu.pipeline_mode<synchronous>, transform_indices = @transform_5, window_bounds = array<i64: 1, 128>}, {transform_indices = @transform_6, window_bounds = array<i64: 1, 256, 128>}]} {
    %c0_i32 = arith.constant 0 : i32
    %0 = arith.cmpi eq, %arg2, %c0_i32 : i32
    %1 = arith.extui %0 : i1 to i32
    %c0_i32_0 = arith.constant 0 : i32
    %2 = arith.cmpi ne, %1, %c0_i32_0 : i32
    scf.if %2 {
      %cst_26 = arith.constant -1.000000e+30 : f32
      %36 = vector.broadcast %cst_26 : f32 to vector<256x1xf32>
      %c0_27 = arith.constant 0 : index
      %c0_28 = arith.constant 0 : index
      %37 = vector.load %arg10[%c0_27, %c0_28] : memref<256x1xf32, #tpu.memory_space<vmem>>, vector<256x1xf32>
      tpu.vector_store %arg10[%c0_27, %c0_28], %36 {strides = array<i32>} : memref<256x1xf32, #tpu.memory_space<vmem>>, vector<256x1xf32>,
      %cst_29 = arith.constant 0.000000e+00 : f32
      %38 = vector.broadcast %cst_29 : f32 to vector<256x1xf32>
      %c0_30 = arith.constant 0 : index
      %c0_31 = arith.constant 0 : index
      %39 = vector.load %arg11[%c0_30, %c0_31] : memref<256x1xf32, #tpu.memory_space<vmem>>, vector<256x1xf32>
      tpu.vector_store %arg11[%c0_30, %c0_31], %38 {strides = array<i32>} : memref<256x1xf32, #tpu.memory_space<vmem>>, vector<256x1xf32>,
      %cst_32 = arith.constant 0.000000e+00 : f32
      %40 = vector.broadcast %cst_32 : f32 to vector<256x128xf32>
      %c0_33 = arith.constant 0 : index
      %c0_34 = arith.constant 0 : index
      %41 = vector.load %arg12[%c0_33, %c0_34] : memref<256x128xf32, #tpu.memory_space<vmem>>, vector<256x128xf32>
      tpu.vector_store %arg12[%c0_33, %c0_34], %40 {strides = array<i32>} : memref<256x128xf32, #tpu.memory_space<vmem>>, vector<256x128xf32>,
    } else {
    }
    %c0 = arith.constant 0 : index
    %c0_1 = arith.constant 0 : index
    %c0_2 = arith.constant 0 : index
    %3 = vector.load %arg3[%c0, %c0_1, %c0_2] : memref<1x256x128xbf16, #tpu.memory_space<vmem>>, vector<1x256x128xbf16>
    %4 = vector.shape_cast %3 : vector<1x256x128xbf16> to vector<256x128xbf16>
    %c0_3 = arith.constant 0 : index
    %c0_4 = arith.constant 0 : index
    %c0_5 = arith.constant 0 : index
    %5 = vector.load %arg4[%c0_3, %c0_4, %c0_5] : memref<1x256x128xbf16, #tpu.memory_space<vmem>>, vector<1x256x128xbf16>
    %6 = vector.shape_cast %5 : vector<1x256x128xbf16> to vector<256x128xbf16>
    %cst = arith.constant dense<0.000000e+00> : vector<256x256xf32>
    %7 = tpu.matmul %4, %6, %cst {dimension_numbers = #tpu.dot_dimension_numbers<[1], [1], [0], [0], [0, 0, 1, 0], [], []>} : vector<256x128xbf16>, vector<256x128xbf16>, vector<256x256xf32> -> vector<256x256xf32>
    %c0_6 = arith.constant 0 : index
    %c0_7 = arith.constant 0 : index
    %8 = vector.load %arg10[%c0_6, %c0_7] : memref<256x1xf32, #tpu.memory_space<vmem>>, vector<256x1xf32>
    %cst_8 = arith.constant dense<0xFF800000> : vector<256xf32>
    %9 = vector.multi_reduction <maximumf>, %7, %cst_8 [1] : vector<256x256xf32> to vector<256xf32>
    %10 = vector.shape_cast %9 : vector<256xf32> to vector<256x1xf32>
    %11 = arith.maximumf %8, %10 : vector<256x1xf32>
    %12 = arith.subf %8, %11 : vector<256x1xf32>
    %13 = math.exp %12 : vector<256x1xf32>
    %14 = vector.broadcast %11 : vector<256x1xf32> to vector<256x256xf32>
    %15 = arith.subf %7, %14 : vector<256x256xf32>
    %16 = math.exp %15 : vector<256x256xf32>
    %c0_9 = arith.constant 0 : index
    %c0_10 = arith.constant 0 : index
    %17 = vector.load %arg11[%c0_9, %c0_10] : memref<256x1xf32, #tpu.memory_space<vmem>>, vector<256x1xf32>
    %18 = arith.mulf %13, %17 : vector<256x1xf32>
    %cst_11 = arith.constant dense<0.000000e+00> : vector<256xf32>
    %19 = vector.multi_reduction <add>, %16, %cst_11 [1] : vector<256x256xf32> to vector<256xf32>
    %20 = vector.shape_cast %19 : vector<256xf32> to vector<256x1xf32>
    %21 = arith.addf %18, %20 : vector<256x1xf32>
    %c0_12 = arith.constant 0 : index
    %c0_13 = arith.constant 0 : index
    %22 = vector.load %arg11[%c0_12, %c0_13] : memref<256x1xf32, #tpu.memory_space<vmem>>, vector<256x1xf32>
    tpu.vector_store %arg11[%c0_12, %c0_13], %21 {strides = array<i32>} : memref<256x1xf32, #tpu.memory_space<vmem>>, vector<256x1xf32>,
    %c0_14 = arith.constant 0 : index
    %c0_15 = arith.constant 0 : index
    %23 = vector.load %arg12[%c0_14, %c0_15] : memref<256x128xf32, #tpu.memory_space<vmem>>, vector<256x128xf32>
    %24 = vector.broadcast %13 : vector<256x1xf32> to vector<256x128xf32>
    %25 = arith.mulf %24, %23 : vector<256x128xf32>
    %26 = arith.truncf %16 : vector<256x256xf32> to vector<256x256xbf16>
    %c0_16 = arith.constant 0 : index
    %c0_17 = arith.constant 0 : index
    %c0_18 = arith.constant 0 : index
    %27 = vector.load %arg5[%c0_16, %c0_17, %c0_18] : memref<1x256x128xbf16, #tpu.memory_space<vmem>>, vector<1x256x128xbf16>
    %28 = vector.shape_cast %27 : vector<1x256x128xbf16> to vector<256x128xbf16>
    %cst_19 = arith.constant dense<0.000000e+00> : vector<256x128xf32>
    %29 = tpu.matmul %26, %28, %cst_19 {dimension_numbers = #tpu.dot_dimension_numbers<[1], [0], [0], [1], [0, 0, 1, 1], [], []>} : vector<256x256xbf16>, vector<256x128xbf16>, vector<256x128xf32> -> vector<256x128xf32>
    %30 = arith.addf %25, %29 : vector<256x128xf32>
    %c0_20 = arith.constant 0 : index
    %c0_21 = arith.constant 0 : index
    %31 = vector.load %arg12[%c0_20, %c0_21] : memref<256x128xf32, #tpu.memory_space<vmem>>, vector<256x128xf32>
    tpu.vector_store %arg12[%c0_20, %c0_21], %30 {strides = array<i32>} : memref<256x128xf32, #tpu.memory_space<vmem>>, vector<256x128xf32>,
    %c0_22 = arith.constant 0 : index
    %c0_23 = arith.constant 0 : index
    %32 = vector.load %arg10[%c0_22, %c0_23] : memref<256x1xf32, #tpu.memory_space<vmem>>, vector<256x1xf32>
    tpu.vector_store %arg10[%c0_22, %c0_23], %11 {strides = array<i32>} : memref<256x1xf32, #tpu.memory_space<vmem>>, vector<256x1xf32>,
    %c0_i32_24 = arith.constant 0 : i32
    %33 = arith.cmpi eq, %arg2, %c0_i32_24 : i32
    %34 = arith.extui %33 : i1 to i32
    %c0_i32_25 = arith.constant 0 : i32
    %35 = arith.cmpi ne, %34, %c0_i32_25 : i32
    scf.if %35 {
      %c0_26 = arith.constant 0 : index
      %c0_27 = arith.constant 0 : index
      %36 = vector.load %arg12[%c0_26, %c0_27] : memref<256x128xf32, #tpu.memory_space<vmem>>, vector<256x128xf32>
      %c0_28 = arith.constant 0 : index
      %c0_29 = arith.constant 0 : index
      %37 = vector.load %arg11[%c0_28, %c0_29] : memref<256x1xf32, #tpu.memory_space<vmem>>, vector<256x1xf32>
      %cst_30 = arith.constant 1.000000e+00 : f32
      %38 = vector.broadcast %cst_30 : f32 to vector<256x1xf32>
      %39 = arith.divf %38, %37 : vector<256x1xf32>
      %40 = vector.broadcast %39 : vector<256x1xf32> to vector<256x128xf32>
      %41 = arith.mulf %36, %40 : vector<256x128xf32>
      %42 = arith.truncf %41 : vector<256x128xf32> to vector<256x128xbf16>
      %c0_31 = arith.constant 0 : index
      %c0_32 = arith.constant 0 : index
      %43 = vector.load %arg7[%c0_31, %c0_32] : memref<128x128xbf16, #tpu.memory_space<vmem>>, vector<128x128xbf16>
      %cst_33 = arith.constant dense<0.000000e+00> : vector<256x128xf32>
      %44 = tpu.matmul %42, %43, %cst_33 {dimension_numbers = #tpu.dot_dimension_numbers<[1], [0], [0], [1], [0, 0, 1, 1], [], []>} : vector<256x128xbf16>, vector<128x128xbf16>, vector<256x128xf32> -> vector<256x128xf32>
      %c0_34 = arith.constant 0 : index
      %c0_35 = arith.constant 0 : index
      %45 = vector.load %arg8[%c0_34, %c0_35] : memref<1x128xf32, #tpu.memory_space<vmem>>, vector<1x128xf32>
      %46 = vector.broadcast %45 : vector<1x128xf32> to vector<256x128xf32>
      %47 = arith.addf %44, %46 : vector<256x128xf32>
      %c0_36 = arith.constant 0 : index
      %c0_37 = arith.constant 0 : index
      %c0_38 = arith.constant 0 : index
      %48 = vector.load %arg6[%c0_36, %c0_37, %c0_38] : memref<1x256x128xf32, #tpu.memory_space<vmem>>, vector<1x256x128xf32>
      %49 = vector.shape_cast %48 : vector<1x256x128xf32> to vector<256x128xf32>
      %50 = arith.addf %47, %49 : vector<256x128xf32>
      %c0_39 = arith.constant 0 : index
      %c0_40 = arith.constant 0 : index
      %c0_41 = arith.constant 0 : index
      %51 = vector.load %arg9[%c0_39, %c0_40, %c0_41] : memref<1x256x128xf32, #tpu.memory_space<vmem>>, vector<1x256x128xf32>
      %52 = vector.shape_cast %51 : vector<1x256x128xf32> to vector<256x128xf32>
      %53 = vector.shape_cast %50 : vector<256x128xf32> to vector<1x256x128xf32>
      tpu.vector_store %arg9[%c0_39, %c0_40, %c0_41], %53 {strides = array<i32>} : memref<1x256x128xf32, #tpu.memory_space<vmem>>, vector<1x256x128xf32>,
    } else {
    }
    return
  }
  func.func @transform_0(%arg0: i32, %arg1: i32, %arg2: i32) -> (i32, i32, i32) {
    %c0_i32 = arith.constant 0 : i32
    %c0_i32_0 = arith.constant 0 : i32
    return %arg0, %arg1, %c0_i32 : i32, i32, i32
  }
  func.func @transform_1(%arg0: i32, %arg1: i32, %arg2: i32) -> (i32, i32, i32) {
    %c0_i32 = arith.constant 0 : i32
    %c0_i32_0 = arith.constant 0 : i32
    return %arg0, %arg2, %c0_i32 : i32, i32, i32
  }
  func.func @transform_2(%arg0: i32, %arg1: i32, %arg2: i32) -> (i32, i32, i32) {
    %c0_i32 = arith.constant 0 : i32
    %c0_i32_0 = arith.constant 0 : i32
    return %arg0, %arg2, %c0_i32 : i32, i32, i32
  }
  func.func @transform_3(%arg0: i32, %arg1: i32, %arg2: i32) -> (i32, i32, i32) {
    %c0_i32 = arith.constant 0 : i32
    %c0_i32_0 = arith.constant 0 : i32
    return %arg0, %arg1, %c0_i32 : i32, i32, i32
  }
  func.func @transform_4(%arg0: i32, %arg1: i32, %arg2: i32) -> (i32, i32) {
    %c0_i32 = arith.constant 0 : i32
    %c0_i32_0 = arith.constant 0 : i32
    %c0_i32_1 = arith.constant 0 : i32
    return %c0_i32, %c0_i32_0 : i32, i32
  }
  func.func @transform_5(%arg0: i32, %arg1: i32, %arg2: i32) -> (i32, i32) {
    %c0_i32 = arith.constant 0 : i32
    %c0_i32_0 = arith.constant 0 : i32
    %c0_i32_1 = arith.constant 0 : i32
    return %c0_i32, %c0_i32_0 : i32, i32
  }
  func.func @transform_6(%arg0: i32, %arg1: i32, %arg2: i32) -> (i32, i32, i32) {
    %c0_i32 = arith.constant 0 : i32
    %c0_i32_0 = arith.constant 0 : i32
    return %arg0, %arg1, %c0_i32 : i32, i32, i32
  }
}

</mosaic_0001>

<bundles_post_ra>
// kernel: nonlocal_embedded_gaussian.1
= control target key start
LH: loop header
LB: loop body
LE: loop exit
PB: predicated region body
PF: predicated region fallthrough
CT: control target
= control target key end

     0   :  { %s4259_s21 = smov 0   ;;  %s4261_s22 = smov 0   ;;  %s6040_s0 = inlined_call_operand.vmem [shape: bf16[2,256,128], index: 0, kind: input, shape index: {}]   ;;  %s6041_s1 = inlined_call_operand.vmem [shape: bf16[2,256,128], index: 1, kind: input, shape index: {}]   ;;  %s6042_s2 = inlined_call_operand.vmem [shape: bf16[2,256,128], index: 2, kind: input, shape index: {}]   ;;  %s6043_s3 = inlined_call_operand.vmem [shape: f32[2,256,128], index: 3, kind: input, shape index: {}]   ;;  %s6044_s4 = inlined_call_operand.vmem [shape: bf16[128,128], index: 4, kind: input, shape index: {}]   ;;  %s6045_s5 = inlined_call_operand.vmem [shape: f32[1,128], index: 5, kind: input, shape index: {}]   ;;  %s6046_s6 = inlined_call_operand.vmem [shape: f32[2,256,128], index: 6, kind: output, shape index: {}]  }
   0x1   :  { %s4263_s23 = smov 0  }
   0x2 LB: > { %s35_s24 = sadd.s32 1, %s4215_s22  ;;  %p3588_p0 = scmp.ge.s32.totalorder %s4219_s23, 1  ;;  %s4219_s23 = sphi %s4263_s23, %s16_s23   ;;  %s4215_s22 = sphi %s4261_s22, %s6360_s22   ;;  %s4211_s21 = sphi %s4259_s21, %s6359_s21  }
   0x3   : > { %p37_p1 = scmp.ge.s32.totalorder %s35_s24, 2  ;;  %p291_p2 = scmp.lt.s32.totalorder %s4219_s23, 3 }
   0x5   : > { %s6362_s24 = smov (%p37_p1, %s35_s24), 0  ;;  %p292_p3 = pnand %p3588_p0, %p291_p2 }
   0x7   : > { %295 = sbr.rel (%p292_p3) target bundleno = 1726 (0x6be), region = 44 }
   0xc   : > { %p357_p4 = scmp.lt.s32.totalorder %s4211_s21, 1  ;;  %vm410_vm0 = vcmask 7168   ;;  %v4221_v61 = vmov -1e+30  }
   0xd   : > { %411 = vst.msk [vmem:[#allocation2] sm:$0xff] %vm410_vm0, %v4221_v61 }
   0xe   : > { %s6364_s21 = smov (!%p357_p4, %s4211_s21), 1  ;;  %412 = vst.msk [vmem:[#allocation2 + $0x8] sm:$0xff] %vm410_vm0, %v4221_v61 }
   0xf   : > { %s4280_s25 = sshll.u32 %s6364_s21, 7  ;;  %413 = vst.msk [vmem:[#allocation2 + $0x10] sm:$0xff] %vm410_vm0, %v4221_v61 }
  0x10   : > { %s374_s28 = scalar_lea.vmem %s6041_s1, %s4280_s25  ;;  %s4290_s7 = scalar_lea.vmem %s6040_s0, %s4280_s25  ;;  %414 = vst.msk [vmem:[#allocation2 + $0x18] sm:$0xff] %vm410_vm0, %v4221_v61 }
  0x11   : > { %v3853_v0 = vld [vmem:[%s374_s28 + $0x38] sm:$0xff]  ;;  %v3852_v2 = vld [vmem:[%s374_s28 + $0x30] sm:$0xff]  ;;  %v3851_v4 = vld [vmem:[%s374_s28 + $0x28] sm:$0xff]  ;;  %415 = vst.msk [vmem:[#allocation2 + $0x20] sm:$0xff] %vm410_vm0, %v4221_v61  ;;  %s4638_s10 = scalar_lea.vmem %s6042_s2, %s4280_s25 }
  0x12   : > { %v3861_v1 = vld [vmem:[%s374_s28 + $0x78] sm:$0xff]  ;;  %763 = vmatpush.bf16.xpose.msra.mxu0 %v3853_v0  ;;  %v3860_v3 = vld [vmem:[%s374_s28 + $0x70] sm:$0xff]  ;;  %v3859_v5 = vld [vmem:[%s374_s28 + $0x68] sm:$0xff]  ;;  %416 = vst.msk [vmem:[#allocation2 + $0x28] sm:$0xff] %vm410_vm0, %v4221_v61 }
  0x13   : > { %852 = vmatpush.bf16.xpose.msra.mxu1 %v3861_v1  ;;  %v3850_v6 = vld [vmem:[%s374_s28 + $0x20] sm:$0xff]  ;;  %v3849_v8 = vld [vmem:[%s374_s28 + $0x18] sm:$0xff]  ;;  %v3848_v10 = vld [vmem:[%s374_s28 + $0x10] sm:$0xff]  ;;  %417 = vst.msk [vmem:[#allocation2 + $0x30] sm:$0xff] %vm410_vm0, %v4221_v61 }
  0x14   : > { %v3858_v7 = vld [vmem:[%s374_s28 + $0x60] sm:$0xff]  ;;  %v3857_v9 = vld [vmem:[%s374_s28 + $0x58] sm:$0xff]  ;;  %v3856_v11 = vld [vmem:[%s374_s28 + $0x50] sm:$0xff]  ;;  %418 = vst.msk [vmem:[#allocation2 + $0x38] sm:$0xff] %vm410_vm0, %v4221_v61 }
  0x15   : > { %v3847_v12 = vld [vmem:[%s374_s28 + $0x8] sm:$0xff]  ;;  %v3846_v14 = vld [vmem:[%s374_s28] sm:$0xff]  ;;  %v3832_v18 = vld [vmem:[%s4290_s7 + $0x10] sm:$0xff]  ;;  %419 = vst.msk [vmem:[#allocation2 + $0x40] sm:$0xff] %vm410_vm0, %v4221_v61 }
  0x16   : > { %v3855_v13 = vld [vmem:[%s374_s28 + $0x48] sm:$0xff]  ;;  %v3854_v15 = vld [vmem:[%s374_s28 + $0x40] sm:$0xff]  ;;  %v3833_v19 = vld [vmem:[%s4290_s7 + $0x18] sm:$0xff]  ;;  %420 = vst.msk [vmem:[#allocation2 + $0x48] sm:$0xff] %vm410_vm0, %v4221_v61 }
  0x17   : > { %v3830_v16 = vld [vmem:[%s4290_s7] sm:$0xff]  ;;  %v3831_v17 = vld [vmem:[%s4290_s7 + $0x8] sm:$0xff]  ;;  %v3836_v22 = vld [vmem:[%s4290_s7 + $0x30] sm:$0xff]  ;;  %421 = vst.msk [vmem:[#allocation2 + $0x50] sm:$0xff] %vm410_vm0, %v4221_v61 }
  0x18   : > { %v3834_v20 = vld [vmem:[%s4290_s7 + $0x20] sm:$0xff]  ;;  %v3835_v21 = vld [vmem:[%s4290_s7 + $0x28] sm:$0xff]  ;;  %v3837_v23 = vld [vmem:[%s4290_s7 + $0x38] sm:$0xff]  ;;  %422 = vst.msk [vmem:[#allocation2 + $0x58] sm:$0xff] %vm410_vm0, %v4221_v61 }
  0x19   : > { %v3838_v24 = vld [vmem:[%s4290_s7 + $0x40] sm:$0xff]  ;;  %v3839_v31 = vld [vmem:[%s4290_s7 + $0x48] sm:$0xff]  ;;  %v3840_v38 = vld [vmem:[%s4290_s7 + $0x50] sm:$0xff]  ;;  %423 = vst.msk [vmem:[#allocation2 + $0x60] sm:$0xff] %vm410_vm0, %v4221_v61 }
  0x1a   : > { %764 = vmatpush.bf16.xpose.msra.mxu0 %v3852_v2  ;;  %v3841_v45 = vld [vmem:[%s4290_s7 + $0x58] sm:$0xff]  ;;  %v3842_v52 = vld [vmem:[%s4290_s7 + $0x60] sm:$0xff]  ;;  %424 = vst.msk [vmem:[#allocation2 + $0x68] sm:$0xff] %vm410_vm0, %v4221_v61 }
  0x1b   : > { %853 = vmatpush.bf16.xpose.msra.mxu1 %v3860_v3  ;;  %425 = vst.msk [vmem:[#allocation2 + $0x70] sm:$0xff] %vm410_vm0, %v4221_v61 }
  0x1c   : > { %426 = vst.msk [vmem:[#allocation2 + $0x78] sm:$0xff] %vm410_vm0, %v4221_v61 }
  0x1d   : > { %427 = vst.msk [vmem:[#allocation2 + $0x80] sm:$0xff] %vm410_vm0, %v4221_v61 }
  0x1e   : > { %428 = vst.msk [vmem:[#allocation2 + $0x88] sm:$0xff] %vm410_vm0, %v4221_v61 }
  0x1f   : > { %429 = vst.msk [vmem:[#allocation2 + $0x90] sm:$0xff] %vm410_vm0, %v4221_v61 }
  0x20   : > { %430 = vst.msk [vmem:[#allocation2 + $0x98] sm:$0xff] %vm410_vm0, %v4221_v61 }
  0x21   : > { %431 = vst.msk [vmem:[#allocation2 + $0xa0] sm:$0xff] %vm410_vm0, %v4221_v61 }
  0x22   : > { %765 = vmatpush.bf16.xpose.msra.mxu0 %v3851_v4  ;;  %432 = vst.msk [vmem:[#allocation2 + $0xa8] sm:$0xff] %vm410_vm0, %v4221_v61 }
  0x23   : > { %854 = vmatpush.bf16.xpose.msra.mxu1 %v3859_v5  ;;  %433 = vst.msk [vmem:[#allocation2 + $0xb0] sm:$0xff] %vm410_vm0, %v4221_v61  ;;  %v3843_v5 = vld [vmem:[%s4290_s7 + $0x68] sm:$0xff] }
  0x24   : > { %434 = vst.msk [vmem:[#allocation2 + $0xb8] sm:$0xff] %vm410_vm0, %v4221_v61 }
  0x25   : > { %435 = vst.msk [vmem:[#allocation2 + $0xc0] sm:$0xff] %vm410_vm0, %v4221_v61 }
  0x26   : > { %436 = vst.msk [vmem:[#allocation2 + $0xc8] sm:$0xff] %vm410_vm0, %v4221_v61 }
  0x27   : > { %437 = vst.msk [vmem:[#allocation2 + $0xd0] sm:$0xff] %vm410_vm0, %v4221_v61 }
  0x28   : > { %438 = vst.msk [vmem:[#allocation2 + $0xd8] sm:$0xff] %vm410_vm0, %v4221_v61 }
  0x29   : > { %439 = vst.msk [vmem:[#allocation2 + $0xe0] sm:$0xff] %vm410_vm0, %v4221_v61 }
  0x2a   : > { %766 = vmatpush.bf16.xpose.msra.mxu0 %v3850_v6  ;;  %440 = vst.msk [vmem:[#allocation2 + $0xe8] sm:$0xff] %vm410_vm0, %v4221_v61 }
  0x2b   : > { %855 = vmatpush.bf16.xpose.msra.mxu1 %v3858_v7  ;;  %441 = vst.msk [vmem:[#allocation2 + $0xf0] sm:$0xff] %vm410_vm0, %v4221_v61 }
  0x2c   : > { %442 = vst.msk [vmem:[#allocation2 + $0xf8] sm:$0xff] %vm410_vm0, %v4221_v61 }
  0x32   : > { %767 = vmatpush.bf16.xpose.msra.mxu0 %v3849_v8 }
  0x33   : > { %856 = vmatpush.bf16.xpose.msra.mxu1 %v3857_v9  ;;  %v4222_v9 = vmov 0  }
  0x34   : > { %3937 = vset.pattern.permute.xlu2 %v4222_v9  ;;  %3938 = vset.pattern.permute.xlu0 %v4222_v9 }
  0x35   : > { %3939 = vset.pattern.permute.xlu1 %v4222_v9 }
  0x3a   : > { %768 = vmatpush.bf16.xpose.msra.mxu0 %v3848_v10 }
  0x3b   : > { %857 = vmatpush.bf16.xpose.msra.mxu1 %v3856_v11 }
  0x42   : > { %769 = vmatpush.bf16.xpose.msra.mxu0 %v3847_v12  ;;  %v4223_v12 = vmov 0.0  }
  0x43   : > { %858 = vmatpush.bf16.xpose.msra.mxu1 %v3855_v13  ;;  %443 = vst.msk [vmem:[#allocation3] sm:$0xff] %vm410_vm0, %v4223_v12 }
  0x44   : > { %444 = vst.msk [vmem:[#allocation3 + $0x8] sm:$0xff] %vm410_vm0, %v4223_v12 }
  0x45   : > { %445 = vst.msk [vmem:[#allocation3 + $0x10] sm:$0xff] %vm410_vm0, %v4223_v12 }
  0x46   : > { %446 = vst.msk [vmem:[#allocation3 + $0x18] sm:$0xff] %vm410_vm0, %v4223_v12 }
  0x47   : > { %447 = vst.msk [vmem:[#allocation3 + $0x20] sm:$0xff] %vm410_vm0, %v4223_v12 }
  0x48   : > { %448 = vst.msk [vmem:[#allocation3 + $0x28] sm:$0xff] %vm410_vm0, %v4223_v12 }
  0x49   : > { %449 = vst.msk [vmem:[#allocation3 + $0x30] sm:$0xff] %vm410_vm0, %v4223_v12 }
  0x4a   : > { %770 = vmatpush.bf16.xpose.msra.mxu0 %v3846_v14  ;;  %v941_v14 = vld [vmem:[#allocation2] sm:$0xff]  ;;  %450 = vst.msk [vmem:[#allocation3 + $0x38] sm:$0xff] %vm410_vm0, %v4223_v12 }
  0x4b   : > { %859 = vmatpush.bf16.xpose.msra.mxu1 %v3854_v15  ;;  %451 = vst.msk [vmem:[#allocation3 + $0x40] sm:$0xff] %vm410_vm0, %v4223_v12 }
  0x4c   : > { %452 = vst.msk [vmem:[#allocation3 + $0x48] sm:$0xff] %vm410_vm0, %v4223_v12 }
  0x4d   : > { %453 = vst.msk [vmem:[#allocation3 + $0x50] sm:$0xff] %vm410_vm0, %v4223_v12 }
  0x4e   : > { %454 = vst.msk [vmem:[#allocation3 + $0x58] sm:$0xff] %vm410_vm0, %v4223_v12 }
  0x4f   : > { %455 = vst.msk [vmem:[#allocation3 + $0x60] sm:$0xff] %vm410_vm0, %v4223_v12 }
  0x50   : > { %456 = vst.msk [vmem:[#allocation3 + $0x68] sm:$0xff] %vm410_vm0, %v4223_v12 }
  0x51   : > { %771 = vmatmul.bf16.vlgmr.msra.gmra.mxu0 %v3830_v16  ;;  %457 = vst.msk [vmem:[#allocation3 + $0x70] sm:$0xff] %vm410_vm0, %v4223_v12 }
  0x52   : > { %860 = vmatmul.bf16.vlgmr.msra.gmra.mxu1 %v3830_v16  ;;  %458 = vst.msk [vmem:[#allocation3 + $0x78] sm:$0xff] %vm410_vm0, %v4223_v12 }
  0x53   : > { %459 = vst.msk [vmem:[#allocation3 + $0x80] sm:$0xff] %vm410_vm0, %v4223_v12 }
  0x54   : > { %460 = vst.msk [vmem:[#allocation3 + $0x88] sm:$0xff] %vm410_vm0, %v4223_v12 }
  0x55   : > { %461 = vst.msk [vmem:[#allocation3 + $0x90] sm:$0xff] %vm410_vm0, %v4223_v12 }
  0x56   : > { %462 = vst.msk [vmem:[#allocation3 + $0x98] sm:$0xff] %vm410_vm0, %v4223_v12 }
  0x57   : > { %463 = vst.msk [vmem:[#allocation3 + $0xa0] sm:$0xff] %vm410_vm0, %v4223_v12 }
  0x58   : > { %464 = vst.msk [vmem:[#allocation3 + $0xa8] sm:$0xff] %vm410_vm0, %v4223_v12 }
  0x59   : > { %465 = vst.msk [vmem:[#allocation3 + $0xb0] sm:$0xff] %vm410_vm0, %v4223_v12 }
  0x5a   : > { %466 = vst.msk [vmem:[#allocation3 + $0xb8] sm:$0xff] %vm410_vm0, %v4223_v12 }
  0x5b   : > { %467 = vst.msk [vmem:[#allocation3 + $0xc0] sm:$0xff] %vm410_vm0, %v4223_v12 }
  0x5c   : > { %468 = vst.msk [vmem:[#allocation3 + $0xc8] sm:$0xff] %vm410_vm0, %v4223_v12 }
  0x5d   : > { %469 = vst.msk [vmem:[#allocation3 + $0xd0] sm:$0xff] %vm410_vm0, %v4223_v12 }
  0x5e   : > { %470 = vst.msk [vmem:[#allocation3 + $0xd8] sm:$0xff] %vm410_vm0, %v4223_v12 }
  0x5f   : > { %471 = vst.msk [vmem:[#allocation3 + $0xe0] sm:$0xff] %vm410_vm0, %v4223_v12 }
  0x60   : > { %472 = vst.msk [vmem:[#allocation3 + $0xe8] sm:$0xff] %vm410_vm0, %v4223_v12 }
  0x61   : > { %776 = vmatmul.bf16.gmra.mxu0 %v3831_v17  ;;  %473 = vst.msk [vmem:[#allocation3 + $0xf0] sm:$0xff] %vm410_vm0, %v4223_v12 }
  0x62   : > { %865 = vmatmul.bf16.gmra.mxu1 %v3831_v17  ;;  %474 = vst.msk [vmem:[#allocation3 + $0xf8] sm:$0xff] %vm410_vm0, %v4223_v12  ;;  %v4558_v12 = vld [vmem:[#allocation2 + $0x28] sm:$0xff] }
  0x63   : > { %6149 = vst [vmem:[#allocation20_spill] sm:$0xff] %v4558_v12 }
  0x71   : > { %781 = vmatmul.bf16.gmra.mxu0 %v3832_v18 }
  0x72   : > { %870 = vmatmul.bf16.gmra.mxu1 %v3832_v18 }
  0x81   : > { %786 = vmatmul.bf16.gmra.mxu0 %v3833_v19 }
  0x82   : > { %875 = vmatmul.bf16.gmra.mxu1 %v3833_v19 }
  0x91   : > { %791 = vmatmul.bf16.gmra.mxu0 %v3834_v20 }
  0x92   : > { %880 = vmatmul.bf16.gmra.mxu1 %v3834_v20  ;;  %v4459_v20 = vld [vmem:[#allocation2 + $0x8] sm:$0xff] }
  0x93   : > { %6135 = vst [vmem:[#allocation6_spill] sm:$0xff] %v4459_v20 }
  0xa1   : > { %796 = vmatmul.bf16.gmra.mxu0 %v3835_v21 }
  0xa2   : > { %885 = vmatmul.bf16.gmra.mxu1 %v3835_v21 }
  0xb1   : > { %801 = vmatmul.bf16.gmra.mxu0 %v3836_v22 }
  0xb2   : > { %890 = vmatmul.bf16.gmra.mxu1 %v3836_v22 }
  0xc1   : > { %806 = vmatmul.bf16.gmra.mxu0 %v3837_v23 }
  0xc2   : > { %895 = vmatmul.bf16.gmra.mxu1 %v3837_v23 }
  0xce   : > { %v4301_v25 = vpop.f32.mrf.mxu0 }
  0xcf   : > { %v4303_v26 = vpop.f32.mrf.mxu1 }
  0xd0   : > { %v973_v27 = vmax.f32 %v4301_v25, %v4303_v26 }
  0xd1   : > { %811 = vmatmul.bf16.gmra.mxu0 %v3838_v24 }
  0xd2   : > { %900 = vmatmul.bf16.gmra.mxu1 %v3838_v24  ;;  %974 = vmax.xlane.f32.xlu0 %v973_v27 }
  0xd6   : > { %v4307_v28 = vpop.f32.mrf.mxu0 }
  0xd7   : > { %v4309_v29 = vpop.f32.mrf.mxu1 }
  0xd8   : > { %v976_v30 = vmax.f32 %v4307_v28, %v4309_v29 }
  0xda   : > { %977 = vmax.xlane.f32.xlu0 %v976_v30  ;;  %v4593_v30 = vld [vmem:[#allocation2 + $0x40] sm:$0xff] }
  0xdb   : > { %6159 = vst [vmem:[#allocation30_spill] sm:$0xff] %v4593_v30 }
  0xde   : > { %v4314_v32 = vpop.f32.mrf.mxu0 }
  0xdf   : > { %v4316_v33 = vpop.f32.mrf.mxu1 }
  0xe0   : > { %v979_v34 = vmax.f32 %v4314_v32, %v4316_v33 }
  0xe1   : > { %816 = vmatmul.bf16.gmra.mxu0 %v3839_v31 }
  0xe2   : > { %980 = vmax.xlane.f32.xlu1 %v979_v34  ;;  %905 = vmatmul.bf16.gmra.mxu1 %v3839_v31  ;;  %v4486_v31 = vld [vmem:[#allocation2 + $0x10] sm:$0xff] }
  0xe3   : > { %6139 = vst [vmem:[#allocation10_spill] sm:$0xff] %v4486_v31 }
  0xe6   : > { %v4320_v35 = vpop.f32.mrf.mxu0 }
  0xe7   : > { %v4322_v36 = vpop.f32.mrf.mxu1 }
  0xe8   : > { %v982_v37 = vmax.f32 %v4320_v35, %v4322_v36 }
  0xea   : > { %983 = vmax.xlane.f32.xlu1 %v982_v37 }
  0xee   : > { %v4327_v39 = vpop.f32.mrf.mxu0 }
  0xef   : > { %v4329_v40 = vpop.f32.mrf.mxu1 }
  0xf0   : > { %v985_v41 = vmax.f32 %v4327_v39, %v4329_v40 }
  0xf1   : > { %821 = vmatmul.bf16.gmra.mxu0 %v3840_v38 }
  0xf2   : > { %986 = vmax.xlane.f32.xlu2 %v985_v41  ;;  %910 = vmatmul.bf16.gmra.mxu1 %v3840_v38 }
  0xf6   : > { %v4333_v42 = vpop.f32.mrf.mxu0 }
  0xf7   : > { %v4335_v43 = vpop.f32.mrf.mxu1 }
  0xf8   : > { %v988_v44 = vmax.f32 %v4333_v42, %v4335_v43 }
  0xfa   : > { %989 = vmax.xlane.f32.xlu2 %v988_v44 }
  0xfe   : > { %v4340_v46 = vpop.f32.mrf.mxu0 }
  0xff   : > { %v4342_v47 = vpop.f32.mrf.mxu1 }
 0x100   : > { %v991_v48 = vmax.f32 %v4340_v46, %v4342_v47 }
 0x101   : > { %826 = vmatmul.bf16.gmra.mxu0 %v3841_v45 }
 0x102   : > { %992 = vmax.xlane.f32.xlu0 %v991_v48  ;;  %915 = vmatmul.bf16.gmra.mxu1 %v3841_v45 }
 0x106   : > { %v4346_v49 = vpop.f32.mrf.mxu0 }
 0x107   : > { %v4348_v50 = vpop.f32.mrf.mxu1 }
 0x108   : > { %v994_v51 = vmax.f32 %v4346_v49, %v4348_v50 }
 0x10a   : > { %995 = vmax.xlane.f32.xlu1 %v994_v51  ;;  %v4513_v51 = vld [vmem:[#allocation2 + $0x18] sm:$0xff] }
 0x10b   : > { %6143 = vst [vmem:[#allocation14_spill] sm:$0xff] %v4513_v51 }
 0x10e   : > { %v4353_v53 = vpop.f32.mrf.mxu0 }
 0x10f   : > { %v4355_v54 = vpop.f32.mrf.mxu1 }
 0x110   : > { %v997_v55 = vmax.f32 %v4353_v53, %v4355_v54 }
 0x111   : > { %831 = vmatmul.bf16.gmra.mxu0 %v3842_v52 }
 0x112   : > { %998 = vmax.xlane.f32.xlu2 %v997_v55  ;;  %920 = vmatmul.bf16.gmra.mxu1 %v3842_v52 }
 0x116   : > { %v4359_v56 = vpop.f32.mrf.mxu0 }
 0x117   : > { %v4361_v57 = vpop.f32.mrf.mxu1 }
 0x118   : > { %v1000_v58 = vmax.f32 %v4359_v56, %v4361_v57 }
 0x11a   : > { %1001 = vmax.xlane.f32.xlu0 %v1000_v58 }
 0x11e   : > { %v4365_v59 = vpop.f32.mrf.mxu0 }
 0x11f   : > { %v4367_v60 = vpop.f32.mrf.mxu1 }
 0x120   : > { %v1003_v62 = vmax.f32 %v4365_v59, %v4367_v60 }
 0x121   : > { %836 = vmatmul.bf16.gmra.mxu0 %v3843_v5 }
 0x122   : > { %1004 = vmax.xlane.f32.xlu1 %v1003_v62  ;;  %925 = vmatmul.bf16.gmra.mxu1 %v3843_v5 }
 0x126   : > { %v4379_v63 = vpop.f32.mrf.mxu0 }
 0x127   : > { %v4381_v0 = vpop.f32.mrf.mxu1 }
 0x128   : > { %v1006_v1 = vmax.f32 %v4379_v63, %v4381_v0 }
 0x12a   : > { %1007 = vmax.xlane.f32.xlu2 %v1006_v1  ;;  %v4541_v1 = vld [vmem:[#allocation2 + $0x20] sm:$0xff] }
 0x12e   : > { %v4393_v2 = vpop.f32.mrf.mxu0 }
 0x12f   : > { %v4395_v3 = vpop.f32.mrf.mxu1 }
 0x130   : > { %v1009_v4 = vmax.f32 %v4393_v2, %v4395_v3 }
 0x132   : > { %1010 = vmax.xlane.f32.xlu0 %v1009_v4 }
 0x136   : > { %v4408_v6 = vpop.f32.mrf.mxu0 }
 0x137   : > { %v4410_v7 = vpop.f32.mrf.mxu1 }
 0x138   : > { %6134 = vst [vmem:[#allocation5_spill] sm:$0xff] %v4410_v7  ;;  %v1012_v8 = vmax.f32 %v4408_v6, %v4410_v7 }
 0x13a   : > { %1013 = vmax.xlane.f32.xlu1 %v1012_v8 }
 0x13e   : > { %v4422_v10 = vpop.f32.mrf.mxu0 }
 0x13f   : > { %v4424_v11 = vpop.f32.mrf.mxu1 }
 0x140   : > { %v1015_v13 = vmax.f32 %v4422_v10, %v4424_v11 }
 0x142   : > { %1016 = vmax.xlane.f32.xlu2 %v1015_v13 }
 0x145   : > { %v975_v15 = vpop.xlane.xlu0 %974 }
 0x146   : > { %v1069_v16 = vmax.f32 %v941_v14, %v975_v15  ;;  %v4444_v17 = vpop.f32.mrf.mxu0  ;;  %v3844_v15 = vld [vmem:[%s4290_s7 + $0x70] sm:$0xff] }
 0x147   : > { %v4446_v18 = vpop.f32.mrf.mxu1  ;;  %841 = vmatmul.bf16.gmra.mxu0 %v3844_v15  ;;  %930 = vmatmul.bf16.gmra.mxu1 %v3844_v15  ;;  %v4581_v15 = vld [vmem:[#allocation2 + $0x38] sm:$0xff] }
 0x148   : > { %v1018_v19 = vmax.f32 %v4444_v17, %v4446_v18  ;;  %2400 = vst.msk [vmem:[#allocation2] sm:$0xff] %vm410_vm0, %v1069_v16  ;;  %v1101_v38 = vsub.f32 %v941_v14, %v1069_v16 }
 0x149   : > { %6156 = vst [vmem:[#allocation27_spill] sm:$0xff] %v4581_v15 }
 0x14a   : > { %1019 = vmax.xlane.f32.xlu0 %v1018_v19  ;;  %v1133_v48 = vmul.f32 1.442695, %v1101_v38  ;;  %v4572_v38 = vld [vmem:[#allocation2 + $0x30] sm:$0xff] }
 0x14b   : > { %6153 = vst [vmem:[#allocation24_spill] sm:$0xff] %v4572_v38 }
 0x14c   : > { %3941 = vpow2.f32 %v1133_v48 }
 0x14d   : > { %v978_v21 = vpop.xlane.xlu0 %977 }
 0x14e   : > { %v4468_v22 = vmax.f32 %v4459_v20, %v978_v21  ;;  %v4470_v23 = vpop.f32.mrf.mxu0  ;;  %v3845_v21 = vld [vmem:[%s4290_s7 + $0x78] sm:$0xff]  ;;  %s3828_s7 = sshll.u32 %s6364_s21, 8 }
 0x14f   : > { %6137 = vst [vmem:[#allocation8_spill] sm:$0xff] %v4470_v23  ;;  %v4472_v24 = vpop.f32.mrf.mxu1  ;;  %s5916_s14 = scalar_lea.vmem %s6046_s6, %s3828_s7 }
 0x150   : > { %6136 = vst [vmem:[#allocation7_spill] sm:$0xff] %v4468_v22  ;;  %v1021_v27 = vmax.f32 %v4470_v23, %v4472_v24 }
 0x151   : > { %6138 = vst [vmem:[#allocation9_spill] sm:$0xff] %v4472_v24 }
 0x152   : > { %2401 = vst.msk [vmem:[#allocation2 + $0x8] sm:$0xff] %vm410_vm0, %v4468_v22  ;;  %1022 = vmax.xlane.f32.xlu1 %v1021_v27  ;;  %v4543_v4 = vpop.eup %3941 }
 0x155   : > { %v981_v34 = vpop.xlane.xlu1 %980 }
 0x156   : > { %v4495_v37 = vmax.f32 %v4486_v31, %v981_v34  ;;  %v4501_v44 = vpop.f32.mrf.mxu0 }
 0x157   : > { %v4499_v41 = vpop.f32.mrf.mxu1  ;;  %6142 = vst [vmem:[#allocation13_spill] sm:$0xff] %v4501_v44  ;;  %846 = vmatmul.bf16.gmra.mxu0 %v3845_v21  ;;  %935 = vmatmul.bf16.gmra.mxu1 %v3845_v21 }
 0x158   : > { %6140 = vst [vmem:[#allocation11_spill] sm:$0xff] %v4495_v37 }
 0x159   : > { %6141 = vst [vmem:[#allocation12_spill] sm:$0xff] %v4499_v41 }
 0x15a   : > { %2402 = vst.msk [vmem:[#allocation2 + $0x10] sm:$0xff] %vm410_vm0, %v4495_v37  ;;  %1199 = vperm.xlu2 %3937, %v1069_v16  }
 0x15d   : > { %v984_v52 = vpop.xlane.xlu1 %983 }
 0x15e   : > { %v4522_v55 = vmax.f32 %v4513_v51, %v984_v52  ;;  %1204 = vperm.xlu0 %3938, %v4468_v22   ;;  %v4527_v58 = vpop.f32.mrf.mxu0 }
 0x15f   : > { %6145 = vst [vmem:[#allocation16_spill] sm:$0xff] %v4527_v58  ;;  %v4535_v62 = vpop.f32.mrf.mxu1 }
 0x160   : > { %6144 = vst [vmem:[#allocation15_spill] sm:$0xff] %v4522_v55  ;;  %v1027_v21 = vmax.f32 %v4527_v58, %v4535_v62 }
 0x161   : > { %2403 = vst.msk [vmem:[#allocation2 + $0x18] sm:$0xff] %vm410_vm0, %v4522_v55 }
 0x162   : > { %6146 = vst [vmem:[#allocation17_spill] sm:$0xff] %v4535_v62 }
 0x165   : > { %v987_v5 = vpop.xlane.xlu2 %986 }
 0x166   : > { %v4546_v8 = vmax.f32 %v4541_v1, %v987_v5  ;;  %1808 = vperm.xlu0 %3938, %v4543_v4   ;;  %v4549_v9 = vpop.f32.mrf.mxu0 }
 0x167   : > { %6147 = vst [vmem:[#allocation18_spill] sm:$0xff] %v4549_v9  ;;  %v4555_v14 = vpop.f32.mrf.mxu1 }
 0x168   : > { %2404 = vst.msk [vmem:[#allocation2 + $0x20] sm:$0xff] %vm410_vm0, %v4546_v8 }
 0x169   : > { %6148 = vst [vmem:[#allocation19_spill] sm:$0xff] %v4555_v14 }
 0x16b   : > { %1209 = vperm.xlu1 %3939, %v4495_v37  }
 0x16d   : > { %v990_v16 = vpop.xlane.xlu2 %989 }
 0x16e   : > { %v4562_v19 = vmax.f32 %v4558_v12, %v990_v16  ;;  %v4568_v27 = vpop.f32.mrf.mxu0 }
 0x16f   : > { %6151 = vst [vmem:[#allocation22_spill] sm:$0xff] %v4568_v27  ;;  %v4570_v34 = vpop.f32.mrf.mxu1 }
 0x170   : > { %6150 = vst [vmem:[#allocation21_spill] sm:$0xff] %v4562_v19  ;;  %v1033_v7 = vmax.f32 %v4568_v27, %v4570_v34 }
 0x171   : > { %2405 = vst.msk [vmem:[#allocation2 + $0x28] sm:$0xff] %vm410_vm0, %v4562_v19 }
 0x172   : > { %6152 = vst [vmem:[#allocation23_spill] sm:$0xff] %v4570_v34 }
 0x175   : > { %v993_v48 = vpop.xlane.xlu0 %992 }
 0x176   : > { %v4575_v52 = vmax.f32 %v4572_v38, %v993_v48  ;;  %v4579_v5 = vpop.f32.mrf.mxu0  ;;  %v1024_v48 = vmax.f32 %v4501_v44, %v4499_v41 }
 0x177   : > { %6155 = vst [vmem:[#allocation26_spill] sm:$0xff] %v4579_v5  ;;  %v4583_v16 = vpop.f32.mrf.mxu1 }
 0x178   : > { %6154 = vst [vmem:[#allocation25_spill] sm:$0xff] %v4575_v52  ;;  %v1036_v22 = vmax.f32 %v4579_v5, %v4583_v16  ;;  %v3868_v5 = vld [vmem:[%s4638_s10 + $0x30] sm:$0xff] }
 0x179   : > { %2406 = vst.msk [vmem:[#allocation2 + $0x30] sm:$0xff] %vm410_vm0, %v4575_v52 }
 0x17a   : > { %6157 = vst [vmem:[#allocation28_spill] sm:$0xff] %v4583_v16  ;;  %v3869_v16 = vld [vmem:[%s4638_s10 + $0x38] sm:$0xff] }
 0x17b   : > { %2158 = vmatpush.bf16.msrb.mxu0 %v3869_v16  ;;  %3886 = vmatpush.bf16.msrb.mxu1 %v3869_v16 }
 0x17c   : > { %3887 = vmatpush.bf16.msra.mxu2 %v3869_v16  ;;  %3888 = vmatpush.bf16.msra.mxu3 %v3869_v16  ;;  %v4662_v16 = vld [vmem:[#allocation2 + $0x68] sm:$0xff] }
 0x17d   : > { %v996_v45 = vpop.xlane.xlu1 %995  ;;  %6171 = vst [vmem:[#allocation42_spill] sm:$0xff] %v4662_v16 }
 0x17e   : > { %v4587_v61 = vmax.f32 %v4581_v15, %v996_v45  ;;  %v4595_v13 = vpop.f32.mrf.mxu0  ;;  %v4604_v45 = vld [vmem:[#allocation2 + $0x48] sm:$0xff] }
 0x17f   : > { %6160 = vst [vmem:[#allocation31_spill] sm:$0xff] %v4595_v13  ;;  %v4597_v12 = vpop.f32.mrf.mxu1  ;;  %2159 = vmatpush.bf16.msrb.mxu0 %v3868_v5  ;;  %3889 = vmatpush.bf16.msrb.mxu1 %v3868_v5 }
 0x180   : > { %6158 = vst [vmem:[#allocation29_spill] sm:$0xff] %v4587_v61  ;;  %3890 = vmatpush.bf16.msra.mxu2 %v3868_v5  ;;  %3891 = vmatpush.bf16.msra.mxu3 %v3868_v5  ;;  %v3864_v5 = vld [vmem:[%s4638_s10 + $0x10] sm:$0xff] }
 0x181   : > { %2407 = vst.msk [vmem:[#allocation2 + $0x38] sm:$0xff] %vm410_vm0, %v4587_v61 }
 0x182   : > { %6161 = vst [vmem:[#allocation32_spill] sm:$0xff] %v4597_v12 }
 0x183   : > { %1025 = vmax.xlane.f32.xlu2 %v1024_v48  ;;  %6163 = vst [vmem:[#allocation34_spill] sm:$0xff] %v4604_v45 }
 0x185   : > { %v999_v38 = vpop.xlane.xlu2 %998 }
 0x186   : > { %v4600_v24 = vmax.f32 %v4593_v30, %v999_v38  ;;  %v4613_v51 = vpop.f32.mrf.mxu0  ;;  %v1030_v38 = vmax.f32 %v4549_v9, %v4555_v14  ;;  %v4619_v30 = vld [vmem:[#allocation2 + $0x50] sm:$0xff] }
 0x187   : > { %v4611_v31 = vpop.f32.mrf.mxu1  ;;  %6165 = vst [vmem:[#allocation36_spill] sm:$0xff] %v4619_v30 }
 0x188   : > { %6162 = vst [vmem:[#allocation33_spill] sm:$0xff] %v4600_v24 }
 0x189   : > { %2408 = vst.msk [vmem:[#allocation2 + $0x40] sm:$0xff] %vm410_vm0, %v4600_v24 }
 0x18d   : > { %v1002_v37 = vpop.xlane.xlu0 %1001 }
 0x18e   : > { %v4609_v48 = vmax.f32 %v4604_v45, %v1002_v37  ;;  %v4632_v14 = vpop.f32.mrf.mxu0 }
 0x18f   : > { %6168 = vst [vmem:[#allocation39_spill] sm:$0xff] %v4632_v14 }
 0x190   : > { %6164 = vst [vmem:[#allocation35_spill] sm:$0xff] %v4609_v48  ;;  %1028 = vmax.xlane.f32.xlu0 %v1027_v21  ;;  %v4630_v21 = vpop.f32.mrf.mxu1 }
 0x191   : > { %2409 = vst.msk [vmem:[#allocation2 + $0x48] sm:$0xff] %vm410_vm0, %v4609_v48 }
 0x192   : > { %6167 = vst [vmem:[#allocation38_spill] sm:$0xff] %v4630_v21 }
 0x195   : > { %v1005_v20 = vpop.xlane.xlu1 %1004  ;;  %1031 = vmax.xlane.f32.xlu1 %v1030_v38  ;;  %v1045_v38 = vmax.f32 %v4632_v14, %v4630_v21  ;;  %v3867_v21 = vld [vmem:[%s4638_s10 + $0x28] sm:$0xff] }
 0x196   : > { %v4624_v37 = vmax.f32 %v4619_v30, %v1005_v20  ;;  %v4641_v20 = vld [vmem:[#allocation2 + $0x58] sm:$0xff]  ;;  %2160 = vmatpush.bf16.msrb.mxu0 %v3867_v21  ;;  %3892 = vmatpush.bf16.msrb.mxu1 %v3867_v21 }
 0x197   : > { %6169 = vst [vmem:[#allocation40_spill] sm:$0xff] %v4641_v20  ;;  %3893 = vmatpush.bf16.msra.mxu2 %v3867_v21  ;;  %3894 = vmatpush.bf16.msra.mxu3 %v3867_v21  ;;  %v4672_v21 = vld [vmem:[#allocation2 + $0x70] sm:$0xff] }
 0x198   : > { %6166 = vst [vmem:[#allocation37_spill] sm:$0xff] %v4624_v37  ;;  %1037 = vmax.xlane.f32.xlu0 %v1036_v22 }
 0x199   : > { %2410 = vst.msk [vmem:[#allocation2 + $0x50] sm:$0xff] %vm410_vm0, %v4624_v37 }
 0x19a   : > { %6173 = vst [vmem:[#allocation44_spill] sm:$0xff] %v4672_v21 }
 0x19b   : > { %1214 = vperm.xlu2 %3937, %v4522_v55   ;;  %v4653_v55 = vld [vmem:[#allocation2 + $0x60] sm:$0xff] }
 0x19c   : > { %6170 = vst [vmem:[#allocation41_spill] sm:$0xff] %v4653_v55 }
 0x19d   : > { %v1008_v22 = vpop.xlane.xlu2 %1007 }
 0x19e   : > { %v4646_v45 = vmax.f32 %v4641_v20, %v1008_v22  ;;  %v3865_v20 = vld [vmem:[%s4638_s10 + $0x18] sm:$0xff] }
 0x1a0   : > { %2411 = vst.msk [vmem:[#allocation2 + $0x58] sm:$0xff] %vm410_vm0, %v4646_v45  ;;  %1046 = vmax.xlane.f32.xlu0 %v1045_v38  ;;  %v3866_v38 = vld [vmem:[%s4638_s10 + $0x20] sm:$0xff] }
 0x1a1   : > { %2161 = vmatpush.bf16.msrb.mxu0 %v3866_v38  ;;  %3895 = vmatpush.bf16.msrb.mxu1 %v3866_v38 }
 0x1a2   : > { %3896 = vmatpush.bf16.msra.mxu2 %v3866_v38  ;;  %3897 = vmatpush.bf16.msra.mxu3 %v3866_v38  ;;  %v3863_v38 = vld [vmem:[%s4638_s10 + $0x8] sm:$0xff] }
 0x1a3   : > { %1219 = vperm.xlu2 %3937, %v4546_v8  }
 0x1a5   : > { %v1011_v22 = vpop.xlane.xlu0 %1010  ;;  %2162 = vmatpush.bf16.msrb.mxu0 %v3865_v20  ;;  %3898 = vmatpush.bf16.msrb.mxu1 %v3865_v20 }
 0x1a6   : > { %v4657_v14 = vmax.f32 %v4653_v55, %v1011_v22  ;;  %3899 = vmatpush.bf16.msra.mxu2 %v3865_v20  ;;  %3900 = vmatpush.bf16.msra.mxu3 %v3865_v20  ;;  %v4682_v20 = vld [vmem:[#allocation2 + $0x78] sm:$0xff] }
 0x1a7   : > { %6174 = vst [vmem:[#allocation45_spill] sm:$0xff] %v4682_v20 }
 0x1a8   : > { %2412 = vst.msk [vmem:[#allocation2 + $0x60] sm:$0xff] %vm410_vm0, %v4657_v14 }
 0x1a9   : > { %2163 = vmatpush.bf16.msrb.mxu0 %v3864_v5  ;;  %3901 = vmatpush.bf16.msrb.mxu1 %v3864_v5 }
 0x1aa   : > { %3902 = vmatpush.bf16.msra.mxu2 %v3864_v5  ;;  %3903 = vmatpush.bf16.msra.mxu3 %v3864_v5  ;;  %v4689_v5 = vpop.f32.mrf.mxu0 }
 0x1ad   : > { %v1014_v30 = vpop.xlane.xlu1 %1013  ;;  %2164 = vmatpush.bf16.msrb.mxu0 %v3863_v38  ;;  %3904 = vmatpush.bf16.msrb.mxu1 %v3863_v38 }
 0x1ae   : > { %v4666_v22 = vmax.f32 %v4662_v16, %v1014_v30  ;;  %1224 = vperm.xlu1 %3939, %v4562_v19   ;;  %v3862_v16 = vld [vmem:[%s4638_s10] sm:$0xff]  ;;  %3905 = vmatpush.bf16.msra.mxu2 %v3863_v38 }
 0x1af   : > { %3906 = vmatpush.bf16.msra.mxu3 %v3863_v38 }
 0x1b0   : > { %6172 = vst [vmem:[#allocation43_spill] sm:$0xff] %v4666_v22 }
 0x1b1   : > { %2413 = vst.msk [vmem:[#allocation2 + $0x68] sm:$0xff] %vm410_vm0, %v4666_v22  ;;  %2165 = vmatpush.bf16.msrb.mxu0 %v3862_v16  ;;  %3907 = vmatpush.bf16.msrb.mxu1 %v3862_v16 }
 0x1b2   : > { %3908 = vmatpush.bf16.msra.mxu2 %v3862_v16 }
 0x1b3   : > { %3909 = vmatpush.bf16.msra.mxu3 %v3862_v16 }
 0x1b4   : > { %1249 = vperm.xlu0 %3938, %v4624_v37  }
 0x1b5   : > { %v1017_v30 = vpop.xlane.xlu2 %1016 }
 0x1b6   : > { %v4676_v55 = vmax.f32 %v4672_v21, %v1017_v30  ;;  %v4691_v30 = vpop.f32.mrf.mxu1  ;;  %v4693_v21 = vld [vmem:[#allocation2 + $0x80] sm:$0xff] }
 0x1b7   : > { %6175 = vst [vmem:[#allocation46_spill] sm:$0xff] %v4691_v30 }
 0x1b8   : > { %2414 = vst.msk [vmem:[#allocation2 + $0x70] sm:$0xff] %vm410_vm0, %v4676_v55 }
 0x1b9   : > { %6176 = vst [vmem:[#allocation47_spill] sm:$0xff] %v4693_v21 }
 0x1bd   : > { %v1020_v19 = vpop.xlane.xlu0 %1019  ;;  %v1200_v58 = vpop.permute.xlu2 %1199 }
 0x1be   : > { %v4685_v37 = vmax.f32 %v4682_v20, %v1020_v19  ;;  %v1357_v19 = vsub.f32 %v4301_v25, %v1200_v58  ;;  %v1358_v16 = vsub.f32 %v4303_v26, %v1200_v58  ;;  %v4704_v20 = vpop.f32.mrf.mxu0  ;;  %v4706_v9 = vpop.f32.mrf.mxu1  ;;  %v1039_v25 = vmax.f32 %v4595_v13, %v4597_v12 }
 0x1bf   : > { %v1048_v12 = vmax.f32 %v4689_v5, %v4691_v30 }
 0x1c0   : > { %2415 = vst.msk [vmem:[#allocation2 + $0x78] sm:$0xff] %vm410_vm0, %v4685_v37  ;;  %v1421_v41 = vmul.f32 1.442695, %v1357_v19  ;;  %v1423_v44 = vmul.f32 1.442695, %v1358_v16 }
 0x1c2   : > { %3943 = vpow2.f32 %v1421_v41 }
 0x1c3   : > { %3945 = vpow2.f32 %v1423_v44 }
 0x1c5   : > { %v1023_v38 = vpop.xlane.xlu1 %1022 }
 0x1c6   : > { %v4696_v62 = vmax.f32 %v4693_v21, %v1023_v38  ;;  %v4712_v26 = vpop.f32.mrf.mxu0 }
 0x1c7   : > { %6177 = vst [vmem:[#allocation48_spill] sm:$0xff] %v4712_v26 }
 0x1c8   : > { %2416 = vst.msk [vmem:[#allocation2 + $0x80] sm:$0xff] %vm410_vm0, %v4696_v62  ;;  %v4716_v58 = vpop.eup %3943 }
 0x1c9   : > { %v4718_v19 = vpop.eup %3945 }
 0x1cc   : > { %1034 = vmax.xlane.f32.xlu2 %v1033_v7  ;;  %v4714_v7 = vpop.f32.mrf.mxu1 }
 0x1cd   : > { %6178 = vst [vmem:[#allocation49_spill] sm:$0xff] %v4714_v7 }
 0x1d0   : > { %v1205_v38 = vpop.permute.xlu0 %1204 }
 0x1d1   : > { %v1359_v21 = vsub.f32 %v4307_v28, %v1205_v38  ;;  %v1360_v23 = vsub.f32 %v4309_v29, %v1205_v38  ;;  %v1054_v28 = vmax.f32 %v4712_v26, %v4714_v7 }
 0x1d3   : > { %v1425_v34 = vmul.f32 1.442695, %v1359_v21  ;;  %v1427_v27 = vmul.f32 1.442695, %v1360_v23 }
 0x1d5   : > { %3947 = vpow2.f32 %v1425_v34 }
 0x1d6   : > { %3949 = vpow2.f32 %v1427_v27 }
 0x1d8   : > { %1040 = vmax.xlane.f32.xlu1 %v1039_v25 }
 0x1db   : > { %v3948_v29 = vpop.eup %3947 }
 0x1dc   : > { %v4722_v23 = vpop.eup %3949  ;;  %v1998_v41 = vpack.c.bf16 %v3948_v29, %v4716_v58 }
 0x1dd   : > { %6179 = vst [vmem:[#allocation50_spill] sm:$0xff] %v4722_v23  ;;  %v1210_v44 = vpop.permute.xlu1 %1209  ;;  %v4726_v27 = vadd.f32 %v4722_v23, %v3948_v29  ;;  %v4755_v23 = vpop.f32.mrf.mxu1 }
 0x1de   : > { %v1361_v21 = vsub.f32 %v4314_v32, %v1210_v44  ;;  %v1362_v16 = vsub.f32 %v4316_v33, %v1210_v44  ;;  %2166 = vmatmul.bf16.vlgmr.msrb.gmra.mxu0 %v1998_v41  ;;  %1055 = vmax.xlane.f32.xlu0 %v1054_v28  ;;  %v4742_v32 = vld [vmem:[#allocation2 + $0x88] sm:$0xff]  ;;  %v4749_v41 = vpop.permute.xlu0 %1808 }
 0x1df   : > { %6181 = vst [vmem:[#allocation52_spill] sm:$0xff] %v4742_v32 }
 0x1e0   : > { %v1429_v38 = vmul.f32 1.442695, %v1361_v21  ;;  %v1431_v25 = vmul.f32 1.442695, %v1362_v16  ;;  %6182 = vst [vmem:[#allocation53_spill] sm:$0xff] %v4749_v41 }
 0x1e2   : > { %3951 = vpow2.f32 %v1429_v38  ;;  %v4753_v38 = vpop.f32.mrf.mxu0 }
 0x1e3   : > { %3953 = vpow2.f32 %v1431_v25 }
 0x1e4   : > { %1229 = vperm.xlu2 %3937, %v4575_v52  }
 0x1e8   : > { %v3952_v7 = vpop.eup %3951 }
 0x1e9   : > { %v4733_v26 = vpop.eup %3953 }
 0x1ea   : > { %6180 = vst [vmem:[#allocation51_spill] sm:$0xff] %v4733_v26  ;;  %v4736_v29 = vadd.f32 %v4733_v26, %v3952_v7 }
 0x1ec   : > { %1234 = vperm.xlu2 %3937, %v4587_v61  }
 0x1f1   : > { %1244 = vperm.xlu1 %3939, %v4609_v48   ;;  %v4757_v48 = vld [vmem:[#allocation2 + $0x90] sm:$0xff] }
 0x1f2   : > { %1264 = vperm.xlu0 %3938, %v4666_v22   ;;  %6183 = vst [vmem:[#allocation54_spill] sm:$0xff] %v4757_v48 }
 0x1f4   : > { %1239 = vperm.xlu2 %3937, %v4600_v24  }
 0x1f6   : > { %v1026_v33 = vpop.xlane.xlu2 %1025 }
 0x1f7   : > { %v4745_v28 = vmax.f32 %v4742_v32, %v1026_v33 }
 0x1f9   : > { %2417 = vst.msk [vmem:[#allocation2 + $0x88] sm:$0xff] %vm410_vm0, %v4745_v28 }
 0x1fe   : > { %v1215_v44 = vpop.permute.xlu2 %1214 }
 0x1ff   : > { %v1363_v21 = vsub.f32 %v4320_v35, %v1215_v44  ;;  %v1364_v16 = vsub.f32 %v4322_v36, %v1215_v44  ;;  %v4764_v35 = vld [vmem:[#allocation2 + $0x98] sm:$0xff] }
 0x200   : > { %6184 = vst [vmem:[#allocation55_spill] sm:$0xff] %v4764_v35 }
 0x201   : > { %v1433_v25 = vmul.f32 1.442695, %v1363_v21  ;;  %v1435_v34 = vmul.f32 1.442695, %v1364_v16  ;;  %v4771_v16 = vld [vmem:[#allocation2 + $0xa8] sm:$0xff] }
 0x202   : > { %6185 = vst [vmem:[#allocation56_spill] sm:$0xff] %v4771_v16 }
 0x203   : > { %3955 = vpow2.f32 %v1433_v25  ;;  %v1029_v33 = vpop.xlane.xlu0 %1028  ;;  %v4776_v25 = vpop.f32.mrf.mxu0 }
 0x204   : > { %3957 = vpow2.f32 %v1435_v34  ;;  %v4760_v24 = vmax.f32 %v4757_v48, %v1029_v33  ;;  %v4778_v33 = vpop.f32.mrf.mxu1 }
 0x206   : > { %2418 = vst.msk [vmem:[#allocation2 + $0x90] sm:$0xff] %vm410_vm0, %v4760_v24 }
 0x208   : > { %v1032_v36 = vpop.xlane.xlu1 %1031 }
 0x209   : > { %v4766_v44 = vpop.eup %3955  ;;  %v4769_v21 = vmax.f32 %v4764_v35, %v1032_v36  ;;  %v4789_v35 = vld [vmem:[#allocation2 + $0xc0] sm:$0xff] }
 0x20a   : > { %v4773_v41 = vpop.eup %3957  ;;  %v2000_v34 = vpack.c.bf16 %v4766_v44, %v3952_v7  ;;  %6187 = vst [vmem:[#allocation58_spill] sm:$0xff] %v4789_v35 }
 0x20b   : > { %2419 = vst.msk [vmem:[#allocation2 + $0x98] sm:$0xff] %vm410_vm0, %v4769_v21  ;;  %v1038_v48 = vpop.xlane.xlu0 %1037  ;;  %v4794_v32 = vpop.f32.mrf.mxu0 }
 0x20c   : > { %2171 = vmatmul.bf16.gmra.mxu0 %v2000_v34  ;;  %v4785_v36 = vmax.f32 %v4771_v16, %v1038_v48  ;;  %6189 = vst [vmem:[#allocation60_spill] sm:$0xff] %v4794_v32  ;;  %v4796_v22 = vpop.f32.mrf.mxu1  ;;  %v1220_v34 = vpop.permute.xlu2 %1219 }
 0x20d   : > { %6190 = vst [vmem:[#allocation61_spill] sm:$0xff] %v4796_v22  ;;  %v1063_v48 = vmax.f32 %v4794_v32, %v4796_v22  ;;  %v1365_v16 = vsub.f32 %v4327_v39, %v1220_v34 }
 0x20e   : > { %6186 = vst [vmem:[#allocation57_spill] sm:$0xff] %v4785_v36 }
 0x20f   : > { %2421 = vst.msk [vmem:[#allocation2 + $0xa8] sm:$0xff] %vm410_vm0, %v4785_v36  ;;  %v1437_v26 = vmul.f32 1.442695, %v1365_v16 }
 0x211   : > { %3959 = vpow2.f32 %v1437_v26 }
 0x213   : > { %v1047_v7 = vpop.xlane.xlu0 %1046 }
 0x214   : > { %v4792_v13 = vmax.f32 %v4789_v35, %v1047_v7  ;;  %v1042_v7 = vmax.f32 %v4613_v51, %v4611_v31  ;;  %v1366_v35 = vsub.f32 %v4329_v40, %v1220_v34 }
 0x216   : > { %6188 = vst [vmem:[#allocation59_spill] sm:$0xff] %v4792_v13  ;;  %v1439_v52 = vmul.f32 1.442695, %v1366_v35 }
 0x217   : > { %2424 = vst.msk [vmem:[#allocation2 + $0xc0] sm:$0xff] %vm410_vm0, %v4792_v13  ;;  %v4810_v39 = vpop.eup %3959 }
 0x218   : > { %3961 = vpow2.f32 %v1439_v52 }
 0x21b   : > { %1049 = vmax.xlane.f32.xlu1 %v1048_v12 }
 0x21c   : > { %1064 = vmax.xlane.f32.xlu0 %v1063_v48 }
 0x21d   : > { %1043 = vmax.xlane.f32.xlu2 %v1042_v7 }
 0x21e   : > { %v4812_v12 = vpop.eup %3961 }
 0x220   : > { %v1225_v15 = vpop.permute.xlu1 %1224 }
 0x221   : > { %v1367_v61 = vsub.f32 %v4333_v42, %v1225_v15  ;;  %v1368_v22 = vsub.f32 %v4335_v43, %v1225_v15  ;;  %v4825_v43 = vld [vmem:[#allocation2 + $0xa0] sm:$0xff]  ;;  %v4843_v42 = vld [vmem:[#allocation2 + $0xd8] sm:$0xff] }
 0x222   : > { %6192 = vst [vmem:[#allocation63_spill] sm:$0xff] %v4825_v43 }
 0x223   : > { %v1441_v32 = vmul.f32 1.442695, %v1367_v61  ;;  %v1443_v30 = vmul.f32 1.442695, %v1368_v22  ;;  %6195 = vst [vmem:[#allocation66_spill] sm:$0xff] %v4843_v42 }
 0x225   : > { %3963 = vpow2.f32 %v1441_v32  ;;  %v4836_v32 = vld [vmem:[#allocation2 + $0xb0] sm:$0xff] }
 0x226   : > { %3965 = vpow2.f32 %v1443_v30  ;;  %v4834_v26 = vpop.permute.xlu0 %1249  ;;  %6193 = vst [vmem:[#allocation64_spill] sm:$0xff] %v4836_v32 }
 0x22b   : > { %v3964_v40 = vpop.eup %3963 }
 0x22c   : > { %v4814_v34 = vpop.eup %3965  ;;  %v2002_v35 = vpack.c.bf16 %v3964_v40, %v4810_v39 }
 0x22d   : > { %6191 = vst [vmem:[#allocation62_spill] sm:$0xff] %v4814_v34  ;;  %v4818_v16 = vadd.f32 %v4814_v34, %v3964_v40 }
 0x22e   : > { %2176 = vmatmul.bf16.gmra.mxu0 %v2002_v35 }
 0x230   : > { %1279 = vperm.xlu0 %3938, %v4696_v62  }
 0x234   : > { %1259 = vperm.xlu1 %3939, %v4657_v14  }
 0x235   : > { %1254 = vperm.xlu2 %3937, %v4646_v45  }
 0x23f   : > { %v1035_v61 = vpop.xlane.xlu2 %1034 }
 0x240   : > { %v4828_v52 = vmax.f32 %v4825_v43, %v1035_v61 }
 0x242   : > { %2420 = vst.msk [vmem:[#allocation2 + $0xa0] sm:$0xff] %vm410_vm0, %v4828_v52 }
 0x247   : > { %v1230_v15 = vpop.permute.xlu2 %1229 }
 0x248   : > { %v1369_v22 = vsub.f32 %v4340_v46, %v1230_v15  ;;  %v1370_v30 = vsub.f32 %v4342_v47, %v1230_v15 }
 0x24a   : > { %v1445_v48 = vmul.f32 1.442695, %v1369_v22  ;;  %v1447_v7 = vmul.f32 1.442695, %v1370_v30 }
 0x24b   : > { %v1041_v40 = vpop.xlane.xlu1 %1040 }
 0x24c   : > { %3967 = vpow2.f32 %v1445_v48  ;;  %v4839_v35 = vmax.f32 %v4836_v32, %v1041_v40 }
 0x24d   : > { %3969 = vpow2.f32 %v1447_v7 }
 0x24e   : > { %6194 = vst [vmem:[#allocation65_spill] sm:$0xff] %v4839_v35 }
 0x24f   : > { %2422 = vst.msk [vmem:[#allocation2 + $0xb0] sm:$0xff] %vm410_vm0, %v4839_v35  ;;  %v1235_v61 = vpop.permute.xlu2 %1234 }
 0x250   : > { %v1371_v46 = vsub.f32 %v4346_v49, %v1235_v61  ;;  %v1372_v47 = vsub.f32 %v4348_v50, %v1235_v61 }
 0x251   : > { %v1056_v15 = vpop.xlane.xlu0 %1055 }
 0x252   : > { %v3968_v34 = vpop.eup %3967  ;;  %v1449_v22 = vmul.f32 1.442695, %v1371_v46  ;;  %v1451_v30 = vmul.f32 1.442695, %v1372_v47  ;;  %v4848_v48 = vmax.f32 %v4843_v42, %v1056_v15  ;;  %v1613_v46 = vadd.f32 %v4718_v19, %v4716_v58 }
 0x253   : > { %v4850_v40 = vpop.eup %3969 }
 0x254   : > { %6196 = vst [vmem:[#allocation67_spill] sm:$0xff] %v4850_v40  ;;  %3971 = vpow2.f32 %v1449_v22  ;;  %v4855_v7 = vadd.f32 %v4850_v40, %v3968_v34  ;;  %v1057_v22 = vmax.f32 %v4753_v38, %v4755_v23  ;;  %v4916_v40 = vpop.f32.mrf.mxu1 }
 0x255   : > { %2427 = vst.msk [vmem:[#allocation2 + $0xd8] sm:$0xff] %vm410_vm0, %v4848_v48  ;;  %3973 = vpow2.f32 %v1451_v30  ;;  %v1051_v30 = vmax.f32 %v4704_v20, %v4706_v9 }
 0x256   : > { %6204 = vst [vmem:[#allocation75_spill] sm:$0xff] %v4916_v40 }
 0x257   : > { %v1240_v49 = vpop.permute.xlu2 %1239 }
 0x258   : > { %v1373_v50 = vsub.f32 %v4353_v53, %v1240_v49  ;;  %v1374_v61 = vsub.f32 %v4355_v54, %v1240_v49 }
 0x25a   : > { %v3972_v47 = vpop.eup %3971  ;;  %v1453_v15 = vmul.f32 1.442695, %v1373_v50  ;;  %v1455_v32 = vmul.f32 1.442695, %v1374_v61  ;;  %1614 = vadd.xlane.f32.xlu0 %v1613_v46 }
 0x25b   : > { %v4863_v42 = vpop.eup %3973  ;;  %v2004_v43 = vpack.c.bf16 %v3972_v47, %v3968_v34 }
 0x25c   : > { %6197 = vst [vmem:[#allocation68_spill] sm:$0xff] %v4863_v42  ;;  %3975 = vpow2.f32 %v1453_v15  ;;  %v1634_v53 = vadd.f32 %v4863_v42, %v3972_v47  ;;  %v1060_v42 = vmax.f32 %v4776_v25, %v4778_v33 }
 0x25d   : > { %3977 = vpow2.f32 %v1455_v32  ;;  %2181 = vmatmul.bf16.vlgmr.msrb.gmra.mxu1 %v2004_v43 }
 0x25e   : > { %1052 = vmax.xlane.f32.xlu2 %v1051_v30  ;;  %1058 = vmax.xlane.f32.xlu1 %v1057_v22  ;;  %v4889_v30 = vld [vmem:[#allocation2 + $0xc8] sm:$0xff] }
 0x25f   : > { %6200 = vst [vmem:[#allocation71_spill] sm:$0xff] %v4889_v30 }
 0x262   : > { %v3976_v58 = vpop.eup %3975 }
 0x263   : > { %v4870_v49 = vpop.eup %3977  ;;  %v1245_v50 = vpop.permute.xlu1 %1244 }
 0x264   : > { %6198 = vst [vmem:[#allocation69_spill] sm:$0xff] %v4870_v49  ;;  %v1375_v61 = vsub.f32 %v4359_v56, %v1245_v50  ;;  %v1376_v34 = vsub.f32 %v4361_v57, %v1245_v50  ;;  %v4875_v46 = vadd.f32 %v4870_v49, %v3976_v58  ;;  %v4887_v57 = vpop.permute.xlu0 %1264  ;;  %v4891_v50 = vld [vmem:[#allocation2 + $0xf0] sm:$0xff]  ;;  %v1625_v56 = vadd.f32 %v4812_v12, %v4810_v39 }
 0x265   : > { %6201 = vst [vmem:[#allocation72_spill] sm:$0xff] %v4891_v50 }
 0x266   : > { %v1457_v15 = vmul.f32 1.442695, %v1375_v61  ;;  %v1459_v47 = vmul.f32 1.442695, %v1376_v34  ;;  %v4893_v34 = vld [vmem:[#allocation2 + $0xb8] sm:$0xff] }
 0x268   : > { %3979 = vpow2.f32 %v1457_v15 }
 0x269   : > { %3981 = vpow2.f32 %v1459_v47 }
 0x26e   : > { %v3980_v54 = vpop.eup %3979  ;;  %1294 = vperm.xlu0 %3938, %v4769_v21  }
 0x26f   : > { %v4878_v43 = vpop.eup %3981  ;;  %v2006_v32 = vpack.c.bf16 %v3980_v54, %v3976_v58 }
 0x270   : > { %6199 = vst [vmem:[#allocation70_spill] sm:$0xff] %v4878_v43  ;;  %v4881_v22 = vadd.f32 %v4878_v43, %v3980_v54 }
 0x271   : > { %2186 = vmatmul.bf16.gmra.mxu1 %v2006_v32 }
 0x276   : > { %1269 = vperm.xlu2 %3937, %v4676_v55  }
 0x277   : > { %1274 = vperm.xlu1 %3939, %v4685_v37  }
 0x28e   : > { %v1050_v61 = vpop.xlane.xlu1 %1049 }
 0x28f   : > { %v4896_v54 = vmax.f32 %v4889_v30, %v1050_v61  ;;  %v1065_v58 = vpop.xlane.xlu0 %1064  ;;  %v1377_v61 = vsub.f32 %v4365_v59, %v4834_v26  ;;  %v4920_v59 = vpop.f32.mrf.mxu0 }
 0x290   : > { %v1044_v15 = vpop.xlane.xlu2 %1043  ;;  %v4899_v47 = vmax.f32 %v4891_v50, %v1065_v58  ;;  %v1066_v39 = vmax.f32 %v4920_v59, %v4916_v40 }
 0x291   : > { %6202 = vst [vmem:[#allocation73_spill] sm:$0xff] %v4896_v54  ;;  %v4904_v32 = vmax.f32 %v4893_v34, %v1044_v15  ;;  %v1461_v58 = vmul.f32 1.442695, %v1377_v61 }
 0x292   : > { %6203 = vst [vmem:[#allocation74_spill] sm:$0xff] %v4899_v47 }
 0x293   : > { %2425 = vst.msk [vmem:[#allocation2 + $0xc8] sm:$0xff] %vm410_vm0, %v4896_v54  ;;  %3983 = vpow2.f32 %v1461_v58 }
 0x294   : > { %2430 = vst.msk [vmem:[#allocation2 + $0xf0] sm:$0xff] %vm410_vm0, %v4899_v47 }
 0x295   : > { %2423 = vst.msk [vmem:[#allocation2 + $0xb8] sm:$0xff] %vm410_vm0, %v4904_v32 }
 0x298   : > { %v1255_v50 = vpop.permute.xlu2 %1254  ;;  %1626 = vadd.xlane.f32.xlu0 %v1625_v56 }
 0x299   : > { %v1379_v30 = vsub.f32 %v4379_v63, %v1255_v50  ;;  %v1380_v15 = vsub.f32 %v4381_v0, %v1255_v50  ;;  %v3984_v63 = vpop.eup %3983  ;;  %v1383_v0 = vsub.f32 %v4408_v6, %v4887_v57 }
 0x29b   : > { %v1465_v49 = vmul.f32 1.442695, %v1379_v30  ;;  %v1467_v43 = vmul.f32 1.442695, %v1380_v15  ;;  %v1473_v61 = vmul.f32 1.442695, %v1383_v0 }
 0x29d   : > { %3985 = vpow2.f32 %v1465_v49 }
 0x29e   : > { %3987 = vpow2.f32 %v1467_v43 }
 0x29f   : > { %1061 = vmax.xlane.f32.xlu2 %v1060_v42  ;;  %3989 = vpow2.f32 %v1473_v61 }
 0x2a0   : > { %1635 = vadd.xlane.f32.xlu0 %v1634_v53 }
 0x2a1   : > { %1067 = vmax.xlane.f32.xlu1 %v1066_v39 }
 0x2a3   : > { %v3986_v56 = vpop.eup %3985 }
 0x2a4   : > { %v4926_v30 = vpop.eup %3987  ;;  %v2008_v49 = vpack.c.bf16 %v3986_v56, %v3984_v63 }
 0x2a5   : > { %6205 = vst [vmem:[#allocation76_spill] sm:$0xff] %v4926_v30  ;;  %v4929_v50 = vadd.f32 %v4926_v30, %v3986_v56  ;;  %v4933_v6 = vpop.eup %3989 }
 0x2a6   : > { %2191 = vmatmul.bf16.gmra.mxu1 %v2008_v49  ;;  %v1260_v43 = vpop.permute.xlu1 %1259  ;;  %v1378_v49 = vsub.f32 %v4367_v60, %v4834_v26 }
 0x2a7   : > { %v1381_v42 = vsub.f32 %v4393_v2, %v1260_v43  ;;  %v1382_v58 = vsub.f32 %v4395_v3, %v1260_v43  ;;  %v4944_v2 = vpop.permute.xlu0 %1279  ;;  %v1549_v3 = vld [vmem:[#allocation3] sm:$0xff] }
 0x2a8   : > { %v1581_v61 = vmul.f32 %v4543_v4, %v1549_v3 }
 0x2a9   : > { %v1469_v53 = vmul.f32 1.442695, %v1381_v42  ;;  %v1471_v15 = vmul.f32 1.442695, %v1382_v58  ;;  %v1463_v58 = vmul.f32 1.442695, %v1378_v49 }
 0x2ab   : > { %3991 = vpow2.f32 %v1469_v53  ;;  %v4949_v53 = vld [vmem:[#allocation2 + $0xd0] sm:$0xff] }
 0x2ac   : > { %3993 = vpow2.f32 %v1471_v15  ;;  %6207 = vst [vmem:[#allocation78_spill] sm:$0xff] %v4949_v53  ;;  %v4951_v15 = vld [vmem:[#allocation2 + $0xe0] sm:$0xff] }
 0x2ad   : > { %6208 = vst [vmem:[#allocation79_spill] sm:$0xff] %v4951_v15  ;;  %3995 = vpow2.f32 %v1463_v58 }
 0x2b1   : > { %v3992_v39 = vpop.eup %3991 }
 0x2b2   : > { %v4935_v40 = vpop.eup %3993  ;;  %v2010_v56 = vpack.c.bf16 %v4933_v6, %v3992_v39 }
 0x2b3   : > { %6206 = vst [vmem:[#allocation77_spill] sm:$0xff] %v4935_v40  ;;  %v4939_v0 = vadd.f32 %v4935_v40, %v3992_v39  ;;  %v4964_v60 = vpop.eup %3995 }
 0x2b4   : > { %2196 = vmatmul.bf16.vlgmr.msra.gmra.mxu2 %v2010_v56  ;;  %1319 = vperm.xlu0 %3938, %v4792_v13   ;;  %6211 = vst [vmem:[#allocation82_spill] sm:$0xff] %v4964_v60 }
 0x2b7   : > { %1284 = vperm.xlu2 %3937, %v4745_v28  }
 0x2ba   : > { %1289 = vperm.xlu1 %3939, %v4760_v24  }
 0x2cd   : > { %v1615_v43 = vpop.xlane.xlu0 %1614 }
 0x2ce   : > { %v1709_v42 = vadd.f32 %v1615_v43, %v1581_v61  ;;  %v1643_v43 = vadd.f32 %v4964_v60, %v3984_v63 }
 0x2d0   : > { %1742 = vst.msk [vmem:[#allocation3] sm:$0xff] %vm410_vm0, %v1709_v42 }
 0x2d1   : > { %v1053_v39 = vpop.xlane.xlu2 %1052  ;;  %v1059_v56 = vpop.xlane.xlu1 %1058 }
 0x2d2   : > { %v4955_v13 = vmax.f32 %v4949_v53, %v1053_v39  ;;  %v4958_v40 = vmax.f32 %v4951_v15, %v1059_v56  ;;  %v1622_v39 = vadd.f32 %v4773_v41, %v4766_v44 }
 0x2d4   : > { %6209 = vst [vmem:[#allocation80_spill] sm:$0xff] %v4955_v13 }
 0x2d5   : > { %6210 = vst [vmem:[#allocation81_spill] sm:$0xff] %v4958_v40 }
 0x2d6   : > { %2426 = vst.msk [vmem:[#allocation2 + $0xd0] sm:$0xff] %vm410_vm0, %v4955_v13 }
 0x2d7   : > { %2428 = vst.msk [vmem:[#allocation2 + $0xe0] sm:$0xff] %vm410_vm0, %v4958_v40 }
 0x2d9   : > { %v1270_v4 = vpop.permute.xlu2 %1269 }
 0x2da   : > { %v1385_v26 = vsub.f32 %v4422_v10, %v1270_v4  ;;  %v1386_v3 = vsub.f32 %v4424_v11, %v1270_v4 }
 0x2dc   : > { %v1477_v49 = vmul.f32 1.442695, %v1385_v26  ;;  %v1479_v61 = vmul.f32 1.442695, %v1386_v3 }
 0x2de   : > { %3997 = vpow2.f32 %v1477_v49  ;;  %1644 = vadd.xlane.f32.xlu0 %v1643_v43  ;;  %v6216_v43 = vld [vmem:[#allocation27_spill] sm:$0xff] }
 0x2df   : > { %3999 = vpow2.f32 %v1479_v61  ;;  %v6215_v61 = vld [vmem:[#allocation29_spill] sm:$0xff] }
 0x2e0   : > { %1617 = vadd.xlane.f32.xlu2 %v4726_v27 }
 0x2e4   : > { %v3998_v42 = vpop.eup %3997  ;;  %1620 = vadd.xlane.f32.xlu1 %v4736_v29 }
 0x2e5   : > { %v4971_v58 = vpop.eup %3999 }
 0x2e6   : > { %6212 = vst [vmem:[#allocation83_spill] sm:$0xff] %v4971_v58  ;;  %v4976_v10 = vadd.f32 %v4971_v58, %v3998_v42 }
 0x2e8   : > { %1623 = vadd.xlane.f32.xlu2 %v1622_v39  ;;  %v1108_v39 = vsub.f32 %v6216_v43, %v6215_v61  ;;  %v5006_v61 = vld [vmem:[#allocation2 + $0xf8] sm:$0xff] }
 0x2e9   : > { %v1275_v11 = vpop.permute.xlu1 %1274  ;;  %6217 = vst [vmem:[#allocation29_spill] sm:$0xff] %v5006_v61 }
 0x2ea   : > { %v1387_v63 = vsub.f32 %v4444_v17, %v1275_v11  ;;  %v1388_v56 = vsub.f32 %v4446_v18, %v1275_v11  ;;  %v6214_v17 = vsub.f32 %v4541_v1, %v4546_v8  ;;  %v1147_v11 = vmul.f32 1.442695, %v1108_v39 }
 0x2ec   : > { %v1481_v4 = vmul.f32 1.442695, %v1387_v63  ;;  %v1483_v26 = vmul.f32 1.442695, %v1388_v56  ;;  %v1141_v18 = vmul.f32 1.442695, %v6214_v17 }
 0x2ed   : > { %v1553_v56 = vld [vmem:[#allocation3 + $0x20] sm:$0xff] }
 0x2ee   : > { %4001 = vpow2.f32 %v1481_v4 }
 0x2ef   : > { %4003 = vpow2.f32 %v1483_v26 }
 0x2f0   : > { %4005 = vpow2.f32 %v1141_v18 }
 0x2f1   : > { %4007 = vpow2.f32 %v1147_v11 }
 0x2f2   : > { %1334 = vperm.xlu0 %3938, %v4848_v48  }
 0x2f4   : > { %v4002_v27 = vpop.eup %4001 }
 0x2f5   : > { %v4981_v29 = vpop.eup %4003  ;;  %v2012_v3 = vpack.c.bf16 %v4002_v27, %v3998_v42  ;;  %v4995_v42 = vpop.permute.xlu0 %1294 }
 0x2f6   : > { %6213 = vst [vmem:[#allocation84_spill] sm:$0xff] %v4981_v29  ;;  %v4984_v44 = vadd.f32 %v4981_v29, %v4002_v27  ;;  %v4997_v63 = vpop.eup %4005  ;;  %v1556_v27 = vld [vmem:[#allocation3 + $0x38] sm:$0xff]  ;;  %v6226_v29 = vld [vmem:[#allocation17_spill] sm:$0xff] }
 0x2f7   : > { %2201 = vmatmul.bf16.gmra.mxu2 %v2012_v3  ;;  %v1585_v4 = vmul.f32 %v4997_v63, %v1553_v56  ;;  %v5001_v8 = vpop.eup %4007  ;;  %v5003_v3 = vld [vmem:[#allocation2 + $0xe8] sm:$0xff] }
 0x2f8   : > { %v1588_v18 = vmul.f32 %v5001_v8, %v1556_v27 }
 0x2fd   : > { %1304 = vperm.xlu1 %3939, %v4785_v36  }
 0x300   : > { %1299 = vperm.xlu2 %3937, %v4828_v52  }
 0x30b   : > { %v1627_v26 = vpop.xlane.xlu0 %1626 }
 0x30c   : > { %v1713_v1 = vadd.f32 %v1627_v26, %v1585_v4  ;;  %v6221_v4 = vld [vmem:[#allocation12_spill] sm:$0xff] }
 0x30e   : > { %1746 = vst.msk [vmem:[#allocation3 + $0x20] sm:$0xff] %vm410_vm0, %v1713_v1  ;;  %v6219_v1 = vld [vmem:[#allocation8_spill] sm:$0xff] }
 0x30f   : > { %v1389_v27 = vsub.f32 %v6219_v1, %v4944_v2 }
 0x312   : > { %v1062_v17 = vpop.xlane.xlu2 %1061 }
 0x313   : > { %v5009_v43 = vmax.f32 %v5003_v3, %v1062_v17  ;;  %v1636_v39 = vpop.xlane.xlu0 %1635  ;;  %v1485_v17 = vmul.f32 1.442695, %v1389_v27 }
 0x314   : > { %v1716_v11 = vadd.f32 %v1636_v39, %v1588_v18  ;;  %v1068_v56 = vpop.xlane.xlu1 %1067  ;;  %v6220_v39 = vld [vmem:[#allocation13_spill] sm:$0xff] }
 0x315   : > { %2429 = vst.msk [vmem:[#allocation2 + $0xe8] sm:$0xff] %vm410_vm0, %v5009_v43  ;;  %v5016_v26 = vmax.f32 %v5006_v61, %v1068_v56  ;;  %1344 = vperm.xlu0 %3938, %v5009_v43   ;;  %4009 = vpow2.f32 %v1485_v17  ;;  %v6225_v17 = vld [vmem:[#allocation16_spill] sm:$0xff] }
 0x316   : > { %1749 = vst.msk [vmem:[#allocation3 + $0x38] sm:$0xff] %vm410_vm0, %v1716_v11 }
 0x317   : > { %6218 = vst [vmem:[#allocation27_spill] sm:$0xff] %v5016_v26 }
 0x318   : > { %2431 = vst.msk [vmem:[#allocation2 + $0xf8] sm:$0xff] %vm410_vm0, %v5016_v26 }
 0x31a   : > { %v1285_v18 = vpop.permute.xlu2 %1284 }
 0x31b   : > { %v1391_v49 = vsub.f32 %v6220_v39, %v1285_v18  ;;  %v1392_v15 = vsub.f32 %v6221_v4, %v1285_v18  ;;  %v5026_v56 = vpop.eup %4009  ;;  %v6223_v39 = vld [vmem:[#allocation18_spill] sm:$0xff] }
 0x31c   : > { %v1395_v4 = vsub.f32 %v6223_v39, %v4995_v42 }
 0x31d   : > { %v1489_v53 = vmul.f32 1.442695, %v1391_v49  ;;  %v1491_v58 = vmul.f32 1.442695, %v1392_v15 }
 0x31f   : > { %4011 = vpow2.f32 %v1489_v53  ;;  %v6224_v53 = vld [vmem:[#allocation5_spill] sm:$0xff] }
 0x320   : > { %4013 = vpow2.f32 %v1491_v58  ;;  %v1384_v15 = vsub.f32 %v6224_v53, %v4887_v57  ;;  %v1497_v58 = vmul.f32 1.442695, %v1395_v4 }
 0x322   : > { %v1475_v60 = vmul.f32 1.442695, %v1384_v15  ;;  %4015 = vpow2.f32 %v1497_v58  ;;  %v6232_v15 = vld [vmem:[#allocation6_spill] sm:$0xff]  ;;  %v6233_v58 = vld [vmem:[#allocation7_spill] sm:$0xff] }
 0x325   : > { %v4012_v61 = vpop.eup %4011 }
 0x326   : > { %v5028_v1 = vpop.eup %4013  ;;  %v2014_v11 = vpack.c.bf16 %v4012_v61, %v5026_v56 }
 0x327   : > { %6222 = vst [vmem:[#allocation8_spill] sm:$0xff] %v5028_v1  ;;  %1629 = vadd.xlane.f32.xlu1 %v4818_v16  ;;  %v5033_v27 = vadd.f32 %v5028_v1, %v4012_v61 }
 0x328   : > { %2206 = vmatmul.bf16.gmra.mxu2 %v2014_v11  ;;  %v5042_v61 = vpop.eup %4015 }
 0x329   : > { %1632 = vadd.xlane.f32.xlu2 %v4855_v7 }
 0x32c   : > { %v1290_v49 = vpop.permute.xlu1 %1289 }
 0x32d   : > { %v1393_v18 = vsub.f32 %v6225_v17, %v1290_v49  ;;  %v1394_v36 = vsub.f32 %v6226_v29, %v1290_v49  ;;  %v6234_v49 = vsub.f32 %v6232_v15, %v6233_v58 }
 0x32f   : > { %v1493_v30 = vmul.f32 1.442695, %v1393_v18  ;;  %v1495_v16 = vmul.f32 1.442695, %v1394_v36  ;;  %v1135_v17 = vmul.f32 1.442695, %v6234_v49 }
 0x330   : > { %v6235_v18 = vld [vmem:[#allocation14_spill] sm:$0xff] }
 0x331   : > { %4017 = vpow2.f32 %v1493_v30  ;;  %v6229_v30 = vld [vmem:[#allocation36_spill] sm:$0xff] }
 0x332   : > { %4019 = vpow2.f32 %v1495_v16  ;;  %v6236_v16 = vld [vmem:[#allocation15_spill] sm:$0xff] }
 0x333   : > { %4021 = vpow2.f32 %v1475_v60  ;;  %v6230_v60 = vld [vmem:[#allocation37_spill] sm:$0xff] }
 0x334   : > { %v6231_v29 = vsub.f32 %v6229_v30, %v6230_v60  ;;  %v1559_v60 = vld [vmem:[#allocation3 + $0x50] sm:$0xff] }
 0x336   : > { %v1153_v53 = vmul.f32 1.442695, %v6231_v29 }
 0x337   : > { %v4018_v11 = vpop.eup %4017 }
 0x338   : > { %v5044_v7 = vpop.eup %4019  ;;  %v2016_v57 = vpack.c.bf16 %v5042_v61, %v4018_v11  ;;  %4023 = vpow2.f32 %v1153_v53  ;;  %v1550_v53 = vld [vmem:[#allocation3 + $0x8] sm:$0xff] }
 0x339   : > { %6227 = vst [vmem:[#allocation13_spill] sm:$0xff] %v5044_v7  ;;  %v5048_v39 = vadd.f32 %v5044_v7, %v4018_v11  ;;  %v5050_v4 = vpop.eup %4021  ;;  %v6237_v11 = vsub.f32 %v6235_v18, %v6236_v16  ;;  %4025 = vpow2.f32 %v1135_v17 }
 0x33a   : > { %6228 = vst [vmem:[#allocation12_spill] sm:$0xff] %v5050_v4  ;;  %2211 = vmatmul.bf16.gmra.mxu2 %v2016_v57  ;;  %v1652_v36 = vadd.f32 %v5050_v4, %v4933_v6  ;;  %v6238_v6 = vld [vmem:[#allocation10_spill] sm:$0xff] }
 0x33b   : > { %v1139_v57 = vmul.f32 1.442695, %v6237_v11  ;;  %v1551_v11 = vld [vmem:[#allocation3 + $0x10] sm:$0xff] }
 0x33d   : > { %4027 = vpow2.f32 %v1139_v57 }
 0x33e   : > { %v5071_v30 = vpop.eup %4023 }
 0x33f   : > { %1653 = vadd.xlane.f32.xlu0 %v1652_v36  ;;  %v6239_v36 = vld [vmem:[#allocation11_spill] sm:$0xff]  ;;  %v5073_v29 = vpop.eup %4025  ;;  %v1591_v15 = vmul.f32 %v5071_v30, %v1559_v60 }
 0x340   : > { %1309 = vperm.xlu1 %3939, %v4839_v35   ;;  %v6240_v7 = vsub.f32 %v6238_v6, %v6239_v36  ;;  %v5068_v35 = vpop.permute.xlu0 %1319  ;;  %v1582_v18 = vmul.f32 %v5073_v29, %v1550_v53  ;;  %v1552_v36 = vld [vmem:[#allocation3 + $0x18] sm:$0xff] }
 0x341   : > { %1314 = vperm.xlu2 %3937, %v4904_v32  }
 0x342   : > { %v1137_v1 = vmul.f32 1.442695, %v6240_v7 }
 0x343   : > { %v4028_v49 = vpop.eup %4027 }
 0x344   : > { %4029 = vpow2.f32 %v1137_v1 }
 0x349   : > { %1324 = vperm.xlu2 %3937, %v4896_v54  }
 0x34a   : > { %v5077_v7 = vpop.eup %4029 }
 0x34b   : > { %v1583_v1 = vmul.f32 %v5077_v7, %v1551_v11 }
 0x351   : > { %v1645_v58 = vpop.xlane.xlu0 %1644 }
 0x352   : > { %v1719_v17 = vadd.f32 %v1645_v58, %v1591_v15  ;;  %v1584_v15 = vmul.f32 %v4028_v49, %v1552_v36 }
 0x353   : > { %v1618_v16 = vpop.xlane.xlu2 %1617  ;;  %1823 = vperm.xlu0 %3938, %v4028_v49  }
 0x354   : > { %1752 = vst.msk [vmem:[#allocation3 + $0x50] sm:$0xff] %vm410_vm0, %v1719_v17  ;;  %v1710_v57 = vadd.f32 %v1618_v16, %v1582_v18  ;;  %v6241_v17 = vld [vmem:[#allocation22_spill] sm:$0xff]  ;;  %v6242_v16 = vld [vmem:[#allocation23_spill] sm:$0xff] }
 0x356   : > { %1743 = vst.msk [vmem:[#allocation3 + $0x8] sm:$0xff] %vm410_vm0, %v1710_v57 }
 0x357   : > { %v1621_v6 = vpop.xlane.xlu1 %1620 }
 0x358   : > { %v1711_v60 = vadd.f32 %v1621_v6, %v1583_v1  ;;  %v6244_v6 = vld [vmem:[#allocation26_spill] sm:$0xff] }
 0x35a   : > { %1744 = vst.msk [vmem:[#allocation3 + $0x10] sm:$0xff] %vm410_vm0, %v1711_v60  ;;  %v6245_v60 = vld [vmem:[#allocation28_spill] sm:$0xff] }
 0x35b   : > { %v1624_v58 = vpop.xlane.xlu2 %1623  ;;  %1828 = vperm.xlu0 %3938, %v4997_v63  }
 0x35c   : > { %v1712_v53 = vadd.f32 %v1624_v58, %v1584_v15 }
 0x35e   : > { %1745 = vst.msk [vmem:[#allocation3 + $0x18] sm:$0xff] %vm410_vm0, %v1712_v53 }
 0x363   : > { %v1300_v54 = vpop.permute.xlu2 %1299  ;;  %1354 = vperm.xlu0 %3938, %v5016_v26   ;;  %v1554_v26 = vld [vmem:[#allocation3 + $0x28] sm:$0xff] }
 0x364   : > { %v1397_v18 = vsub.f32 %v6241_v17, %v1300_v54  ;;  %v1398_v57 = vsub.f32 %v6242_v16, %v1300_v54 }
 0x366   : > { %v1501_v11 = vmul.f32 1.442695, %v1397_v18  ;;  %v1503_v4 = vmul.f32 1.442695, %v1398_v57 }
 0x368   : > { %4031 = vpow2.f32 %v1501_v11  ;;  %v6253_v11 = vld [vmem:[#allocation40_spill] sm:$0xff] }
 0x369   : > { %4033 = vpow2.f32 %v1503_v4 }
 0x36a   : > { %1638 = vadd.xlane.f32.xlu1 %v4875_v46  ;;  %v6246_v46 = vld [vmem:[#allocation9_spill] sm:$0xff] }
 0x36b   : > { %v1390_v4 = vsub.f32 %v6246_v46, %v4944_v2  ;;  %v6249_v2 = vld [vmem:[#allocation21_spill] sm:$0xff] }
 0x36e   : > { %v4032_v49 = vpop.eup %4031 }
 0x36f   : > { %v5089_v1 = vpop.eup %4033  ;;  %v1305_v63 = vpop.permute.xlu1 %1304 }
 0x370   : > { %6243 = vst [vmem:[#allocation18_spill] sm:$0xff] %v5089_v1  ;;  %v1399_v36 = vsub.f32 %v6244_v6, %v1305_v63  ;;  %v1400_v15 = vsub.f32 %v6245_v60, %v1305_v63  ;;  %v5094_v58 = vadd.f32 %v5089_v1, %v4032_v49  ;;  %v1487_v63 = vmul.f32 1.442695, %v1390_v4  ;;  %v6248_v6 = vld [vmem:[#allocation20_spill] sm:$0xff]  ;;  %v6254_v1 = vld [vmem:[#allocation43_spill] sm:$0xff] }
 0x372   : > { %v1505_v53 = vmul.f32 1.442695, %v1399_v36  ;;  %v1507_v17 = vmul.f32 1.442695, %v1400_v15  ;;  %1641 = vadd.xlane.f32.xlu2 %v4881_v22  ;;  %v2468_v22 = vld [vmem:[#allocation3 + $0x8] sm:$0xff]  ;;  %v6250_v36 = vsub.f32 %v6248_v6, %v6249_v2  ;;  %v6252_v15 = vld [vmem:[#allocation24_spill] sm:$0xff]  ;;  %v1112_v6 = vsub.f32 %v6253_v11, %v4646_v45 }
 0x373   : > { %vm2519_vm2 = vweird.f32 %v2468_v22  ;;  %v2523_v45 = vand.u32 2147483647, %v2468_v22 }
 0x374   : > { %4035 = vpow2.f32 %v1505_v53 }
 0x375   : > { %4037 = vpow2.f32 %v1507_v17  ;;  %vm2524_vm4 = vcmp.eq.f32.partialorder %v2523_v45, 8.507059e+37 }
 0x376   : > { %4039 = vpow2.f32 %v1487_v63 }
 0x377   : > { %4041 = vrcp.f32 %v2468_v22 }
 0x37a   : > { %v4036_v54 = vpop.eup %4035  ;;  %1650 = vadd.xlane.f32.xlu2 %v4939_v0  ;;  %v1143_v0 = vmul.f32 1.442695, %v6250_v36  ;;  %v1155_v36 = vmul.f32 1.442695, %v1112_v6 }
 0x37b   : > { %v5100_v18 = vpop.eup %4037  ;;  %v2018_v16 = vpack.c.bf16 %v4036_v54, %v4032_v49  ;;  %v6251_v49 = vld [vmem:[#allocation25_spill] sm:$0xff] }
 0x37c   : > { %6247 = vst [vmem:[#allocation5_spill] sm:$0xff] %v5100_v18  ;;  %v5103_v57 = vadd.f32 %v5100_v18, %v4036_v54  ;;  %v5111_v60 = vpop.eup %4039  ;;  %v1107_v53 = vsub.f32 %v6252_v15, %v6251_v49  ;;  %4043 = vpow2.f32 %v1143_v0  ;;  %v1555_v49 = vld [vmem:[#allocation3 + $0x30] sm:$0xff] }
 0x37d   : > { %2216 = vmatmul.bf16.gmra.mxu2 %v2018_v16  ;;  %v4042_v17 = vpop.eup %4041  ;;  %v1661_v54 = vadd.f32 %v5111_v60, %v5026_v56 }
 0x37e   : > { %v1145_v46 = vmul.f32 1.442695, %v1107_v53  ;;  %v2515_v4 = vmul.f32 %v4042_v17, %v2468_v22  ;;  %vm2520_vm1 = vweird.f32 %v4042_v17 }
 0x37f   : > { %vm2521_vm3 = vmor %vm2519_vm2, %vm2520_vm1 }
 0x380   : > { %4045 = vpow2.f32 %v1145_v46  ;;  %v2516_v63 = vsub.f32 1.0, %v2515_v4  ;;  %v6255_v46 = vld [vmem:[#allocation42_spill] sm:$0xff] }
 0x381   : > { %4047 = vpow2.f32 %v1155_v36  ;;  %v1114_v4 = vsub.f32 %v6255_v46, %v6254_v1  ;;  %v5125_v36 = vpop.permute.xlu0 %1334  ;;  %v6256_v1 = vld [vmem:[#allocation44_spill] sm:$0xff] }
 0x382   : > { %v4044_v16 = vpop.eup %4043  ;;  %v2517_v2 = vmul.f32 %v4042_v17, %v2516_v63 }
 0x383   : > { %1329 = vperm.xlu1 %3939, %v4955_v13   ;;  %v1586_v15 = vmul.f32 %v4044_v16, %v1554_v26 }
 0x384   : > { %v2518_v0 = vadd.f32 %v4042_v17, %v2517_v2 }
 0x386   : > { %v4046_v13 = vpop.eup %4045  ;;  %v2522_v6 = vsel %vm2521_vm3, %v4042_v17, %v2518_v0 }
 0x387   : > { %v1587_v53 = vmul.f32 %v4046_v13, %v1555_v49  ;;  %v5123_v2 = vpop.eup %4047 }
 0x38d   : > { %1662 = vadd.xlane.f32.xlu0 %v1661_v54  ;;  %v2525_v54 = vand.u32 2147483648, %v2468_v22  ;;  %v1115_v22 = vsub.f32 %v6256_v1, %v4676_v55 }
 0x38f   : > { %v2526_v26 = vor.u32 1.1754944e-38, %v2525_v54 }
 0x392   : > { %1833 = vperm.xlu2 %3937, %v4044_v16   ;;  %v1159_v16 = vmul.f32 1.442695, %v1114_v4  ;;  %v5134_v4 = vpop.permute.xlu0 %1344 }
 0x394   : > { %4049 = vpow2.f32 %v1159_v16 }
 0x39a   : > { %1838 = vperm.xlu2 %3937, %v4046_v13   ;;  %v1630_v56 = vpop.xlane.xlu1 %1629  ;;  %v2527_v13 = vsel %vm2524_vm4, %v2526_v26, %v2522_v6  ;;  %v4050_v46 = vpop.eup %4049 }
 0x39b   : > { %v1714_v18 = vadd.f32 %v1630_v56, %v1586_v15  ;;  %v1161_v15 = vmul.f32 1.442695, %v1115_v22 }
 0x39c   : > { %v1633_v11 = vpop.xlane.xlu2 %1632 }
 0x39d   : > { %1747 = vst.msk [vmem:[#allocation3 + $0x28] sm:$0xff] %vm410_vm0, %v1714_v18  ;;  %v1715_v63 = vadd.f32 %v1633_v11, %v1587_v53  ;;  %v6257_v53 = vld [vmem:[#allocation47_spill] sm:$0xff] }
 0x39e   : > { %v1117_v54 = vsub.f32 %v6257_v53, %v4696_v62 }
 0x39f   : > { %1748 = vst.msk [vmem:[#allocation3 + $0x30] sm:$0xff] %vm410_vm0, %v1715_v63 }
 0x3a0   : > { %v1165_v45 = vmul.f32 1.442695, %v1117_v54 }
 0x3a1   : > { %2986 = vperm.xlu0 %3938, %v2527_v13  }
 0x3a2   : > { %1863 = vperm.xlu2 %3937, %v5123_v2  }
 0x3a4   : > { %v1315_v18 = vpop.permute.xlu2 %1314 }
 0x3a5   : > { %v1403_v17 = vsub.f32 %v4613_v51, %v1315_v18  ;;  %v1404_v49 = vsub.f32 %v4611_v31, %v1315_v18  ;;  %v6258_v51 = vld [vmem:[#allocation46_spill] sm:$0xff] }
 0x3a6   : > { %v1562_v31 = vld [vmem:[#allocation3 + $0x68] sm:$0xff] }
 0x3a7   : > { %v1513_v0 = vmul.f32 1.442695, %v1403_v17  ;;  %v1515_v56 = vmul.f32 1.442695, %v1404_v49  ;;  %v1594_v1 = vmul.f32 %v4050_v46, %v1562_v31 }
 0x3a9   : > { %4051 = vpow2.f32 %v1513_v0 }
 0x3aa   : > { %4053 = vpow2.f32 %v1515_v56  ;;  %1873 = vperm.xlu2 %3937, %v4050_v46   ;;  %v6261_v56 = vld [vmem:[#allocation32_spill] sm:$0xff] }
 0x3ab   : > { %4055 = vpow2.f32 %v1161_v15  ;;  %v6260_v15 = vld [vmem:[#allocation31_spill] sm:$0xff] }
 0x3ac   : > { %v1325_v55 = vpop.permute.xlu2 %1324  ;;  %4057 = vpow2.f32 %v1165_v45 }
 0x3ad   : > { %v1407_v11 = vsub.f32 %v4689_v5, %v1325_v55  ;;  %v1408_v63 = vsub.f32 %v6258_v51, %v1325_v55  ;;  %1647 = vadd.xlane.f32.xlu1 %v4929_v50  ;;  %v6259_v50 = vld [vmem:[#allocation52_spill] sm:$0xff] }
 0x3ae   : > { %v1118_v17 = vsub.f32 %v6259_v50, %v4745_v28 }
 0x3af   : > { %v4052_v6 = vpop.eup %4051  ;;  %v1521_v26 = vmul.f32 1.442695, %v1407_v11  ;;  %v1523_v16 = vmul.f32 1.442695, %v1408_v63 }
 0x3b0   : > { %v5139_v62 = vpop.eup %4053  ;;  %v1167_v11 = vmul.f32 1.442695, %v1118_v17 }
 0x3b1   : > { %v5141_v13 = vpop.eup %4055  ;;  %4059 = vpow2.f32 %v1521_v26  ;;  %v5144_v22 = vadd.f32 %v5139_v62, %v4052_v6 }
 0x3b2   : > { %4061 = vpow2.f32 %v1523_v16  ;;  %1878 = vperm.xlu2 %3937, %v5141_v13   ;;  %v1654_v5 = vpop.xlane.xlu0 %1653  ;;  %v1310_v18 = vpop.permute.xlu1 %1309  ;;  %v6262_v16 = vld [vmem:[#allocation39_spill] sm:$0xff] }
 0x3b3   : > { %v1722_v49 = vadd.f32 %v1654_v5, %v1594_v1  ;;  %v1401_v0 = vsub.f32 %v6260_v15, %v1310_v18  ;;  %v1402_v53 = vsub.f32 %v6261_v56, %v1310_v18  ;;  %v5152_v45 = vpop.eup %4057  ;;  %v1405_v1 = vsub.f32 %v6262_v16, %v5068_v35  ;;  %v2472_v5 = vld [vmem:[#allocation3 + $0x28] sm:$0xff]  ;;  %v6263_v15 = vld [vmem:[#allocation33_spill] sm:$0xff] }
 0x3b4   : > { %v6266_v16 = vld [vmem:[#allocation34_spill] sm:$0xff]  ;;  %vm2579_vm6 = vweird.f32 %v2472_v5 }
 0x3b5   : > { %1755 = vst.msk [vmem:[#allocation3 + $0x68] sm:$0xff] %vm410_vm0, %v1722_v49  ;;  %v1509_v54 = vmul.f32 1.442695, %v1401_v0  ;;  %v1511_v46 = vmul.f32 1.442695, %v1402_v53  ;;  %v6264_v0 = vld [vmem:[#allocation30_spill] sm:$0xff] }
 0x3b6   : > { %v1517_v49 = vmul.f32 1.442695, %v1405_v1  ;;  %v1109_v56 = vsub.f32 %v6264_v0, %v6263_v15 }
 0x3b7   : > { %v4060_v55 = vpop.eup %4059  ;;  %4063 = vpow2.f32 %v1509_v54 }
 0x3b8   : > { %v5154_v51 = vpop.eup %4061  ;;  %4065 = vpow2.f32 %v1511_v46 }
 0x3b9   : > { %v5157_v63 = vadd.f32 %v5154_v51, %v4060_v55  ;;  %4067 = vpow2.f32 %v1167_v11  ;;  %v1149_v11 = vmul.f32 1.442695, %v1109_v56 }
 0x3ba   : > { %1888 = vperm.xlu2 %3937, %v5152_v45   ;;  %4069 = vrcp.f32 %v2472_v5 }
 0x3bb   : > { %4071 = vpow2.f32 %v1517_v49 }
 0x3bc   : > { %4073 = vpow2.f32 %v1149_v11 }
 0x3bd   : > { %v4064_v28 = vpop.eup %4063 }
 0x3be   : > { %v5160_v31 = vpop.eup %4065  ;;  %v2020_v26 = vpack.c.bf16 %v4052_v6, %v4064_v28 }
 0x3bf   : > { %v5165_v18 = vadd.f32 %v5160_v31, %v4064_v28  ;;  %v5169_v17 = vpop.eup %4067 }
 0x3c0   : > { %2221 = vmatmul.bf16.vlgmr.msra.gmra.mxu3 %v2020_v26  ;;  %v4070_v6 = vpop.eup %4069  ;;  %v6265_v26 = vld [vmem:[#allocation35_spill] sm:$0xff] }
 0x3c1   : > { %v2575_v53 = vmul.f32 %v4070_v6, %v2472_v5  ;;  %v5176_v54 = vpop.eup %4071  ;;  %v1110_v1 = vsub.f32 %v6266_v16, %v6265_v26  ;;  %vm2580_vm5 = vweird.f32 %v4070_v6 }
 0x3c2   : > { %1893 = vperm.xlu2 %3937, %v5169_v17   ;;  %v2022_v46 = vpack.c.bf16 %v4060_v55, %v5176_v54  ;;  %v4074_v50 = vpop.eup %4073  ;;  %vm2581_vm7 = vmor %vm2579_vm6, %vm2580_vm5  ;;  %v6267_v55 = vld [vmem:[#allocation41_spill] sm:$0xff] }
 0x3c3   : > { %v2576_v28 = vsub.f32 1.0, %v2575_v53  ;;  %v1151_v15 = vmul.f32 1.442695, %v1110_v1  ;;  %v1113_v56 = vsub.f32 %v6267_v55, %v4657_v14 }
 0x3c5   : > { %v2577_v49 = vmul.f32 %v4070_v6, %v2576_v28  ;;  %4075 = vpow2.f32 %v1151_v15  ;;  %v1157_v1 = vmul.f32 1.442695, %v1113_v56  ;;  %v2467_v15 = vld [vmem:[#allocation3] sm:$0xff] }
 0x3c6   : > { %1339 = vperm.xlu1 %3939, %v4958_v40   ;;  %v1557_v40 = vld [vmem:[#allocation3 + $0x40] sm:$0xff]  ;;  %vm2504_vm10 = vweird.f32 %v2467_v15 }
 0x3c7   : > { %v2578_v0 = vadd.f32 %v4070_v6, %v2577_v49  ;;  %4077 = vpow2.f32 %v1157_v1 }
 0x3c8   : > { %4079 = vrcp.f32 %v2467_v15 }
 0x3c9   : > { %v2582_v53 = vsel %vm2581_vm7, %v4070_v6, %v2578_v0  ;;  %v1561_v0 = vld [vmem:[#allocation3 + $0x60] sm:$0xff] }
 0x3cb   : > { %1674 = vadd.xlane.f32.xlu0 %v5094_v58  ;;  %v2585_v58 = vand.u32 2147483648, %v2472_v5  ;;  %v5187_v49 = vpop.eup %4075 }
 0x3cd   : > { %v2586_v11 = vor.u32 1.1754944e-38, %v2585_v58 }
 0x3ce   : > { %1813 = vperm.xlu1 %3939, %v5073_v29   ;;  %v2583_v29 = vand.u32 2147483647, %v2472_v5  ;;  %v1558_v5 = vld [vmem:[#allocation3 + $0x48] sm:$0xff] }
 0x3cf   : > { %v1590_v14 = vmul.f32 %v5187_v49, %v1558_v5 }
 0x3d0   : > { %2226 = vmatmul.bf16.gmra.mxu3 %v2022_v46  ;;  %v1589_v46 = vmul.f32 %v4074_v50, %v1557_v40  ;;  %vm2584_vm8 = vcmp.eq.f32.partialorder %v2583_v29, 8.507059e+37 }
 0x3d1   : > { %v2587_v16 = vsel %vm2584_vm8, %v2586_v11, %v2582_v53 }
 0x3d6   : > { %1349 = vperm.xlu1 %3939, %v4899_v47   ;;  %v5189_v47 = vpop.permute.xlu0 %1823 }
 0x3dd   : > { %v1639_v26 = vpop.xlane.xlu1 %1638 }
 0x3de   : > { %v1717_v28 = vadd.f32 %v1639_v26, %v1589_v46  ;;  %1818 = vperm.xlu1 %3939, %v5077_v7   ;;  %v5194_v7 = vpop.eup %4077  ;;  %v5198_v56 = vpop.permute.xlu0 %1828 }
 0x3df   : > { %3006 = vperm.xlu0 %3938, %v2587_v16   ;;  %v4080_v58 = vpop.eup %4079  ;;  %v1593_v29 = vmul.f32 %v5194_v7, %v1561_v0  ;;  %v1565_v0 = vld [vmem:[#allocation3 + $0x80] sm:$0xff] }
 0x3e0   : > { %1750 = vst.msk [vmem:[#allocation3 + $0x40] sm:$0xff] %vm410_vm0, %v1717_v28  ;;  %v2500_v46 = vmul.f32 %v4080_v58, %v2467_v15  ;;  %vm2505_vm9 = vweird.f32 %v4080_v58 }
 0x3e1   : > { %vm2506_vm11 = vmor %vm2504_vm10, %vm2505_vm9 }
 0x3e2   : > { %v2501_v26 = vsub.f32 1.0, %v2500_v46 }
 0x3e4   : > { %v2502_v5 = vmul.f32 %v4080_v58, %v2501_v26 }
 0x3e5   : > { %v1642_v40 = vpop.xlane.xlu2 %1641 }
 0x3e6   : > { %v1718_v6 = vadd.f32 %v1642_v40, %v1590_v14  ;;  %1843 = vperm.xlu1 %3939, %v5001_v8   ;;  %v6268_v8 = vld [vmem:[#allocation48_spill] sm:$0xff]  ;;  %v5205_v14 = vpop.permute.xlu0 %1354 }
 0x3e7   : > { %v1411_v11 = vsub.f32 %v6268_v8, %v5125_v36 }
 0x3e8   : > { %1751 = vst.msk [vmem:[#allocation3 + $0x48] sm:$0xff] %vm410_vm0, %v1718_v6 }
 0x3e9   : > { %v1529_v28 = vmul.f32 1.442695, %v1411_v11 }
 0x3eb   : > { %1659 = vadd.xlane.f32.xlu2 %v4984_v44  ;;  %4081 = vpow2.f32 %v1529_v28 }
 0x3ed   : > { %v1651_v55 = vpop.xlane.xlu2 %1650 }
 0x3ee   : > { %v1721_v53 = vadd.f32 %v1651_v55, %v1593_v29  ;;  %1848 = vperm.xlu1 %3939, %v4074_v50   ;;  %v2503_v50 = vadd.f32 %v4080_v58, %v2502_v5  ;;  %v2510_v29 = vand.u32 2147483648, %v2467_v15  ;;  %v2508_v55 = vand.u32 2147483647, %v2467_v15 }
 0x3f0   : > { %1754 = vst.msk [vmem:[#allocation3 + $0x60] sm:$0xff] %vm410_vm0, %v1721_v53  ;;  %v2473_v53 = vld [vmem:[#allocation3 + $0x30] sm:$0xff]  ;;  %v2511_v26 = vor.u32 1.1754944e-38, %v2510_v29  ;;  %vm2509_vm12 = vcmp.eq.f32.partialorder %v2508_v55, 8.507059e+37 }
 0x3f1   : > { %v5207_v46 = vpop.eup %4081  ;;  %v2600_v29 = vand.u32 2147483648, %v2473_v53  ;;  %vm2594_vm14 = vweird.f32 %v2473_v53  ;;  %v2598_v55 = vand.u32 2147483647, %v2473_v53 }
 0x3f3   : > { %vm2599_vm1 = vcmp.eq.f32.partialorder %v2598_v55, 8.507059e+37 }
 0x3f5   : > { %v1330_v16 = vpop.permute.xlu1 %1329 }
 0x3f6   : > { %v1409_v1 = vsub.f32 %v4704_v20, %v1330_v16  ;;  %v1410_v44 = vsub.f32 %v4706_v9, %v1330_v16  ;;  %v1597_v9 = vmul.f32 %v5152_v45, %v1565_v0  ;;  %v2507_v20 = vsel %vm2506_vm11, %v4080_v58, %v2503_v50 }
 0x3f8   : > { %v1525_v40 = vmul.f32 1.442695, %v1409_v1  ;;  %v1527_v6 = vmul.f32 1.442695, %v1410_v44  ;;  %v2512_v44 = vsel %vm2509_vm12, %v2511_v26, %v2507_v20  ;;  %v1560_v26 = vld [vmem:[#allocation3 + $0x58] sm:$0xff] }
 0x3fa   : > { %4083 = vpow2.f32 %v1525_v40 }
 0x3fb   : > { %4085 = vpow2.f32 %v1527_v6  ;;  %v6270_v6 = vld [vmem:[#allocation19_spill] sm:$0xff] }
 0x3fc   : > { %4087 = vrcp.f32 %v2473_v53  ;;  %v1396_v50 = vsub.f32 %v6270_v6, %v4995_v42  ;;  %v1592_v42 = vmul.f32 %v5123_v2, %v1560_v26  ;;  %v3874_v26 = vld [vmem:[%s4638_s10 + $0x60] sm:$0xff] }
 0x400   : > { %v4084_v8 = vpop.eup %4083  ;;  %v1663_v11 = vpop.xlane.xlu0 %1662 }
 0x401   : > { %v5210_v28 = vpop.eup %4085  ;;  %v1725_v16 = vadd.f32 %v1663_v11, %v1597_v9  ;;  %v2024_v1 = vpack.c.bf16 %v5207_v46, %v4084_v8  ;;  %v1499_v9 = vmul.f32 1.442695, %v1396_v50  ;;  %v2601_v11 = vor.u32 1.1754944e-38, %v2600_v29  ;;  %v3876_v50 = vld [vmem:[%s4638_s10 + $0x70] sm:$0xff] }
 0x402   : > { %6269 = vst [vmem:[#allocation16_spill] sm:$0xff] %v5210_v28  ;;  %v5214_v15 = vadd.f32 %v5210_v28, %v4084_v8  ;;  %v4088_v45 = vpop.eup %4087  ;;  %v5221_v8 = vpop.permute.xlu2 %1833 }
 0x403   : > { %1758 = vst.msk [vmem:[#allocation3 + $0x80] sm:$0xff] %vm410_vm0, %v1725_v16  ;;  %2981 = vperm.xlu2 %3937, %v2512_v44   ;;  %2231 = vmatmul.bf16.gmra.mxu3 %v2024_v1  ;;  %v2590_v58 = vmul.f32 %v4088_v45, %v2473_v53  ;;  %vm2595_vm13 = vweird.f32 %v4088_v45  ;;  %4089 = vpow2.f32 %v1499_v9  ;;  %v3875_v9 = vld [vmem:[%s4638_s10 + $0x68] sm:$0xff] }
 0x404   : > { %vm2596_vm15 = vmor %vm2594_vm14, %vm2595_vm13 }
 0x405   : > { %v2591_v5 = vsub.f32 1.0, %v2590_v58  ;;  %v5239_v58 = vld [vmem:[#allocation3 + $0x20] sm:$0xff] }
 0x406   : > { %vm2564_vm11 = vweird.f32 %v5239_v58 }
 0x407   : > { %v2592_v40 = vmul.f32 %v4088_v45, %v2591_v5  ;;  %v6271_v5 = vld [vmem:[#allocation63_spill] sm:$0xff] }
 0x409   : > { %1683 = vadd.xlane.f32.xlu0 %v5144_v22  ;;  %v2593_v0 = vadd.f32 %v4088_v45, %v2592_v40  ;;  %v5227_v1 = vpop.eup %4089  ;;  %v1121_v40 = vsub.f32 %v6271_v5, %v4828_v52  ;;  %v3873_v5 = vld [vmem:[%s4638_s10 + $0x58] sm:$0xff] }
 0x40a   : > { %v5230_v44 = vpop.permute.xlu2 %1838  ;;  %v1670_v2 = vadd.f32 %v5227_v1, %v5042_v61 }
 0x40b   : > { %v2597_v20 = vsel %vm2596_vm15, %v4088_v45, %v2593_v0  ;;  %v5233_v45 = vld [vmem:[#allocation3 + $0x10] sm:$0xff]  ;;  %v1173_v0 = vmul.f32 1.442695, %v1121_v40 }
 0x40c   : > { %v2602_v22 = vsel %vm2599_vm1, %v2601_v11, %v2597_v20  ;;  %vm2534_vm6 = vweird.f32 %v5233_v45 }
 0x412   : > { %v5252_v55 = vpop.permute.xlu2 %1863 }
 0x413   : > { %6272 = vst [vmem:[#allocation17_spill] sm:$0xff] %v5252_v55 }
 0x418   : > { %1656 = vadd.xlane.f32.xlu1 %v4976_v10  ;;  %v5225_v10 = vld [vmem:[#allocation3 + $0x18] sm:$0xff] }
 0x419   : > { %4091 = vrcp.f32 %v5225_v10  ;;  %vm2549_vm3 = vweird.f32 %v5225_v10 }
 0x41a   : > { %4093 = vrcp.f32 %v5233_v45 }
 0x41b   : > { %4095 = vrcp.f32 %v5239_v58 }
 0x41c   : > { %4097 = vpow2.f32 %v1173_v0  ;;  %v1569_v0 = vld [vmem:[#allocation3 + $0xa0] sm:$0xff] }
 0x41d   : > { %3011 = vperm.xlu0 %3938, %v2602_v22  }
 0x41f   : > { %v5243_v6 = vpop.eup %4091 }
 0x420   : > { %1665 = vadd.xlane.f32.xlu1 %v5033_v27  ;;  %v1648_v16 = vpop.xlane.xlu1 %1647  ;;  %v3877_v27 = vld [vmem:[%s4638_s10 + $0x78] sm:$0xff]  ;;  %v5248_v61 = vpop.eup %4093  ;;  %v2545_v29 = vmul.f32 %v5243_v6, %v5225_v10  ;;  %vm2550_vm2 = vweird.f32 %v5243_v6 }
 0x421   : > { %v1720_v53 = vadd.f32 %v1648_v16, %v1592_v42  ;;  %2247 = vmatpush.bf16.msrb.mxu3 %v3877_v27  ;;  %v2530_v52 = vmul.f32 %v5248_v61, %v5233_v45  ;;  %v5257_v20 = vpop.eup %4095  ;;  %v1415_v42 = vsub.f32 %v4776_v25, %v5134_v4  ;;  %v5267_v27 = vpop.permute.xlu0 %2986  ;;  %vm5286_vm4 = vmor %vm2549_vm3, %vm2550_vm2  ;;  %vm2535_vm5 = vweird.f32 %v5248_v61 }
 0x422   : > { %v2546_v11 = vsub.f32 1.0, %v2545_v29  ;;  %v5270_v40 = vpop.eup %4097  ;;  %vm5299_vm8 = vmor %vm2534_vm6, %vm2535_vm5  ;;  %vm2565_vm9 = vweird.f32 %v5257_v20 }
 0x423   : > { %1753 = vst.msk [vmem:[#allocation3 + $0x58] sm:$0xff] %vm410_vm0, %v1720_v53  ;;  %v2531_v16 = vsub.f32 1.0, %v2530_v52  ;;  %v2560_v53 = vmul.f32 %v5257_v20, %v5239_v58  ;;  %v1537_v29 = vmul.f32 1.442695, %v1415_v42  ;;  %v2553_v42 = vand.u32 2147483647, %v5225_v10  ;;  %vm2566_vm12 = vmor %vm2564_vm11, %vm2565_vm9 }
 0x425   : > { %2248 = vmatpush.bf16.msrb.mxu3 %v3876_v50  ;;  %v2532_v25 = vmul.f32 %v5248_v61, %v2531_v16  ;;  %v2561_v52 = vsub.f32 1.0, %v2560_v53  ;;  %v3872_v16 = vld [vmem:[%s4638_s10 + $0x50] sm:$0xff]  ;;  %vm2554_vm7 = vcmp.eq.f32.partialorder %v2553_v42, 8.507059e+37 }
 0x427   : > { %v2533_v53 = vadd.f32 %v5248_v61, %v2532_v25 }
 0x428   : > { %1671 = vadd.xlane.f32.xlu1 %v1670_v2  ;;  %v2547_v2 = vmul.f32 %v5243_v6, %v2546_v11 }
 0x429   : > { %2249 = vmatpush.bf16.msrb.mxu3 %v3875_v9 }
 0x42c   : > { %1668 = vadd.xlane.f32.xlu2 %v5048_v39  ;;  %v6273_v39 = vld [vmem:[#allocation49_spill] sm:$0xff] }
 0x42d   : > { %v1412_v22 = vsub.f32 %v6273_v39, %v5125_v36  ;;  %2250 = vmatpush.bf16.msrb.mxu3 %v3874_v26  ;;  %v5272_v36 = vpop.permute.xlu2 %1873  ;;  %v2548_v26 = vadd.f32 %v5243_v6, %v2547_v2 }
 0x42e   : > { %6274 = vst [vmem:[#allocation36_spill] sm:$0xff] %v5272_v36  ;;  %v2555_v36 = vand.u32 2147483648, %v5225_v10  ;;  %v2540_v10 = vand.u32 2147483648, %v5233_v45 }
 0x42f   : > { %v1531_v50 = vmul.f32 1.442695, %v1412_v22  ;;  %v1601_v22 = vmul.f32 %v5270_v40, %v1569_v0  ;;  %v2552_v2 = vsel %vm5286_vm4, %v5243_v6, %v2548_v26  ;;  %v3871_v6 = vld [vmem:[%s4638_s10 + $0x48] sm:$0xff] }
 0x431   : > { %2251 = vmatpush.bf16.msrb.mxu3 %v3873_v5  ;;  %4099 = vpow2.f32 %v1531_v50  ;;  %v2562_v5 = vmul.f32 %v5257_v20, %v2561_v52  ;;  %v2538_v50 = vand.u32 2147483647, %v5233_v45  ;;  %v2541_v45 = vor.u32 1.1754944e-38, %v2540_v10 }
 0x432   : > { %4101 = vpow2.f32 %v1537_v29 }
 0x433   : > { %v2563_v52 = vadd.f32 %v5257_v20, %v2562_v5  ;;  %vm2539_vm10 = vcmp.eq.f32.partialorder %v2538_v50, 8.507059e+37  ;;  %v6279_v50 = vld [vmem:[#allocation60_spill] sm:$0xff] }
 0x435   : > { %2252 = vmatpush.bf16.msrb.mxu3 %v3872_v16  ;;  %v5315_v26 = vpop.permute.xlu2 %1878  ;;  %v2568_v16 = vand.u32 2147483647, %v5239_v58  ;;  %v2567_v10 = vsel %vm2566_vm12, %v5257_v20, %v2563_v52 }
 0x437   : > { %vm2569_vm13 = vcmp.eq.f32.partialorder %v2568_v16, 8.507059e+37 }
 0x438   : > { %v1340_v9 = vpop.permute.xlu1 %1339 }
 0x439   : > { %v1413_v39 = vsub.f32 %v4753_v38, %v1340_v9  ;;  %v1414_v11 = vsub.f32 %v4755_v23, %v1340_v9  ;;  %v1416_v23 = vsub.f32 %v4778_v33, %v5134_v4  ;;  %v2556_v4 = vor.u32 1.1754944e-38, %v2555_v36  ;;  %v5309_v36 = vpop.eup %4099  ;;  %2253 = vmatpush.bf16.msrb.mxu3 %v3871_v6 }
 0x43a   : > { %v1419_v38 = vsub.f32 %v4920_v59, %v5205_v14 }
 0x43b   : > { %v1533_v55 = vmul.f32 1.442695, %v1413_v39  ;;  %v1535_v28 = vmul.f32 1.442695, %v1414_v11  ;;  %v1539_v29 = vmul.f32 1.442695, %v1416_v23  ;;  %v2557_v25 = vsel %vm2554_vm7, %v2556_v4, %v2552_v2  ;;  %v4102_v11 = vpop.eup %4101 }
 0x43c   : > { %v3870_v39 = vld [vmem:[%s4638_s10 + $0x40] sm:$0xff]  ;;  %v1694_v2 = vadd.f32 %v5309_v36, %v5207_v46  ;;  %s5903_s10 = scalar_lea.vmem %s6043_s3, %s3828_s7 }
 0x43d   : > { %4103 = vpow2.f32 %v1533_v55  ;;  %2254 = vmatpush.bf16.msrb.mxu3 %v3870_v39  ;;  %v6280_v55 = vld [vmem:[#allocation61_spill] sm:$0xff] }
 0x43e   : > { %4105 = vpow2.f32 %v1535_v28  ;;  %v1675_v33 = vpop.xlane.xlu0 %1674  ;;  %v2537_v28 = vsel %vm5299_vm8, %v5248_v61, %v2533_v53 }
 0x43f   : > { %v1729_v0 = vadd.f32 %v1675_v33, %v1601_v22  ;;  %v2570_v22 = vand.u32 2147483648, %v5239_v58  ;;  %v2542_v61 = vsel %vm2539_vm10, %v2541_v45, %v2537_v28  ;;  %4107 = vpow2.f32 %v1539_v29  ;;  %v5338_v45 = vpop.permute.xlu2 %1888 }
 0x440   : > { %v5304_v9 = vpop.permute.xlu1 %1813  ;;  %v1545_v33 = vmul.f32 1.442695, %v1419_v38 }
 0x441   : > { %1762 = vst.msk [vmem:[#allocation3 + $0xa0] sm:$0xff] %vm410_vm0, %v1729_v0  ;;  %2996 = vperm.xlu1 %3939, %v2557_v25   ;;  %v2571_v58 = vor.u32 1.1754944e-38, %v2570_v22  ;;  %v6281_v25 = vld [vmem:[#allocation45_spill] sm:$0xff] }
 0x442   : > { %v1116_v28 = vsub.f32 %v6281_v25, %v4685_v37  ;;  %4109 = vpow2.f32 %v1545_v33  ;;  %v6284_v25 = vld [vmem:[#allocation38_spill] sm:$0xff] }
 0x443   : > { %v4104_v42 = vpop.eup %4103  ;;  %v2572_v4 = vsel %vm2569_vm13, %v2571_v58, %v2567_v10 }
 0x444   : > { %v5320_v23 = vpop.eup %4105  ;;  %2991 = vperm.xlu2 %3937, %v2542_v61   ;;  %v2026_v53 = vpack.c.bf16 %v4102_v11, %v4104_v42  ;;  %v1163_v39 = vmul.f32 1.442695, %v1116_v28  ;;  %v2477_v61 = vld [vmem:[#allocation3 + $0x50] sm:$0xff]  ;;  %v1406_v28 = vsub.f32 %v6284_v25, %v5068_v35 }
 0x445   : > { %v5330_v5 = vadd.f32 %v5320_v23, %v4104_v42  ;;  %v5334_v29 = vpop.eup %4107  ;;  %vm2654_vm15 = vweird.f32 %v2477_v61 }
 0x446   : > { %2236 = vmatmul.bf16.gmra.mxu3 %v2026_v53  ;;  %v1700_v52 = vadd.f32 %v5334_v29, %v4102_v11 }
 0x447   : > { %1695 = vadd.xlane.f32.xlu0 %v1694_v2  ;;  %v5349_v53 = vpop.permute.xlu2 %1893  ;;  %v1564_v2 = vld [vmem:[#allocation3 + $0x78] sm:$0xff] }
 0x448   : > { %v1350_v59 = vpop.permute.xlu1 %1349  ;;  %v5341_v22 = vpop.eup %4109 }
 0x449   : > { %v1417_v0 = vsub.f32 %v6279_v50, %v1350_v59  ;;  %v1418_v6 = vsub.f32 %v6280_v55, %v1350_v59  ;;  %3001 = vperm.xlu1 %3939, %v2572_v4   ;;  %v5358_v55 = vld [vmem:[#allocation3 + $0x38] sm:$0xff] }
 0x44a   : > { %vm2609_vm7 = vweird.f32 %v5358_v55 }
 0x44b   : > { %v1541_v46 = vmul.f32 1.442695, %v1417_v0  ;;  %v1543_v20 = vmul.f32 1.442695, %v1418_v6  ;;  %v5356_v0 = vld [vmem:[#allocation3 + $0x68] sm:$0xff] }
 0x44c   : > { %v6282_v6 = vld [vmem:[#allocation50_spill] sm:$0xff]  ;;  %vm2699_vm5 = vweird.f32 %v5356_v0 }
 0x44d   : > { %4111 = vpow2.f32 %v1541_v46  ;;  %v6283_v46 = vpack.c.bf16 %v6282_v6, %v4718_v19  ;;  %v1519_v19 = vmul.f32 1.442695, %v1406_v28 }
 0x44e   : > { %4113 = vpow2.f32 %v1543_v20 }
 0x44f   : > { %1701 = vadd.xlane.f32.xlu0 %v1700_v52  ;;  %4115 = vpow2.f32 %v1163_v39  ;;  %v5370_v39 = vld [vmem:[#allocation3 + $0x80] sm:$0xff] }
 0x450   : > { %4117 = vrcp.f32 %v2477_v61  ;;  %vm2744_vm12 = vweird.f32 %v5370_v39 }
 0x451   : > { %4119 = vrcp.f32 %v5356_v0 }
 0x452   : > { %4121 = vrcp.f32 %v5358_v55 }
 0x453   : > { %v4112_v42 = vpop.eup %4111  ;;  %4123 = vrcp.f32 %v5370_v39 }
 0x454   : > { %v5343_v16 = vpop.eup %4113  ;;  %v2028_v38 = vpack.c.bf16 %v5341_v22, %v4112_v42  ;;  %4125 = vpow2.f32 %v1519_v19 }
 0x455   : > { %v5347_v37 = vadd.f32 %v5343_v16, %v4112_v42  ;;  %v5351_v11 = vpop.eup %4115 }
 0x456   : > { %2241 = vmatmul.bf16.gmra.mxu3 %v2028_v38  ;;  %v4118_v10 = vpop.eup %4117  ;;  %v1596_v58 = vmul.f32 %v5351_v11, %v1564_v2  ;;  %v2660_v38 = vand.u32 2147483648, %v2477_v61  ;;  %v2658_v2 = vand.u32 2147483647, %v2477_v61 }
 0x457   : > { %v2650_v4 = vmul.f32 %v4118_v10, %v2477_v61  ;;  %vm2655_vm14 = vweird.f32 %v4118_v10  ;;  %v5372_v42 = vpop.eup %4119 }
 0x458   : > { %v5375_v35 = vpop.eup %4121  ;;  %vm2656_vm1 = vmor %vm2654_vm15, %vm2655_vm14  ;;  %vm2659_vm2 = vcmp.eq.f32.partialorder %v2658_v2, 8.507059e+37  ;;  %vm2700_vm3 = vweird.f32 %v5372_v42 }
 0x459   : > { %v2651_v50 = vsub.f32 1.0, %v2650_v4  ;;  %v5385_v4 = vpop.eup %4123  ;;  %vm2610_vm4 = vweird.f32 %v5375_v35  ;;  %vm2701_vm6 = vmor %vm2699_vm5, %vm2700_vm3 }
 0x45a   : > { %vm2611_vm8 = vmor %vm2609_vm7, %vm2610_vm4  ;;  %vm2745_vm11 = vweird.f32 %v5385_v4 }
 0x45b   : > { %v2652_v20 = vmul.f32 %v4118_v10, %v2651_v50  ;;  %v5387_v50 = vpop.permute.xlu0 %3006  ;;  %vm2746_vm13 = vmor %vm2744_vm12, %vm2745_vm11 }
 0x45d   : > { %v2653_v52 = vadd.f32 %v4118_v10, %v2652_v20  ;;  %v6285_v20 = vld [vmem:[#allocation51_spill] sm:$0xff] }
 0x45e   : > { %v1660_v33 = vpop.xlane.xlu2 %1659  ;;  %v6286_v25 = vpack.c.bf16 %v4773_v41, %v6285_v20  ;;  %v2613_v20 = vand.u32 2147483647, %v5358_v55 }
 0x45f   : > { %v1724_v59 = vadd.f32 %v1660_v33, %v1596_v58  ;;  %v2661_v33 = vor.u32 1.1754944e-38, %v2660_v38 }
 0x460   : > { %vm2614_vm10 = vcmp.eq.f32.partialorder %v2613_v20, 8.507059e+37  ;;  %v6290_v20 = vld [vmem:[#allocation55_spill] sm:$0xff] }
 0x461   : > { %1757 = vst.msk [vmem:[#allocation3 + $0x78] sm:$0xff] %vm410_vm0, %v1724_v59 }
 0x463   : > { %1853 = vperm.xlu0 %3938, %v5187_v49   ;;  %v1124_v49 = vsub.f32 %v4893_v34, %v4904_v32  ;;  %v5378_v34 = vpop.permute.xlu1 %1818  ;;  %v2657_v32 = vsel %vm2656_vm1, %v4118_v10, %v2653_v52  ;;  %v5389_v10 = vld [vmem:[#allocation3 + $0x48] sm:$0xff]  ;;  %v1572_v52 = vld [vmem:[#allocation3 + $0xb8] sm:$0xff] }
 0x464   : > { %v2662_v61 = vsel %vm2659_vm2, %v2661_v33, %v2657_v32  ;;  %v2705_v33 = vand.u32 2147483648, %v5356_v0  ;;  %vm2639_vm1 = vweird.f32 %v5389_v10 }
 0x465   : > { %v1179_v58 = vmul.f32 1.442695, %v1124_v49  ;;  %v2740_v49 = vmul.f32 %v5385_v4, %v5370_v39 }
 0x466   : > { %2255 = vmatmul.bf16.vlgmr.msrb.gmra.mxu3 %v6283_v46  ;;  %v5391_v46 = vpop.eup %4125 }
 0x467   : > { %4127 = vpow2.f32 %v1179_v58  ;;  %v1685_v38 = vadd.f32 %v5391_v46, %v5176_v54  ;;  %v2741_v32 = vsub.f32 1.0, %v2740_v49 }
 0x468   : > { %4129 = vrcp.f32 %v5389_v10 }
 0x46b   : > { %1858 = vperm.xlu0 %3938, %v5071_v30   ;;  %v2695_v30 = vmul.f32 %v5372_v42, %v5356_v0  ;;  %v5402_v19 = vpop.permute.xlu1 %1843 }
 0x46d   : > { %1677 = vadd.xlane.f32.xlu2 %v5103_v57  ;;  %v2605_v57 = vmul.f32 %v5375_v35, %v5358_v55  ;;  %v2696_v59 = vsub.f32 1.0, %v2695_v30 }
 0x46f   : > { %v2606_v6 = vsub.f32 1.0, %v2605_v57  ;;  %v2697_v28 = vmul.f32 %v5372_v42, %v2696_v59  ;;  %v2615_v59 = vand.u32 2147483648, %v5358_v55  ;;  %v6287_v55 = vld [vmem:[#allocation54_spill] sm:$0xff] }
 0x471   : > { %v2607_v2 = vmul.f32 %v5375_v35, %v2606_v6  ;;  %v2698_v58 = vadd.f32 %v5372_v42, %v2697_v28  ;;  %v2706_v28 = vor.u32 1.1754944e-38, %v2705_v33  ;;  %v6288_v33 = vld [vmem:[#allocation62_spill] sm:$0xff] }
 0x473   : > { %3031 = vperm.xlu0 %3938, %v2662_v61   ;;  %1680 = vadd.xlane.f32.xlu1 %v5165_v18  ;;  %v5400_v18 = vpop.eup %4127  ;;  %v2608_v61 = vadd.f32 %v5375_v35, %v2607_v2  ;;  %v2702_v6 = vsel %vm2701_vm6, %v5372_v42, %v2698_v58  ;;  %v5427_v2 = vpop.permute.xlu1 %1848 }
 0x474   : > { %v1604_v41 = vmul.f32 %v5400_v18, %v1572_v52  ;;  %v5413_v57 = vpop.eup %4129 }
 0x475   : > { %v2612_v49 = vsel %vm2611_vm8, %v5375_v35, %v2608_v61  ;;  %v2748_v35 = vand.u32 2147483647, %v5370_v39  ;;  %v1563_v61 = vld [vmem:[#allocation3 + $0x70] sm:$0xff]  ;;  %vm2640_vm15 = vweird.f32 %v5413_v57 }
 0x476   : > { %2260 = vmatmul.bf16.gmra.mxu3 %v6286_v25  ;;  %v2742_v25 = vmul.f32 %v5385_v4, %v2741_v32  ;;  %v2750_v32 = vand.u32 2147483648, %v5370_v39  ;;  %vm2641_vm2 = vmor %vm2639_vm1, %vm2640_vm15 }
 0x477   : > { %vm2749_vm14 = vcmp.eq.f32.partialorder %v2748_v35, 8.507059e+37 }
 0x478   : > { %v2743_v42 = vadd.f32 %v5385_v4, %v2742_v25  ;;  %v1120_v25 = vsub.f32 %v6290_v20, %v4769_v21  ;;  %v2643_v21 = vand.u32 2147483647, %v5389_v10 }
 0x47a   : > { %vm2644_vm3 = vcmp.eq.f32.partialorder %v2643_v21, 8.507059e+37 }
 0x47b   : > { %1868 = vperm.xlu0 %3938, %v5194_v7   ;;  %1686 = vadd.xlane.f32.xlu1 %v1685_v38  ;;  %v2703_v7 = vand.u32 2147483647, %v5356_v0  ;;  %v2635_v0 = vmul.f32 %v5413_v57, %v5389_v10  ;;  %v2616_v38 = vor.u32 1.1754944e-38, %v2615_v59 }
 0x47c   : > { %v1684_v30 = vpop.xlane.xlu0 %1683 }
 0x47d   : > { %v1732_v54 = vadd.f32 %v1684_v30, %v1604_v41  ;;  %vm2704_vm9 = vcmp.eq.f32.partialorder %v2703_v7, 8.507059e+37  ;;  %v1119_v41 = vsub.f32 %v6287_v55, %v4760_v24  ;;  %v2617_v58 = vsel %vm2614_vm10, %v2616_v38, %v2612_v49  ;;  %v2487_v49 = vld [vmem:[#allocation3 + $0xa0] sm:$0xff]  ;;  %v5451_v55 = vpop.f32.mrf.mxu3 }
 0x47e   : > { %v2707_v52 = vsel %vm2704_vm9, %v2706_v28, %v2702_v6  ;;  %v2636_v30 = vsub.f32 1.0, %v2635_v0  ;;  %v2747_v7 = vsel %vm2746_vm13, %v5385_v4, %v2743_v42  ;;  %v2751_v6 = vor.u32 1.1754944e-38, %v2750_v32 }
 0x47f   : > { %1765 = vst.msk [vmem:[#allocation3 + $0xb8] sm:$0xff] %vm410_vm0, %v1732_v54  ;;  %v6289_v54 = vpack.c.bf16 %v6288_v33, %v4812_v12  ;;  %v1169_v59 = vmul.f32 1.442695, %v1119_v41  ;;  %v1595_v0 = vmul.f32 %v5141_v13, %v1563_v61  ;;  %v1171_v4 = vmul.f32 1.442695, %v1120_v25  ;;  %v1566_v13 = vld [vmem:[#allocation3 + $0x88] sm:$0xff] }
 0x480   : > { %v2637_v24 = vmul.f32 %v5413_v57, %v2636_v30  ;;  %v2752_v28 = vsel %vm2749_vm14, %v2751_v6, %v2747_v7  ;;  %v2645_v38 = vand.u32 2147483648, %v5389_v10  ;;  %v1598_v32 = vmul.f32 %v5169_v17, %v1566_v13  ;;  %v6291_v10 = vld [vmem:[#allocation68_spill] sm:$0xff]  ;;  %v6292_v7 = vld [vmem:[#allocation67_spill] sm:$0xff] }
 0x481   : > { %4131 = vpow2.f32 %v1169_v59  ;;  %v6293_v61 = vpack.c.bf16 %v6291_v10, %v6292_v7  ;;  %v5458_v59 = vpop.permute.xlu2 %2981  ;;  %v1568_v6 = vld [vmem:[#allocation3 + $0x98] sm:$0xff]  ;;  %v2810_v13 = vand.u32 2147483648, %v2487_v49  ;;  %vm2804_vm5 = vweird.f32 %v2487_v49  ;;  %v6298_v10 = vld [vmem:[#allocation66_spill] sm:$0xff] }
 0x482   : > { %4133 = vrcp.f32 %v2487_v49  ;;  %v2646_v41 = vor.u32 1.1754944e-38, %v2645_v38  ;;  %v1128_v7 = vsub.f32 %v6298_v10, %v4848_v48 }
 0x483   : > { %3046 = vperm.xlu0 %3938, %v2707_v52   ;;  %v2638_v52 = vadd.f32 %v5413_v57, %v2637_v24  ;;  %4135 = vpow2.f32 %v1171_v4 }
 0x485   : > { %3016 = vperm.xlu2 %3937, %v2617_v58   ;;  %v2642_v42 = vsel %vm2641_vm2, %v5413_v57, %v2638_v52  ;;  %v5460_v17 = vpop.f32.mrf.mxu3 }
 0x486   : > { %2265 = vmatmul.bf16.gmra.mxu3 %v6289_v54  ;;  %v2647_v35 = vsel %vm2644_vm3, %v2646_v41, %v2642_v42  ;;  %v2808_v41 = vand.u32 2147483647, %v2487_v49 }
 0x487   : > { %v4132_v58 = vpop.eup %4131 }
 0x488   : > { %v4134_v33 = vpop.eup %4133  ;;  %vm2809_vm7 = vcmp.eq.f32.partialorder %v2808_v41, 8.507059e+37 }
 0x489   : > { %v4136_v57 = vpop.eup %4135  ;;  %v2800_v24 = vmul.f32 %v4134_v33, %v2487_v49  ;;  %vm2805_vm4 = vweird.f32 %v4134_v33  ;;  %v5476_v49 = vld [vmem:[#allocation3 + $0x58] sm:$0xff] }
 0x48a   : > { %v1600_v20 = vmul.f32 %v4136_v57, %v1568_v6  ;;  %vm2806_vm6 = vmor %vm2804_vm5, %vm2805_vm4  ;;  %vm2669_vm13 = vweird.f32 %v5476_v49 }
 0x48b   : > { %3061 = vperm.xlu0 %3938, %v2752_v28   ;;  %v1657_v39 = vpop.xlane.xlu1 %1656  ;;  %v1567_v28 = vld [vmem:[#allocation3 + $0x90] sm:$0xff] }
 0x48c   : > { %v1723_v12 = vadd.f32 %v1657_v39, %v1595_v0  ;;  %v2801_v0 = vsub.f32 1.0, %v2800_v24 }
 0x48d   : > { %v5465_v42 = vpop.f32.mrf.mxu3 }
 0x48e   : > { %1756 = vst.msk [vmem:[#allocation3 + $0x70] sm:$0xff] %vm410_vm0, %v1723_v12  ;;  %v1599_v12 = vmul.f32 %v4132_v58, %v1567_v28  ;;  %v2802_v4 = vmul.f32 %v4134_v33, %v2801_v0  ;;  %v6301_v28 = vld [vmem:[#allocation82_spill] sm:$0xff]  ;;  %v6302_v0 = vld [vmem:[#allocation76_spill] sm:$0xff] }
 0x48f   : > { %6294 = vst [vmem:[#allocation37_spill] sm:$0xff] %v5465_v42 }
 0x490   : > { %v2803_v21 = vadd.f32 %v4134_v33, %v2802_v4 }
 0x493   : > { %1898 = vperm.xlu0 %3938, %v4132_v58   ;;  %v1666_v30 = vpop.xlane.xlu1 %1665  ;;  %v5470_v58 = vld [vmem:[#allocation3 + $0x40] sm:$0xff] }
 0x494   : > { %v1726_v54 = vadd.f32 %v1666_v30, %v1598_v32  ;;  %3026 = vperm.xlu1 %3939, %v2647_v35   ;;  %v6295_v32 = vld [vmem:[#allocation70_spill] sm:$0xff]  ;;  %v6296_v30 = vld [vmem:[#allocation69_spill] sm:$0xff]  ;;  %4137 = vrcp.f32 %v5470_v58  ;;  %vm2624_vm9 = vweird.f32 %v5470_v58 }
 0x495   : > { %v6297_v35 = vpack.c.bf16 %v6295_v32, %v6296_v30  ;;  %v5478_v24 = vpop.f32.mrf.mxu3  ;;  %v5491_v4 = vld [vmem:[#allocation3 + $0x70] sm:$0xff] }
 0x496   : > { %1759 = vst.msk [vmem:[#allocation3 + $0x88] sm:$0xff] %vm410_vm0, %v1726_v54  ;;  %2270 = vmatmul.bf16.gmra.mxu3 %v6293_v61  ;;  %v2807_v54 = vsel %vm2806_vm6, %v4134_v33, %v2803_v21  ;;  %v2811_v61 = vor.u32 1.1754944e-38, %v2810_v13  ;;  %v5481_v33 = vpop.permute.xlu0 %3011  ;;  %vm2714_vm2 = vweird.f32 %v5491_v4 }
 0x497   : > { %6299 = vst [vmem:[#allocation6_spill] sm:$0xff] %v5478_v24 }
 0x49a   : > { %v4138_v6 = vpop.eup %4137 }
 0x49b   : > { %1903 = vperm.xlu0 %3938, %v4136_v57   ;;  %v1672_v25 = vpop.xlane.xlu1 %1671  ;;  %v1187_v57 = vmul.f32 1.442695, %v1128_v7  ;;  %v2620_v48 = vmul.f32 %v4138_v6, %v5470_v58  ;;  %vm2625_vm8 = vweird.f32 %v4138_v6 }
 0x49c   : > { %v1728_v39 = vadd.f32 %v1672_v25, %v1600_v20  ;;  %v6300_v20 = vsub.f32 %v5003_v3, %v5009_v43  ;;  %v3885_v3 = vld [vmem:[%s6044_s4 + $0x38] sm:$0xff]  ;;  %vm2626_vm10 = vmor %vm2624_vm9, %vm2625_vm8 }
 0x49d   : > { %4139 = vpow2.f32 %v1187_v57  ;;  %v5495_v21 = vpop.f32.mrf.mxu3  ;;  %3255 = vmatpush.bf16.msrb.mxu2 %v3885_v3 }
 0x49e   : > { %1761 = vst.msk [vmem:[#allocation3 + $0x98] sm:$0xff] %vm410_vm0, %v1728_v39  ;;  %4141 = vrcp.f32 %v5476_v49  ;;  %v1191_v25 = vmul.f32 1.442695, %v6300_v20  ;;  %v2009_v39 = vpack.c.bf16 %v6302_v0, %v6301_v28  ;;  %v5516_v20 = vld [vmem:[#allocation3 + $0x60] sm:$0xff] }
 0x49f   : > { %v1669_v52 = vpop.xlane.xlu2 %1668  ;;  %6303 = vst [vmem:[#allocation7_spill] sm:$0xff] %v5495_v21  ;;  %vm2684_vm9 = vweird.f32 %v5516_v20 }
 0x4a0   : > { %v1727_v38 = vadd.f32 %v1669_v52, %v1599_v12  ;;  %v1576_v12 = vld [vmem:[#allocation3 + $0xd8] sm:$0xff]  ;;  %v2621_v52 = vsub.f32 1.0, %v2620_v48  ;;  %4143 = vpow2.f32 %v1191_v25  ;;  %v2630_v48 = vand.u32 2147483648, %v5470_v58  ;;  %v6304_v25 = vld [vmem:[#allocation75_spill] sm:$0xff] }
 0x4a1   : > { %4145 = vrcp.f32 %v5491_v4  ;;  %v1420_v28 = vsub.f32 %v6304_v25, %v5205_v14  ;;  %v3883_v14 = vld [vmem:[%s6044_s4 + $0x28] sm:$0xff] }
 0x4a2   : > { %1760 = vst.msk [vmem:[#allocation3 + $0x90] sm:$0xff] %vm410_vm0, %v1727_v38  ;;  %v2622_v41 = vmul.f32 %v4138_v6, %v2621_v52 }
 0x4a3   : > { %1923 = vperm.xlu0 %3938, %v5400_v18   ;;  %v2812_v18 = vsel %vm2809_vm7, %v2811_v61, %v2807_v54  ;;  %v1578_v54 = vld [vmem:[#allocation3 + $0xe8] sm:$0xff]  ;;  %v5508_v61 = vld [vmem:[#allocation3 + $0x78] sm:$0xff] }
 0x4a4   : > { %v2623_v10 = vadd.f32 %v4138_v6, %v2622_v41  ;;  %4147 = vrcp.f32 %v5508_v61  ;;  %v6306_v41 = vld [vmem:[#allocation77_spill] sm:$0xff]  ;;  %vm2729_vm7 = vweird.f32 %v5508_v61 }
 0x4a5   : > { %v5522_v0 = vpop.f32.mrf.mxu3  ;;  %4149 = vrcp.f32 %v5516_v20 }
 0x4a6   : > { %2275 = vmatmul.bf16.gmra.mxu3 %v6297_v35  ;;  %6305 = vst [vmem:[#allocation14_spill] sm:$0xff] %v5522_v0  ;;  %v2627_v52 = vsel %vm2626_vm10, %v4138_v6, %v2623_v10 }
 0x4ab   : > { %3081 = vperm.xlu0 %3938, %v2812_v18   ;;  %v3884_v18 = vld [vmem:[%s6044_s4 + $0x30] sm:$0xff] }
 0x4ac   : > { %3256 = vmatpush.bf16.msrb.mxu2 %v3884_v18  ;;  %v5538_v18 = vld [vmem:[#allocation3 + $0x90] sm:$0xff] }
 0x4ad   : > { %4151 = vrcp.f32 %v5538_v18 }
 0x4ae   : > { %1689 = vadd.xlane.f32.xlu2 %v5157_v63  ;;  %v5489_v63 = vpop.eup %4139 }
 0x4af   : > { %v5493_v38 = vpop.eup %4141  ;;  %v1608_v13 = vmul.f32 %v5489_v63, %v1576_v12 }
 0x4b0   : > { %v2665_v32 = vmul.f32 %v5493_v38, %v5476_v49  ;;  %v5505_v35 = vpop.eup %4143  ;;  %3257 = vmatpush.bf16.msrb.mxu2 %v3883_v14  ;;  %vm2670_vm12 = vweird.f32 %v5493_v38  ;;  %v6309_v14 = vld [vmem:[#allocation57_spill] sm:$0xff] }
 0x4b1   : > { %v5513_v57 = vpop.eup %4145  ;;  %vm2671_vm14 = vmor %vm2669_vm13, %vm2670_vm12 }
 0x4b2   : > { %v2666_v7 = vsub.f32 1.0, %v2665_v32  ;;  %v2710_v3 = vmul.f32 %v5513_v57, %v5491_v4  ;;  %v6307_v32 = vld [vmem:[#allocation12_spill] sm:$0xff]  ;;  %vm2715_vm1 = vweird.f32 %v5513_v57 }
 0x4b3   : > { %vm5582_vm3 = vmor %vm2714_vm2, %vm2715_vm1  ;;  %v5599_v21 = vpop.permute.xlu1 %2996 }
 0x4b6   : > { %2280 = vmatmul.bf16.gmra.mxu3 %v2009_v39  ;;  %v1610_v39 = vmul.f32 %v5505_v35, %v1578_v54  ;;  %v1547_v54 = vmul.f32 1.442695, %v1420_v28  ;;  %v3882_v28 = vld [vmem:[%s6044_s4 + $0x20] sm:$0xff] }
 0x4b7   : > { %3258 = vmatpush.bf16.msrb.mxu2 %v3882_v28 }
 0x4b8   : > { %4153 = vpow2.f32 %v1547_v54  ;;  %v5566_v54 = vld [vmem:[#allocation3 + $0x98] sm:$0xff] }
 0x4b9   : > { %4155 = vrcp.f32 %v5566_v54 }
 0x4ba   : > { %v1696_v43 = vpop.xlane.xlu0 %1695 }
 0x4bb   : > { %v1736_v30 = vadd.f32 %v1696_v43, %v1608_v13  ;;  %v2667_v13 = vmul.f32 %v5493_v38, %v2666_v7  ;;  %v2631_v43 = vor.u32 1.1754944e-38, %v2630_v48  ;;  %v2711_v7 = vsub.f32 1.0, %v2710_v3  ;;  %v5540_v48 = vpop.eup %4147  ;;  %v5652_v42 = vpop.permute.xlu1 %3001 }
 0x4bc   : > { %v5543_v25 = vpop.eup %4149  ;;  %v2725_v3 = vmul.f32 %v5540_v48, %v5508_v61  ;;  %vm2730_vm5 = vweird.f32 %v5540_v48 }
 0x4bd   : > { %1769 = vst.msk [vmem:[#allocation3 + $0xd8] sm:$0xff] %vm410_vm0, %v1736_v30  ;;  %v2011_v30 = vpack.c.bf16 %v6307_v32, %v6306_v41  ;;  %v2668_v10 = vadd.f32 %v5493_v38, %v2667_v13  ;;  %v2712_v13 = vmul.f32 %v5513_v57, %v2711_v7  ;;  %v6310_v41 = vld [vmem:[#allocation56_spill] sm:$0xff]  ;;  %v2720_v7 = vand.u32 2147483648, %v5491_v4  ;;  %vm5629_vm8 = vmor %vm2729_vm7, %vm2730_vm5 }
 0x4be   : > { %1692 = vadd.xlane.f32.xlu1 %v5214_v15  ;;  %v2628_v15 = vand.u32 2147483647, %v5470_v58  ;;  %v1122_v32 = vsub.f32 %v6310_v41, %v6309_v14  ;;  %vm2685_vm6 = vweird.f32 %v5543_v25 }
 0x4bf   : > { %vm5638_vm10 = vmor %vm2684_vm9, %vm2685_vm6 }
 0x4c0   : > { %vm2629_vm11 = vcmp.eq.f32.partialorder %v2628_v15, 8.507059e+37  ;;  %v2675_v15 = vand.u32 2147483648, %v5476_v49 }
 0x4c1   : > { %v2632_v6 = vsel %vm2629_vm11, %v2631_v43, %v2627_v52  ;;  %v2672_v52 = vsel %vm2671_vm14, %v5493_v38, %v2668_v10  ;;  %v3881_v43 = vld [vmem:[%s6044_s4 + $0x18] sm:$0xff]  ;;  %v2713_v38 = vadd.f32 %v5513_v57, %v2712_v13  ;;  %v5568_v10 = vpop.eup %4151  ;;  %v3880_v13 = vld [vmem:[%s6044_s4 + $0x10] sm:$0xff]  ;;  %vm2774_vm14 = vweird.f32 %v5538_v18 }
 0x4c2   : > { %v1702_v12 = vpop.xlane.xlu0 %1701  ;;  %3259 = vmatpush.bf16.msrb.mxu2 %v3881_v43  ;;  %v5573_v28 = vpop.eup %4153  ;;  %vm2775_vm13 = vweird.f32 %v5568_v10 }
 0x4c3   : > { %v1738_v58 = vadd.f32 %v1702_v12, %v1610_v39  ;;  %v2673_v39 = vand.u32 2147483647, %v5476_v49  ;;  %v2680_v49 = vmul.f32 %v5543_v25, %v5516_v20  ;;  %v1706_v41 = vadd.f32 %v5573_v28, %v5341_v22 }
 0x4c5   : > { %1771 = vst.msk [vmem:[#allocation3 + $0xe8] sm:$0xff] %vm410_vm0, %v1738_v58  ;;  %v2676_v58 = vor.u32 1.1754944e-38, %v2675_v15  ;;  %vm2674_vm15 = vcmp.eq.f32.partialorder %v2673_v39, 8.507059e+37  ;;  %v2681_v15 = vsub.f32 1.0, %v2680_v49  ;;  %v5571_v39 = vld [vmem:[#allocation3 + $0x88] sm:$0xff]  ;;  %v2717_v49 = vsel %vm5582_vm3, %v5513_v57, %v2713_v38 }
 0x4c6   : > { %3021 = vperm.xlu2 %3937, %v2632_v6   ;;  %2285 = vmatmul.bf16.gmra.mxu3 %v2011_v30  ;;  %v2726_v6 = vsub.f32 1.0, %v2725_v3  ;;  %v1175_v3 = vmul.f32 1.442695, %v1122_v32  ;;  %4157 = vrcp.f32 %v5571_v39  ;;  %v2721_v32 = vor.u32 1.1754944e-38, %v2720_v7  ;;  %v3879_v57 = vld [vmem:[%s6044_s4 + $0x8] sm:$0xff]  ;;  %v5609_v7 = vpop.eup %4155 }
 0x4c7   : > { %v2677_v30 = vsel %vm2674_vm15, %v2676_v58, %v2672_v52  ;;  %v2718_v52 = vand.u32 2147483647, %v5491_v4  ;;  %v2770_v4 = vmul.f32 %v5568_v10, %v5538_v18  ;;  %3260 = vmatpush.bf16.msrb.mxu2 %v3880_v13  ;;  %v6317_v13 = vld [vmem:[#allocation83_spill] sm:$0xff]  ;;  %vm2776_vm15 = vmor %vm2774_vm14, %vm2775_vm13  ;;  %vm2790_vm2 = vweird.f32 %v5609_v7 }
 0x4c8   : > { %v2727_v14 = vmul.f32 %v5540_v48, %v2726_v6  ;;  %4159 = vpow2.f32 %v1175_v3  ;;  %v6316_v6 = vld [vmem:[#allocation84_spill] sm:$0xff]  ;;  %v3878_v3 = vld [vmem:[%s6044_s4] sm:$0xff]  ;;  %vm2759_vm6 = vweird.f32 %v5571_v39 }
 0x4c9   : > { %v5550_v12 = vpop.f32.mrf.mxu3  ;;  %vm2719_vm4 = vcmp.eq.f32.partialorder %v2718_v52, 8.507059e+37  ;;  %v6318_v43 = vpack.c.bf16 %v6316_v6, %v6317_v13 }
 0x4ca   : > { %6308 = vst [vmem:[#allocation15_spill] sm:$0xff] %v5550_v12  ;;  %v6314_v12 = vld [vmem:[#allocation65_spill] sm:$0xff]  ;;  %v2722_v38 = vsel %vm2719_vm4, %v2721_v32, %v2717_v49  ;;  %v2728_v22 = vadd.f32 %v5540_v48, %v2727_v14  ;;  %v5620_v14 = vpop.permute.xlu2 %2991  ;;  %vm2789_vm4 = vweird.f32 %v5566_v54 }
 0x4cb   : > { %3261 = vmatpush.bf16.msrb.mxu2 %v3879_v57  ;;  %vm2791_vm5 = vmor %vm2789_vm4, %vm2790_vm2 }
 0x4ce   : > { %3036 = vperm.xlu2 %3937, %v2677_v30   ;;  %v2682_v30 = vmul.f32 %v5543_v25, %v2681_v15  ;;  %v2735_v15 = vand.u32 2147483648, %v5508_v61 }
 0x4cf   : > { %3262 = vmatpush.bf16.msrb.mxu2 %v3878_v3 }
 0x4d0   : > { %v2683_v52 = vadd.f32 %v5543_v25, %v2682_v30  ;;  %v2732_v30 = vsel %vm5629_vm8, %v5540_v48, %v2728_v22  ;;  %v2736_v6 = vor.u32 1.1754944e-38, %v2735_v15  ;;  %v6324_v48 = vld [vmem:[#allocation59_spill] sm:$0xff]  ;;  %v6325_v22 = vld [vmem:[#allocation58_spill] sm:$0xff] }
 0x4d1   : > { %v5580_v58 = vpop.f32.mrf.mxu3  ;;  %v1125_v32 = vsub.f32 %v6325_v22, %v6324_v48 }
 0x4d2   : > { %6311 = vst [vmem:[#allocation10_spill] sm:$0xff] %v5580_v58  ;;  %v6315_v58 = vld [vmem:[#allocation64_spill] sm:$0xff]  ;;  %v2687_v13 = vsel %vm5638_vm10, %v5543_v25, %v2683_v52 }
 0x4d3   : > { %v1123_v0 = vsub.f32 %v6315_v58, %v6314_v12  ;;  %v2771_v12 = vsub.f32 1.0, %v2770_v4  ;;  %v5618_v58 = vpop.eup %4157  ;;  %v2690_v4 = vand.u32 2147483648, %v5516_v20 }
 0x4d4   : > { %vm2760_vm3 = vweird.f32 %v5618_v58 }
 0x4d5   : > { %1707 = vadd.xlane.f32.xlu0 %v1706_v41  ;;  %v1177_v49 = vmul.f32 1.442695, %v1123_v0  ;;  %v2688_v0 = vand.u32 2147483647, %v5516_v20  ;;  %v2772_v57 = vmul.f32 %v5568_v10, %v2771_v12  ;;  %v2755_v20 = vmul.f32 %v5618_v58, %v5571_v39  ;;  %v1570_v12 = vld [vmem:[#allocation3 + $0xa8] sm:$0xff]  ;;  %vm2761_vm7 = vmor %vm2759_vm6, %vm2760_vm3 }
 0x4d6   : > { %2290 = vmatmul.bf16.gmra.mxu3 %v6318_v43  ;;  %3051 = vperm.xlu2 %3937, %v2722_v38   ;;  %v2785_v38 = vmul.f32 %v5609_v7, %v5566_v54  ;;  %v4160_v43 = vpop.eup %4159 }
 0x4d7   : > { %1883 = vperm.xlu1 %3939, %v5351_v11   ;;  %v2733_v11 = vand.u32 2147483647, %v5508_v61  ;;  %4161 = vpow2.f32 %v1177_v49  ;;  %vm2689_vm12 = vcmp.eq.f32.partialorder %v2688_v0, 8.507059e+37  ;;  %v2773_v25 = vadd.f32 %v5568_v10, %v2772_v57  ;;  %v1571_v57 = vld [vmem:[#allocation3 + $0xb0] sm:$0xff] }
 0x4d8   : > { %v2786_v52 = vsub.f32 1.0, %v2785_v38  ;;  %v1602_v3 = vmul.f32 %v4160_v43, %v1570_v12  ;;  %v2780_v61 = vand.u32 2147483648, %v5538_v18  ;;  %v2756_v48 = vsub.f32 1.0, %v2755_v20 }
 0x4d9   : > { %v5625_v41 = vpop.f32.mrf.mxu3  ;;  %vm2734_vm11 = vcmp.eq.f32.partialorder %v2733_v11, 8.507059e+37  ;;  %v1181_v49 = vmul.f32 1.442695, %v1125_v32 }
 0x4da   : > { %6319 = vst [vmem:[#allocation11_spill] sm:$0xff] %v5625_v41  ;;  %v2691_v41 = vor.u32 1.1754944e-38, %v2690_v4  ;;  %v2737_v24 = vsel %vm2734_vm11, %v2736_v6, %v2732_v30  ;;  %v2778_v4 = vand.u32 2147483647, %v5538_v18  ;;  %v2787_v38 = vmul.f32 %v5609_v7, %v2786_v52  ;;  %v2167_v6 = vpop.f32.mrf.mxu0  ;;  %v6326_v18 = vld [vmem:[#allocation8_spill] sm:$0xff] }
 0x4db   : > { %v2757_v20 = vmul.f32 %v5618_v58, %v2756_v48  ;;  %4163 = vpow2.f32 %v1181_v49  ;;  %v2015_v22 = vpack.c.bf16 %v6326_v18, %v5111_v60  ;;  %v2793_v60 = vand.u32 2147483647, %v5566_v54 }
 0x4dc   : > { %v2692_v15 = vsel %vm2689_vm12, %v2691_v41, %v2687_v13  ;;  %v2777_v41 = vsel %vm2776_vm15, %v5568_v10, %v2773_v25  ;;  %v2781_v13 = vor.u32 1.1754944e-38, %v2780_v61  ;;  %vm2779_vm1 = vcmp.eq.f32.partialorder %v2778_v4, 8.507059e+37 }
 0x4dd   : > { %v2788_v25 = vadd.f32 %v5609_v7, %v2787_v38  ;;  %v2758_v61 = vadd.f32 %v5618_v58, %v2757_v20  ;;  %v2765_v48 = vand.u32 2147483648, %v5571_v39  ;;  %vm2794_vm8 = vcmp.eq.f32.partialorder %v2793_v60, 8.507059e+37 }
 0x4de   : > { %3056 = vperm.xlu2 %3937, %v2737_v24   ;;  %v5661_v24 = vpop.eup %4161  ;;  %v2782_v32 = vsel %vm2779_vm1, %v2781_v13, %v2777_v41 }
 0x4df   : > { %3041 = vperm.xlu1 %3939, %v2692_v15   ;;  %v1603_v12 = vmul.f32 %v5661_v24, %v1571_v57  ;;  %v5670_v15 = vpop.permute.xlu0 %1853  ;;  %v2792_v4 = vsel %vm2791_vm5, %v5609_v7, %v2788_v25  ;;  %v2766_v38 = vor.u32 1.1754944e-38, %v2765_v48  ;;  %v6327_v7 = vld [vmem:[#allocation53_spill] sm:$0xff] }
 0x4e0   : > { %v1678_v11 = vpop.xlane.xlu2 %1677 }
 0x4e1   : > { %v1730_v0 = vadd.f32 %v1678_v11, %v1602_v3  ;;  %v5659_v30 = vpop.f32.mrf.mxu3  ;;  %v2795_v3 = vand.u32 2147483648, %v5566_v54  ;;  %v5683_v11 = vpop.eup %4163  ;;  %v2762_v54 = vsel %vm2761_vm7, %v5618_v58, %v2758_v61 }
 0x4e2   : > { %v2169_v13 = vpop.f32.mrf.mxu0 }
 0x4e3   : > { %1763 = vst.msk [vmem:[#allocation3 + $0xa8] sm:$0xff] %vm410_vm0, %v1730_v0  ;;  %v1573_v0 = vld [vmem:[#allocation3 + $0xc0] sm:$0xff]  ;;  %v2796_v57 = vor.u32 1.1754944e-38, %v2795_v3  ;;  %v1967_v3 = vmul.f32 0.0, %v5304_v9 }
 0x4e4   : > { %v1605_v18 = vmul.f32 %v5683_v11, %v1573_v0 }
 0x4e5   : > { %v2797_v20 = vsel %vm2794_vm8, %v2796_v57, %v2792_v4 }
 0x4e6   : > { %2295 = vmatmul.bf16.gmra.mxu3 %v2015_v22  ;;  %3071 = vperm.xlu2 %3937, %v2782_v32   ;;  %v1681_v10 = vpop.xlane.xlu1 %1680 }
 0x4e7   : > { %v1731_v52 = vadd.f32 %v1681_v10, %v1603_v12  ;;  %1913 = vperm.xlu1 %3939, %v4160_v43   ;;  %v2763_v43 = vand.u32 2147483647, %v5571_v39  ;;  %v1966_v10 = vmul.f32 0.0, %v6327_v7  ;;  %v5689_v25 = vpop.permute.xlu0 %1858 }
 0x4e9   : > { %1764 = vst.msk [vmem:[#allocation3 + $0xb0] sm:$0xff] %vm410_vm0, %v1731_v52  ;;  %v2256_v49 = vpop.f32.mrf.mxu3  ;;  %vm2764_vm9 = vcmp.eq.f32.partialorder %v2763_v43, 8.507059e+37 }
 0x4ea   : > { %v2488_v41 = vld [vmem:[#allocation3 + $0xa8] sm:$0xff]  ;;  %v2257_v22 = vadd.f32 %v2256_v49, %v2167_v6  ;;  %v2767_v32 = vsel %vm2764_vm9, %v2766_v38, %v2762_v54  ;;  %v6328_v6 = vld [vmem:[#allocation13_spill] sm:$0xff]  ;;  %v2172_v0 = vpop.f32.mrf.mxu0 }
 0x4eb   : > { %4165 = vrcp.f32 %v2488_v41  ;;  %v2017_v49 = vpack.c.bf16 %v5227_v1, %v6328_v6  ;;  %vm2819_vm11 = vweird.f32 %v2488_v41 }
 0x4ec   : > { %v2336_v61 = vadd.f32 %v2257_v22, %v1966_v10  ;;  %v1968_v10 = vmul.f32 0.0, %v5378_v34 }
 0x4ee   : > { %3076 = vperm.xlu2 %3937, %v2797_v20   ;;  %v1687_v39 = vpop.xlane.xlu1 %1686  ;;  %v3139_v57 = vmul.f32 %v5458_v59, %v2336_v61  ;;  %v1969_v61 = vmul.f32 0.0, %v5189_v47 }
 0x4ef   : > { %v1733_v12 = vadd.f32 %v1687_v39, %v1605_v18  ;;  %3066 = vperm.xlu1 %3939, %v2767_v32   ;;  %v2825_v18 = vand.u32 2147483648, %v2488_v41  ;;  %v2823_v39 = vand.u32 2147483647, %v2488_v41  ;;  %v5698_v1 = vpop.permute.xlu0 %3031 }
 0x4f1   : > { %v4166_v52 = vpop.eup %4165  ;;  %1766 = vst.msk [vmem:[#allocation3 + $0xc0] sm:$0xff] %vm410_vm0, %v1733_v12  ;;  %v2258_v58 = vpop.f32.mrf.mxu3  ;;  %v2826_v32 = vor.u32 1.1754944e-38, %v2825_v18  ;;  %vm2824_vm13 = vcmp.eq.f32.partialorder %v2823_v39, 8.507059e+37 }
 0x4f2   : > { %v2259_v60 = vadd.f32 %v2258_v58, %v2169_v13  ;;  %v2815_v48 = vmul.f32 %v4166_v52, %v2488_v41  ;;  %vm2820_vm10 = vweird.f32 %v4166_v52 }
 0x4f3   : > { %vm2821_vm12 = vmor %vm2819_vm11, %vm2820_vm10 }
 0x4f4   : > { %v2337_v43 = vadd.f32 %v2259_v60, %v1967_v3  ;;  %v2816_v4 = vsub.f32 1.0, %v2815_v48 }
 0x4f6   : > { %v3140_v54 = vmul.f32 %v5267_v27, %v2337_v43  ;;  %2300 = vmatmul.bf16.gmra.mxu3 %v2017_v49  ;;  %v2817_v38 = vmul.f32 %v4166_v52, %v2816_v4 }
 0x4f7   : > { %1918 = vperm.xlu1 %3939, %v5661_v24   ;;  %v2174_v24 = vpop.f32.mrf.mxu0  ;;  %v5702_v6 = vpop.permute.xlu0 %1868 }
 0x4f8   : > { %v3171_v20 = vpack.c.bf16 %v3140_v54, %v3139_v57  ;;  %v2818_v9 = vadd.f32 %v4166_v52, %v2817_v38  ;;  %v2491_v13 = vld [vmem:[#allocation3 + $0xc0] sm:$0xff]  ;;  %v6330_v57 = vld [vmem:[#allocation18_spill] sm:$0xff] }
 0x4f9   : > { %v2261_v22 = vpop.f32.mrf.mxu3  ;;  %4167 = vrcp.f32 %v2491_v13  ;;  %v2870_v43 = vand.u32 2147483648, %v2491_v13  ;;  %v2868_v4 = vand.u32 2147483647, %v2491_v13  ;;  %vm2864_vm15 = vweird.f32 %v2491_v13 }
 0x4fa   : > { %3263 = vmatmul.bf16.vlgmr.msrb.gmra.mxu2 %v3171_v20  ;;  %v2822_v59 = vsel %vm2821_vm12, %v4166_v52, %v2818_v9  ;;  %v2262_v27 = vadd.f32 %v2261_v22, %v2172_v0  ;;  %v6329_v0 = vld [vmem:[#allocation5_spill] sm:$0xff] }
 0x4fb   : > { %v2827_v12 = vsel %vm2824_vm13, %v2826_v32, %v2822_v59  ;;  %v6331_v54 = vpack.c.bf16 %v6329_v0, %v6330_v57  ;;  %v2871_v9 = vor.u32 1.1754944e-38, %v2870_v43  ;;  %vm2869_vm2 = vcmp.eq.f32.partialorder %v2868_v4, 8.507059e+37  ;;  %v3017_v4 = vpop.permute.xlu2 %3016 }
 0x4fc   : > { %v2338_v41 = vadd.f32 %v2262_v27, %v1968_v10 }
 0x4fe   : > { %v3141_v34 = vmul.f32 %v5620_v14, %v2338_v41  ;;  %v2182_v41 = vpop.f32.mrf.mxu1 }
 0x4ff   : > { %v4168_v7 = vpop.eup %4167  ;;  %3086 = vperm.xlu1 %3939, %v2827_v12   ;;  %v2177_v47 = vpop.f32.mrf.mxu0  ;;  %v6332_v12 = vld [vmem:[#allocation73_spill] sm:$0xff] }
 0x500   : > { %v2860_v58 = vmul.f32 %v4168_v7, %v2491_v13  ;;  %vm2865_vm14 = vweird.f32 %v4168_v7  ;;  %v5709_v32 = vpop.permute.xlu0 %3046 }
 0x501   : > { %v2263_v3 = vpop.f32.mrf.mxu3  ;;  %vm2866_vm1 = vmor %vm2864_vm15, %vm2865_vm14 }
 0x502   : > { %v2264_v60 = vadd.f32 %v2263_v3, %v2174_v24  ;;  %v2861_v48 = vsub.f32 1.0, %v2860_v58  ;;  %v6333_v24 = vld [vmem:[#allocation71_spill] sm:$0xff]  ;;  %v1971_v58 = vmul.f32 0.0, %v5221_v8 }
 0x503   : > { %v1126_v14 = vsub.f32 %v6333_v24, %v6332_v12  ;;  %v5740_v24 = vpop.f32.mrf.mxu2 }
 0x504   : > { %v2339_v52 = vadd.f32 %v2264_v60, %v1969_v61  ;;  %v2862_v49 = vmul.f32 %v4168_v7, %v2861_v48  ;;  %v6334_v48 = vpack.c.bf16 %v5139_v62, %v5160_v31  ;;  %v1574_v31 = vld [vmem:[#allocation3 + $0xc8] sm:$0xff] }
 0x506   : > { %2305 = vmatmul.bf16.gmra.mxu3 %v6331_v54  ;;  %v3142_v38 = vmul.f32 %v5599_v21, %v2339_v52  ;;  %v2863_v20 = vadd.f32 %v4168_v7, %v2862_v49  ;;  %v1970_v21 = vmul.f32 0.0, %v5198_v56  ;;  %v5721_v56 = vld [vmem:[#allocation3 + $0xb0] sm:$0xff]  ;;  %v2184_v62 = vpop.f32.mrf.mxu1  ;;  %v5728_v54 = vld [vmem:[#allocation3 + $0xb8] sm:$0xff] }
 0x507   : > { %v2179_v10 = vpop.f32.mrf.mxu0  ;;  %vm2834_vm4 = vweird.f32 %v5721_v56  ;;  %vm2849_vm8 = vweird.f32 %v5728_v54 }
 0x508   : > { %v3172_v18 = vpack.c.bf16 %v3142_v38, %v3141_v34  ;;  %v2867_v22 = vsel %vm2866_vm1, %v4168_v7, %v2863_v20  ;;  %v1183_v7 = vmul.f32 1.442695, %v1126_v14  ;;  %v5723_v49 = vpop.permute.xlu0 %3061  ;;  %v6336_v34 = vld [vmem:[#allocation78_spill] sm:$0xff]  ;;  %v1972_v20 = vmul.f32 0.0, %v5230_v44 }
 0x509   : > { %v2266_v39 = vpop.f32.mrf.mxu3  ;;  %v2872_v59 = vsel %vm2869_vm2, %v2871_v9, %v2867_v22  ;;  %v1973_v9 = vmul.f32 0.0, %v5402_v19  ;;  %v2023_v19 = vpack.c.bf16 %v5154_v51, %v5391_v46 }
 0x50a   : > { %3268 = vmatmul.bf16.gmra.mxu2 %v3172_v18  ;;  %3101 = vperm.xlu0 %3938, %v2872_v59   ;;  %v2267_v27 = vadd.f32 %v2266_v39, %v2177_v47  ;;  %4169 = vpow2.f32 %v1183_v7 }
 0x50b   : > { %4171 = vrcp.f32 %v5721_v56 }
 0x50c   : > { %v2340_v3 = vadd.f32 %v2267_v27, %v1970_v21  ;;  %4173 = vrcp.f32 %v5728_v54 }
 0x50e   : > { %v3143_v43 = vmul.f32 %v5652_v42, %v2340_v3 }
 0x510   : > { %v5726_v57 = vpop.eup %4169  ;;  %v5737_v39 = vpop.permute.xlu0 %1898 }
 0x511   : > { %v2268_v13 = vpop.f32.mrf.mxu3  ;;  %v1606_v47 = vmul.f32 %v5726_v57, %v1574_v31 }
 0x512   : > { %v2269_v61 = vadd.f32 %v2268_v13, %v2179_v10  ;;  %v2187_v10 = vpop.f32.mrf.mxu1 }
 0x514   : > { %v2341_v60 = vadd.f32 %v2269_v61, %v1971_v58 }
 0x516   : > { %2310 = vmatmul.bf16.gmra.mxu3 %v6334_v48  ;;  %v3144_v52 = vmul.f32 %v5387_v50, %v2341_v60  ;;  %v5730_v50 = vpop.eup %4171  ;;  %v3027_v60 = vpop.permute.xlu1 %3026  ;;  %v5751_v48 = vld [vmem:[#allocation3 + $0xd8] sm:$0xff] }
 0x517   : > { %1698 = vadd.xlane.f32.xlu2 %v5330_v5  ;;  %v6335_v5 = vld [vmem:[#allocation80_spill] sm:$0xff]  ;;  %v2830_v14 = vmul.f32 %v5730_v50, %v5721_v56  ;;  %v5748_v61 = vpop.eup %4173  ;;  %vm2835_vm3 = vweird.f32 %v5730_v50  ;;  %vm2909_vm12 = vweird.f32 %v5751_v48 }
 0x518   : > { %v3173_v8 = vpack.c.bf16 %v3144_v52, %v3143_v43  ;;  %v1127_v38 = vsub.f32 %v6336_v34, %v6335_v5  ;;  %v2845_v51 = vmul.f32 %v5748_v61, %v5728_v54  ;;  %v5756_v46 = vpop.permute.xlu0 %1903  ;;  %v2840_v5 = vand.u32 2147483648, %v5721_v56  ;;  %vm5774_vm5 = vmor %vm2834_vm4, %vm2835_vm3 }
 0x519   : > { %v2271_v0 = vpop.f32.mrf.mxu3  ;;  %v2831_v3 = vsub.f32 1.0, %v2830_v14  ;;  %vm2850_vm7 = vweird.f32 %v5748_v61 }
 0x51a   : > { %3273 = vmatmul.bf16.gmra.mxu2 %v3173_v8  ;;  %v2272_v42 = vadd.f32 %v2271_v0, %v2182_v41  ;;  %v1185_v21 = vmul.f32 1.442695, %v1127_v38  ;;  %vm2851_vm9 = vmor %vm2849_vm8, %vm2850_vm7 }
 0x51b   : > { %v2832_v43 = vmul.f32 %v5730_v50, %v2831_v3 }
 0x51c   : > { %v2342_v59 = vadd.f32 %v2272_v42, %v1972_v20  ;;  %4175 = vpow2.f32 %v1185_v21  ;;  %v1974_v42 = vmul.f32 0.0, %v5427_v2  ;;  %v2838_v20 = vand.u32 2147483647, %v5721_v56 }
 0x51d   : > { %4177 = vrcp.f32 %v5751_v48  ;;  %v2833_v0 = vadd.f32 %v5730_v50, %v2832_v43 }
 0x51e   : > { %v3145_v13 = vmul.f32 %v5481_v33, %v2342_v59  ;;  %v5758_v33 = vpop.f32.mrf.mxu2  ;;  %vm2839_vm6 = vcmp.eq.f32.partialorder %v2838_v20, 8.507059e+37 }
 0x520   : > { %v5792_v3 = vpop.permute.xlu0 %1923 }
 0x521   : > { %v1690_v18 = vpop.xlane.xlu2 %1689  ;;  %v2273_v22 = vpop.f32.mrf.mxu3 }
 0x522   : > { %v1734_v27 = vadd.f32 %v1690_v18, %v1606_v47  ;;  %v2274_v12 = vadd.f32 %v2273_v22, %v2184_v62  ;;  %v5761_v52 = vpop.eup %4175  ;;  %v2846_v62 = vsub.f32 1.0, %v2845_v51 }
 0x523   : > { %v5779_v2 = vpop.eup %4177 }
 0x524   : > { %1767 = vst.msk [vmem:[#allocation3 + $0xc8] sm:$0xff] %vm410_vm0, %v1734_v27  ;;  %v2343_v44 = vadd.f32 %v2274_v12, %v1973_v9  ;;  %v2837_v27 = vsel %vm5774_vm5, %v5730_v50, %v2833_v0  ;;  %v2847_v56 = vmul.f32 %v5748_v61, %v2846_v62  ;;  %v6339_v12 = vld [vmem:[#allocation27_spill] sm:$0xff]  ;;  %v2905_v43 = vmul.f32 %v5779_v2, %v5751_v48 }
 0x525   : > { %v2855_v0 = vand.u32 2147483648, %v5728_v54  ;;  %vm2910_vm11 = vweird.f32 %v5779_v2 }
 0x526   : > { %2315 = vmatmul.bf16.gmra.mxu3 %v2023_v19  ;;  %v3146_v58 = vmul.f32 %v3017_v4, %v2343_v44  ;;  %v1575_v4 = vld [vmem:[#allocation3 + $0xd0] sm:$0xff]  ;;  %v6341_v44 = vld [vmem:[#allocation16_spill] sm:$0xff]  ;;  %vm5829_vm13 = vmor %vm2909_vm12, %vm2910_vm11 }
 0x527   : > { %v1607_v38 = vmul.f32 %v5761_v52, %v1575_v4  ;;  %v2025_v19 = vpack.c.bf16 %v5309_v36, %v6341_v44  ;;  %v2848_v36 = vadd.f32 %v5748_v61, %v2847_v56 }
 0x528   : > { %v3174_v7 = vpack.c.bf16 %v3146_v58, %v3145_v13  ;;  %v5789_v13 = vpop.f32.mrf.mxu2  ;;  %v5813_v22 = vpop.permute.xlu0 %3081 }
 0x529   : > { %v2276_v41 = vpop.f32.mrf.mxu3  ;;  %1704 = vadd.xlane.f32.xlu1 %v5347_v37  ;;  %v2189_v37 = vpop.f32.mrf.mxu1 }
 0x52a   : > { %3278 = vmatmul.bf16.gmra.mxu2 %v3174_v7  ;;  %v2277_v8 = vadd.f32 %v2276_v41, %v2187_v10  ;;  %v2841_v10 = vor.u32 1.1754944e-38, %v2840_v5  ;;  %v3022_v58 = vpop.permute.xlu2 %3021  ;;  %v2852_v5 = vsel %vm2851_vm9, %v5748_v61, %v2848_v36  ;;  %v1976_v61 = vmul.f32 0.0, %v5689_v25 }
 0x52b   : > { %v5766_v31 = vld [vmem:[#allocation3 + $0xc8] sm:$0xff] }
 0x52c   : > { %v2344_v47 = vadd.f32 %v2277_v8, %v1974_v42  ;;  %4179 = vrcp.f32 %v5766_v31  ;;  %v2842_v50 = vsel %vm2839_vm6, %v2841_v10, %v2837_v27  ;;  %v2906_v42 = vsub.f32 1.0, %v2905_v43  ;;  %v6342_v27 = vld [vmem:[#allocation17_spill] sm:$0xff]  ;;  %v1580_v10 = vld [vmem:[#allocation3 + $0xf8] sm:$0xff] }
 0x52d   : > { %v1977_v56 = vmul.f32 0.0, %v6342_v27  ;;  %vm2879_vm2 = vweird.f32 %v5766_v31 }
 0x52e   : > { %v3147_v7 = vmul.f32 %v3022_v58, %v2344_v47 }
 0x52f   : > { %1908 = vperm.xlu2 %3937, %v5270_v40   ;;  %v1975_v40 = vmul.f32 0.0, %v5670_v15  ;;  %v6340_v15 = vld [vmem:[#allocation29_spill] sm:$0xff] }
 0x530   : > { %v1132_v14 = vsub.f32 %v6340_v15, %v6339_v12  ;;  %v2913_v15 = vand.u32 2147483647, %v5751_v48 }
 0x531   : > { %v2278_v34 = vpop.f32.mrf.mxu3  ;;  %v1693_v18 = vpop.xlane.xlu1 %1692 }
 0x532   : > { %v2279_v9 = vadd.f32 %v2278_v34, %v2189_v37  ;;  %v1735_v59 = vadd.f32 %v1693_v18, %v1607_v38  ;;  %v2192_v51 = vpop.f32.mrf.mxu1  ;;  %v5798_v8 = vpop.eup %4179  ;;  %v1195_v4 = vmul.f32 1.442695, %v1132_v14  ;;  %v2856_v38 = vor.u32 1.1754944e-38, %v2855_v0 }
 0x533   : > { %v2875_v34 = vmul.f32 %v5798_v8, %v5766_v31  ;;  %v2915_v14 = vand.u32 2147483648, %v5751_v48  ;;  %vm5833_vm14 = vcmp.eq.f32.partialorder %v2913_v15, 8.507059e+37  ;;  %vm2880_vm15 = vweird.f32 %v5798_v8 }
 0x534   : > { %v2345_v21 = vadd.f32 %v2279_v9, %v1975_v40  ;;  %1768 = vst.msk [vmem:[#allocation3 + $0xd0] sm:$0xff] %vm410_vm0, %v1735_v59  ;;  %4181 = vpow2.f32 %v1195_v4  ;;  %v2907_v9 = vmul.f32 %v5779_v2, %v2906_v42  ;;  %vm2881_vm4 = vmor %vm2879_vm2, %vm2880_vm15 }
 0x535   : > { %v2876_v18 = vsub.f32 1.0, %v2875_v34 }
 0x536   : > { %2320 = vmatmul.bf16.gmra.mxu3 %v2025_v19  ;;  %v3148_v41 = vmul.f32 %v3027_v60, %v2345_v21  ;;  %v2853_v60 = vand.u32 2147483647, %v5728_v54  ;;  %v5810_v54 = vpop.f32.mrf.mxu2  ;;  %v2908_v58 = vadd.f32 %v5779_v2, %v2907_v9 }
 0x537   : > { %3091 = vperm.xlu2 %3937, %v2842_v50   ;;  %v2877_v50 = vmul.f32 %v5798_v8, %v2876_v18 }
 0x538   : > { %v3175_v37 = vpack.c.bf16 %v3148_v41, %v3147_v7  ;;  %vm2854_vm10 = vcmp.eq.f32.partialorder %v2853_v60, 8.507059e+37  ;;  %v2027_v41 = vpack.c.bf16 %v5334_v29, %v5320_v23  ;;  %v2912_v23 = vsel %vm5829_vm13, %v5779_v2, %v2908_v58 }
 0x539   : > { %v2281_v62 = vpop.f32.mrf.mxu3  ;;  %v2857_v47 = vsel %vm2854_vm10, %v2856_v38, %v2852_v5  ;;  %v2878_v42 = vadd.f32 %v5798_v8, %v2877_v50  ;;  %v2885_v5 = vand.u32 2147483648, %v5766_v31 }
 0x53a   : > { %3283 = vmatmul.bf16.gmra.mxu2 %v3175_v37  ;;  %v2282_v40 = vadd.f32 %v2281_v62, %v2192_v51  ;;  %v2194_v59 = vpop.f32.mrf.mxu1  ;;  %v5818_v21 = vpop.eup %4181  ;;  %v2916_v37 = vor.u32 1.1754944e-38, %v2915_v14  ;;  %v6347_v14 = vld [vmem:[#allocation74_spill] sm:$0xff] }
 0x53b   : > { %v5806_v20 = vld [vmem:[#allocation3 + $0xd0] sm:$0xff]  ;;  %v3037_v51 = vpop.permute.xlu2 %3036  ;;  %v1612_v36 = vmul.f32 %v5818_v21, %v1580_v10  ;;  %v2882_v27 = vsel %vm2881_vm4, %v5798_v8, %v2878_v42 }
 0x53c   : > { %4183 = vrcp.f32 %v5806_v20  ;;  %v2346_v44 = vadd.f32 %v2282_v40, %v1976_v61  ;;  %v2900_v60 = vand.u32 2147483648, %v5806_v20  ;;  %v2917_v9 = vsel %vm5833_vm14, %v2916_v37, %v2912_v23 }
 0x53d   : > { %vm2894_vm3 = vweird.f32 %v5806_v20 }
 0x53e   : > { %v3149_v29 = vmul.f32 %v5698_v1, %v2346_v44  ;;  %v5841_v62 = vpop.f32.mrf.mxu2  ;;  %v2898_v1 = vand.u32 2147483647, %v5806_v20  ;;  %v6348_v44 = vld [vmem:[#allocation72_spill] sm:$0xff] }
 0x53f   : > { %3096 = vperm.xlu2 %3937, %v2857_v47  }
 0x540   : > { %vm2899_vm6 = vcmp.eq.f32.partialorder %v2898_v1, 8.507059e+37 }
 0x541   : > { %v2283_v12 = vpop.f32.mrf.mxu3 }
 0x542   : > { %v2284_v19 = vadd.f32 %v2283_v12, %v2194_v59  ;;  %1933 = vperm.xlu1 %3939, %v5726_v57   ;;  %v4184_v25 = vpop.eup %4183  ;;  %v2901_v59 = vor.u32 1.1754944e-38, %v2900_v60  ;;  %v2886_v12 = vor.u32 1.1754944e-38, %v2885_v5 }
 0x543   : > { %v2890_v43 = vmul.f32 %v4184_v25, %v5806_v20  ;;  %vm2895_vm1 = vweird.f32 %v4184_v25  ;;  %v5862_v20 = vld [vmem:[#allocation3 + $0xe8] sm:$0xff] }
 0x544   : > { %v2347_v7 = vadd.f32 %v2284_v19, %v1977_v56  ;;  %vm2896_vm5 = vmor %vm2894_vm3, %vm2895_vm1  ;;  %v1131_v19 = vsub.f32 %v6348_v44, %v6347_v14  ;;  %4185 = vrcp.f32 %v5862_v20  ;;  %vm2939_vm13 = vweird.f32 %v5862_v20 }
 0x545   : > { %v2891_v0 = vsub.f32 1.0, %v2890_v43 }
 0x546   : > { %2325 = vmatmul.bf16.gmra.mxu3 %v2027_v41  ;;  %v3150_v48 = vmul.f32 %v3037_v51, %v2347_v7  ;;  %v5865_v58 = vpop.f32.mrf.mxu2  ;;  %v6349_v7 = vld [vmem:[#allocation36_spill] sm:$0xff]  ;;  %v1193_v51 = vmul.f32 1.442695, %v1131_v19 }
 0x547   : > { %1928 = vperm.xlu2 %3937, %v5683_v11   ;;  %v2892_v40 = vmul.f32 %v4184_v25, %v2891_v0  ;;  %v2883_v11 = vand.u32 2147483647, %v5766_v31  ;;  %v1979_v8 = vmul.f32 0.0, %v6349_v7  ;;  %v2945_v7 = vand.u32 2147483648, %v5862_v20 }
 0x548   : > { %v1708_v34 = vpop.xlane.xlu0 %1707  ;;  %v3176_v38 = vpack.c.bf16 %v3150_v48, %v3149_v29  ;;  %v6351_v29 = vld [vmem:[#allocation79_spill] sm:$0xff] }
 0x549   : > { %v1740_v2 = vadd.f32 %v1708_v34, %v1612_v36  ;;  %v2286_v47 = vpop.f32.mrf.mxu3  ;;  %v5853_v18 = vpop.permute.xlu1 %1883  ;;  %v2893_v61 = vadd.f32 %v4184_v25, %v2892_v40  ;;  %vm2884_vm7 = vcmp.eq.f32.partialorder %v2883_v11, 8.507059e+37 }
 0x54a   : > { %3116 = vperm.xlu1 %3939, %v2917_v9   ;;  %3288 = vmatmul.bf16.gmra.mxu2 %v3176_v38  ;;  %v2887_v15 = vsel %vm2884_vm7, %v2886_v12, %v2882_v27  ;;  %v2287_v10 = vadd.f32 %v2286_v47, %v5740_v24  ;;  %v2029_v24 = vpack.c.bf16 %v5573_v28, %v5343_v16  ;;  %v3052_v28 = vpop.permute.xlu2 %3051  ;;  %v1980_v9 = vmul.f32 0.0, %v5315_v26 }
 0x54b   : > { %1773 = vst.msk [vmem:[#allocation3 + $0xf8] sm:$0xff] %vm410_vm0, %v1740_v2  ;;  %v2897_v56 = vsel %vm2896_vm5, %v4184_v25, %v2893_v61  ;;  %v1978_v25 = vmul.f32 0.0, %v5702_v6  ;;  %v4186_v6 = vpop.eup %4185  ;;  %v1981_v61 = vmul.f32 0.0, %v5853_v18 }
 0x54c   : > { %v2902_v31 = vsel %vm2899_vm6, %v2901_v59, %v2897_v56  ;;  %vm2940_vm12 = vweird.f32 %v4186_v6 }
 0x54d   : > { %3111 = vperm.xlu0 %3938, %v2902_v31   ;;  %v2348_v4 = vadd.f32 %v2287_v10, %v1978_v25  ;;  %vm2941_vm14 = vmor %vm2939_vm13, %vm2940_vm12 }
 0x54e   : > { %v5878_v42 = vpop.f32.mrf.mxu2 }
 0x54f   : > { %3106 = vperm.xlu2 %3937, %v2887_v15  }
 0x551   : > { %v2288_v50 = vpop.f32.mrf.mxu3  ;;  %v3042_v36 = vpop.permute.xlu1 %3041 }
 0x552   : > { %v2289_v41 = vadd.f32 %v2288_v50, %v5758_v33  ;;  %v2498_v43 = vld [vmem:[#allocation3 + $0xf8] sm:$0xff]  ;;  %v3151_v37 = vmul.f32 %v3042_v36, %v2348_v4  ;;  %v6350_v33 = vld [vmem:[#allocation81_spill] sm:$0xff]  ;;  %v3057_v44 = vpop.permute.xlu2 %3056  ;;  %v1982_v4 = vmul.f32 0.0, %v5338_v45 }
 0x553   : > { %4187 = vrcp.f32 %v2498_v43  ;;  %v1129_v48 = vsub.f32 %v6351_v29, %v6350_v33  ;;  %v2975_v40 = vand.u32 2147483648, %v2498_v43  ;;  %v2973_v2 = vand.u32 2147483647, %v2498_v43  ;;  %v5908_v45 = vld [vmem:[%s6045_s5] ss:$0 sm:$0xff] }
 0x554   : > { %v2349_v57 = vadd.f32 %v2289_v41, %v1979_v8  ;;  %4189 = vpow2.f32 %v1193_v51  ;;  %vm2969_vm9 = vweird.f32 %v2498_v43  ;;  %v2946_v51 = vor.u32 1.1754944e-38, %v2945_v7 }
 0x555   : > { %1953 = vperm.xlu0 %3938, %v5505_v35   ;;  %v2935_v35 = vmul.f32 %v4186_v6, %v5862_v20  ;;  %v1189_v34 = vmul.f32 1.442695, %v1129_v48  ;;  %v2976_v27 = vor.u32 1.1754944e-38, %v2975_v40  ;;  %vm2974_vm11 = vcmp.eq.f32.partialorder %v2973_v2, 8.507059e+37 }
 0x556   : > { %2330 = vmatmul.bf16.gmra.mxu3 %v2029_v24  ;;  %v3152_v23 = vmul.f32 %v5709_v32, %v2349_v57  ;;  %v2214_v31 = vpop.f32.mrf.mxu2 }
 0x557   : > { %1938 = vperm.xlu2 %3937, %v5761_v52   ;;  %v2936_v47 = vsub.f32 1.0, %v2935_v35  ;;  %4191 = vpow2.f32 %v1189_v34 }
 0x558   : > { %v3177_v0 = vpack.c.bf16 %v3152_v23, %v3151_v37  ;;  %v1983_v37 = vmul.f32 0.0, %v5349_v53 }
 0x559   : > { %v4188_v60 = vpop.eup %4187  ;;  %v2291_v5 = vpop.f32.mrf.mxu3  ;;  %v2937_v14 = vmul.f32 %v4186_v6, %v2936_v47  ;;  %v3345_v47 = vld [vmem:[%s5903_s10 + $0x8] sm:$0xff] }
 0x55a   : > { %3293 = vmatmul.bf16.gmra.mxu2 %v3177_v0  ;;  %v2965_v16 = vmul.f32 %v4188_v60, %v2498_v43  ;;  %v5881_v32 = vpop.eup %4189  ;;  %v2292_v52 = vadd.f32 %v2291_v5, %v5789_v13  ;;  %vm2970_vm8 = vweird.f32 %v4188_v60  ;;  %v1914_v41 = vpop.permute.xlu1 %1913 }
 0x55b   : > { %vm2971_vm10 = vmor %vm2969_vm9, %vm2970_vm8  ;;  %v2938_v50 = vadd.f32 %v4186_v6, %v2937_v14  ;;  %v3346_v14 = vld [vmem:[%s5903_s10 + $0x10] sm:$0xff] }
 0x55c   : > { %v2966_v38 = vsub.f32 1.0, %v2965_v16  ;;  %v2350_v56 = vadd.f32 %v2292_v52, %v1980_v9 }
 0x55d   : > { %1958 = vperm.xlu0 %3938, %v5881_v32   ;;  %v4192_v19 = vpop.eup %4191  ;;  %v2942_v43 = vsel %vm2941_vm14, %v4186_v6, %v2938_v50 }
 0x55e   : > { %v2967_v1 = vmul.f32 %v4188_v60, %v2966_v38  ;;  %v3153_v10 = vmul.f32 %v3052_v28, %v2350_v56  ;;  %v5892_v25 = vpop.f32.mrf.mxu2  ;;  %v1984_v28 = vmul.f32 0.0, %v5737_v39  ;;  %v1985_v38 = vmul.f32 0.0, %v5756_v46 }
 0x55f   : > { %1943 = vperm.xlu2 %3937, %v5489_v63  }
 0x560   : > { %v2968_v11 = vadd.f32 %v4188_v60, %v2967_v1 }
 0x561   : > { %v2293_v59 = vpop.f32.mrf.mxu3 }
 0x562   : > { %v2294_v13 = vadd.f32 %v2293_v59, %v5810_v54  ;;  %v2972_v12 = vsel %vm2971_vm10, %v4188_v60, %v2968_v11  ;;  %v2943_v54 = vand.u32 2147483647, %v5862_v20  ;;  %v3067_v48 = vpop.permute.xlu1 %3066  ;;  %v3072_v60 = vpop.permute.xlu2 %3071  ;;  %v1577_v59 = vld [vmem:[#allocation3 + $0xe0] sm:$0xff] }
 0x563   : > { %v2977_v15 = vsel %vm2974_vm11, %v2976_v27, %v2972_v12 }
 0x564   : > { %v2351_v63 = vadd.f32 %v2294_v13, %v1981_v61  ;;  %vm2944_vm15 = vcmp.eq.f32.partialorder %v2943_v54, 8.507059e+37  ;;  %v1609_v13 = vmul.f32 %v4192_v19, %v1577_v59 }
 0x565   : > { %3136 = vperm.xlu0 %3938, %v2977_v15   ;;  %v2947_v57 = vsel %vm2944_vm15, %v2946_v51, %v2942_v43 }
 0x566   : > { %v3154_v26 = vmul.f32 %v3057_v44, %v2351_v63  ;;  %v2219_v29 = vpop.f32.mrf.mxu2 }
 0x567   : > { %1948 = vperm.xlu2 %3937, %v4192_v19  }
 0x568   : > { %v3178_v18 = vpack.c.bf16 %v3154_v26, %v3153_v10  ;;  %v1987_v26 = vmul.f32 0.0, %v1914_v41 }
 0x569   : > { %v2296_v8 = vpop.f32.mrf.mxu3 }
 0x56a   : > { %3298 = vmatmul.bf16.gmra.mxu2 %v3178_v18  ;;  %v2297_v36 = vadd.f32 %v2296_v8, %v5841_v62  ;;  %v3077_v40 = vpop.permute.xlu2 %3076  ;;  %v1919_v46 = vpop.permute.xlu1 %1918 }
 0x56c   : > { %v2352_v23 = vadd.f32 %v2297_v36, %v1982_v4 }
 0x56e   : > { %v3155_v6 = vmul.f32 %v5723_v49, %v2352_v23  ;;  %v3344_v49 = vld [vmem:[%s5903_s10] sm:$0xff]  ;;  %v1579_v23 = vld [vmem:[#allocation3 + $0xf0] sm:$0xff] }
 0x56f   : > { %3126 = vperm.xlu2 %3937, %v2947_v57   ;;  %v3347_v57 = vld [vmem:[%s5903_s10 + $0x18] sm:$0xff] }
 0x571   : > { %v2298_v24 = vpop.f32.mrf.mxu3 }
 0x572   : > { %v2299_v20 = vadd.f32 %v2298_v24, %v5865_v58  ;;  %v3087_v8 = vpop.permute.xlu1 %3086 }
 0x574   : > { %v2353_v33 = vadd.f32 %v2299_v20, %v1983_v37 }
 0x576   : > { %v3156_v0 = vmul.f32 %v3067_v48, %v2353_v33  ;;  %v1611_v48 = vmul.f32 %v5881_v32, %v1579_v23 }
 0x578   : > { %v3179_v5 = vpack.c.bf16 %v3156_v0, %v3155_v6 }
 0x579   : > { %v2301_v62 = vpop.f32.mrf.mxu3 }
 0x57a   : > { %3303 = vmatmul.bf16.gmra.mxu2 %v3179_v5  ;;  %v2302_v58 = vadd.f32 %v2301_v62, %v5878_v42  ;;  %v3348_v62 = vld [vmem:[%s5903_s10 + $0x20] sm:$0xff] }
 0x57c   : > { %v2354_v52 = vadd.f32 %v2302_v58, %v1984_v28  ;;  %v1988_v58 = vmul.f32 0.0, %v1919_v46 }
 0x57d   : > { %v3264_v53 = vpop.f32.mrf.mxu2 }
 0x57e   : > { %v3265_v16 = vadd.f32 %v5908_v45, %v3264_v53  ;;  %v3157_v9 = vmul.f32 %v3072_v60, %v2354_v52 }
 0x580   : > { %v3376_v35 = vadd.f32 %v3344_v49, %v3265_v16 }
 0x581   : > { %v2303_v34 = vpop.f32.mrf.mxu3 }
 0x582   : > { %3408 = vst [vmem:[%s5916_s14] sm:$0xff] %v3376_v35  ;;  %v2304_v1 = vadd.f32 %v2303_v34, %v2214_v31  ;;  %v1989_v34 = vmul.f32 0.0, %v5792_v3 }
 0x584   : > { %v2355_v42 = vadd.f32 %v2304_v1, %v1985_v38 }
 0x585   : > { %v3266_v2 = vpop.f32.mrf.mxu2 }
 0x586   : > { %v3158_v11 = vmul.f32 %v3077_v40, %v2355_v42  ;;  %v3267_v61 = vadd.f32 %v5908_v45, %v3266_v2 }
 0x588   : > { %v3377_v27 = vadd.f32 %v3345_v47, %v3267_v61  ;;  %v3180_v39 = vpack.c.bf16 %v3158_v11, %v3157_v9  ;;  %v3349_v11 = vld [vmem:[%s5903_s10 + $0x28] sm:$0xff] }
 0x589   : > { %v2306_v56 = vpop.f32.mrf.mxu3 }
 0x58a   : > { %3409 = vst [vmem:[%s5916_s14 + $0x8] sm:$0xff] %v3377_v27  ;;  %v1699_v12 = vpop.xlane.xlu2 %1698  ;;  %3308 = vmatmul.bf16.gmra.mxu2 %v3180_v39  ;;  %v2307_v19 = vadd.f32 %v2306_v56, %v5892_v25 }
 0x58b   : > { %v1737_v15 = vadd.f32 %v1699_v12, %v1609_v13 }
 0x58d   : > { %1770 = vst.msk [vmem:[#allocation3 + $0xe0] sm:$0xff] %vm410_vm0, %v1737_v15  ;;  %v3269_v31 = vpop.f32.mrf.mxu2 }
 0x58e   : > { %v3270_v63 = vadd.f32 %v5908_v45, %v3269_v31  ;;  %v3350_v31 = vld [vmem:[%s5903_s10 + $0x30] sm:$0xff] }
 0x590   : > { %v3378_v44 = vadd.f32 %v3346_v14, %v3270_v63 }
 0x591   : > { %v2308_v10 = vpop.f32.mrf.mxu3 }
 0x592   : > { %3410 = vst [vmem:[%s5916_s14 + $0x10] sm:$0xff] %v3378_v44  ;;  %v2309_v50 = vadd.f32 %v2308_v10, %v2219_v29  ;;  %v1909_v18 = vpop.permute.xlu2 %1908 }
 0x593   : > { %v1986_v7 = vmul.f32 0.0, %v1909_v18 }
 0x594   : > { %v2357_v54 = vadd.f32 %v2309_v50, %v1987_v26  ;;  %v2495_v43 = vld [vmem:[#allocation3 + $0xe0] sm:$0xff] }
 0x595   : > { %v2356_v51 = vadd.f32 %v2307_v19, %v1986_v7  ;;  %v3271_v36 = vpop.f32.mrf.mxu2  ;;  %4193 = vrcp.f32 %v2495_v43  ;;  %v2930_v16 = vand.u32 2147483648, %v2495_v43  ;;  %v2928_v32 = vand.u32 2147483647, %v2495_v43  ;;  %v6352_v26 = vld [vmem:[#allocation37_spill] sm:$0xff] }
 0x596   : > { %v3160_v4 = vmul.f32 %v3087_v8, %v2357_v54  ;;  %v3272_v24 = vadd.f32 %v5908_v45, %v3271_v36  ;;  %vm2924_vm2 = vweird.f32 %v2495_v43 }
 0x597   : > { %v3159_v41 = vmul.f32 %v5813_v22, %v2356_v51  ;;  %v2931_v42 = vor.u32 1.1754944e-38, %v2930_v16 }
 0x598   : > { %v3379_v37 = vadd.f32 %v3347_v57, %v3272_v24 }
 0x599   : > { %v2311_v20 = vpop.f32.mrf.mxu3  ;;  %v3181_v33 = vpack.c.bf16 %v3160_v4, %v3159_v41  ;;  %v6353_v4 = vld [vmem:[#allocation6_spill] sm:$0xff] }
 0x59a   : > { %3411 = vst [vmem:[%s5916_s14 + $0x18] sm:$0xff] %v3379_v37  ;;  %v3092_v25 = vpop.permute.xlu2 %3091  ;;  %v2312_v53 = vadd.f32 %v2311_v20, %v5451_v55  ;;  %v3351_v37 = vld [vmem:[%s5903_s10 + $0x38] sm:$0xff] }
 0x59b   : > { %v4194_v29 = vpop.eup %4193  ;;  %3313 = vmatmul.bf16.gmra.mxu2 %v3181_v33 }
 0x59c   : > { %v1705_v6 = vpop.xlane.xlu1 %1704  ;;  %v2920_v0 = vmul.f32 %v4194_v29, %v2495_v43  ;;  %vm2925_vm1 = vweird.f32 %v4194_v29  ;;  %v2358_v40 = vadd.f32 %v2312_v53, %v1988_v58 }
 0x59d   : > { %v1739_v60 = vadd.f32 %v1705_v6, %v1611_v48  ;;  %v3274_v5 = vpop.f32.mrf.mxu2  ;;  %vm2926_vm3 = vmor %vm2924_vm2, %vm2925_vm1  ;;  %v3102_v48 = vpop.permute.xlu0 %3101 }
 0x59e   : > { %v3275_v22 = vadd.f32 %v5908_v45, %v3274_v5  ;;  %v2921_v49 = vsub.f32 1.0, %v2920_v0  ;;  %v3161_v59 = vmul.f32 %v3092_v25, %v2358_v40 }
 0x59f   : > { %1772 = vst.msk [vmem:[#allocation3 + $0xf0] sm:$0xff] %vm410_vm0, %v1739_v60  ;;  %vm2929_vm0 = vcmp.eq.f32.partialorder %v2928_v32, 8.507059e+37 }
 0x5a0   : > { %v3380_v28 = vadd.f32 %v3348_v62, %v3275_v22  ;;  %v2922_v35 = vmul.f32 %v4194_v29, %v2921_v49  ;;  %v3352_v49 = vld [vmem:[%s5903_s10 + $0x40] sm:$0xff] }
 0x5a1   : > { %v2313_v38 = vpop.f32.mrf.mxu3 }
 0x5a2   : > { %3412 = vst [vmem:[%s5916_s14 + $0x20] sm:$0xff] %v3380_v28  ;;  %v2314_v52 = vadd.f32 %v2313_v38, %v5460_v17  ;;  %v3097_v55 = vpop.permute.xlu2 %3096  ;;  %v2923_v1 = vadd.f32 %v4194_v29, %v2922_v35  ;;  %v6354_v28 = vld [vmem:[#allocation7_spill] sm:$0xff]  ;;  %v6355_v38 = vld [vmem:[#allocation14_spill] sm:$0xff] }
 0x5a4   : > { %v2359_v2 = vadd.f32 %v2314_v52, %v1989_v34  ;;  %v2927_v47 = vsel %vm2926_vm3, %v4194_v29, %v2923_v1 }
 0x5a5   : > { %v3276_v9 = vpop.f32.mrf.mxu2  ;;  %v2932_v61 = vsel %vm2929_vm0, %v2931_v42, %v2927_v47  ;;  %v3353_v47 = vld [vmem:[%s5903_s10 + $0x48] sm:$0xff] }
 0x5a6   : > { %v3162_v3 = vmul.f32 %v3097_v55, %v2359_v2  ;;  %v3277_v27 = vadd.f32 %v5908_v45, %v3276_v9  ;;  %3121 = vperm.xlu1 %3939, %v2932_v61   ;;  %v2497_v39 = vld [vmem:[#allocation3 + $0xf0] sm:$0xff] }
 0x5a7   : > { %4195 = vrcp.f32 %v2497_v39  ;;  %v2960_v7 = vand.u32 2147483648, %v2497_v39  ;;  %v2958_v43 = vand.u32 2147483647, %v2497_v39  ;;  %vm2954_vm5 = vweird.f32 %v2497_v39 }
 0x5a8   : > { %v3182_v17 = vpack.c.bf16 %v3162_v3, %v3161_v59  ;;  %v3381_v56 = vadd.f32 %v3349_v11, %v3277_v27 }
 0x5a9   : > { %v2316_v13 = vpop.f32.mrf.mxu3  ;;  %v2961_v23 = vor.u32 1.1754944e-38, %v2960_v7  ;;  %vm2959_vm7 = vcmp.eq.f32.partialorder %v2958_v43, 8.507059e+37 }
 0x5aa   : > { %3413 = vst [vmem:[%s5916_s14 + $0x28] sm:$0xff] %v3381_v56  ;;  %v1929_v46 = vpop.permute.xlu2 %1928  ;;  %v2317_v50 = vadd.f32 %v2316_v13, %v6352_v26  ;;  %v3354_v56 = vld [vmem:[%s5903_s10 + $0x50] sm:$0xff] }
 0x5ab   : > { %3318 = vmatmul.bf16.gmra.mxu2 %v3182_v17  ;;  %v1990_v18 = vmul.f32 0.0, %v1929_v46 }
 0x5ad   : > { %v4196_v12 = vpop.eup %4195  ;;  %v3279_v15 = vpop.f32.mrf.mxu2  ;;  %v2360_v57 = vadd.f32 %v2317_v50, %v1990_v18  ;;  %v3357_v18 = vld [vmem:[%s5903_s10 + $0x68] sm:$0xff] }
 0x5ae   : > { %v3280_v14 = vadd.f32 %v5908_v45, %v3279_v15  ;;  %1963 = vperm.xlu1 %3939, %v5818_v21   ;;  %v2950_v63 = vmul.f32 %v4196_v12, %v2497_v39  ;;  %vm2955_vm4 = vweird.f32 %v4196_v12  ;;  %v3355_v15 = vld [vmem:[%s5903_s10 + $0x58] sm:$0xff] }
 0x5af   : > { %vm2956_vm6 = vmor %vm2954_vm5, %vm2955_vm4  ;;  %v3163_v0 = vmul.f32 %v3102_v48, %v2360_v57  ;;  %v3359_v57 = vld [vmem:[%s5903_s10 + $0x78] sm:$0xff] }
 0x5b0   : > { %v3382_v44 = vadd.f32 %v3350_v31, %v3280_v14  ;;  %v2951_v10 = vsub.f32 1.0, %v2950_v63 }
 0x5b1   : > { %v2318_v19 = vpop.f32.mrf.mxu3 }
 0x5b2   : > { %3414 = vst [vmem:[%s5916_s14 + $0x30] sm:$0xff] %v3382_v44  ;;  %v3107_v8 = vpop.permute.xlu2 %3106  ;;  %v2952_v54 = vmul.f32 %v4196_v12, %v2951_v10  ;;  %v2319_v21 = vadd.f32 %v2318_v19, %v6353_v4  ;;  %v3356_v44 = vld [vmem:[%s5903_s10 + $0x60] sm:$0xff] }
 0x5b4   : > { %v1934_v51 = vpop.permute.xlu1 %1933  ;;  %v2953_v36 = vadd.f32 %v4196_v12, %v2952_v54  ;;  %v3358_v54 = vld [vmem:[%s5903_s10 + $0x70] sm:$0xff] }
 0x5b5   : > { %v1991_v24 = vmul.f32 0.0, %v1934_v51  ;;  %v3281_v41 = vpop.f32.mrf.mxu2 }
 0x5b6   : > { %v3282_v20 = vadd.f32 %v5908_v45, %v3281_v41  ;;  %v2957_v33 = vsel %vm2956_vm6, %v4196_v12, %v2953_v36  ;;  %v3360_v41 = vld [vmem:[%s5903_s10 + $0x80] sm:$0xff] }
 0x5b7   : > { %v2361_v25 = vadd.f32 %v2319_v21, %v1991_v24  ;;  %v2962_v29 = vsel %vm2959_vm7, %v2961_v23, %v2957_v33 }
 0x5b8   : > { %v3383_v6 = vadd.f32 %v3351_v37, %v3282_v20  ;;  %3131 = vperm.xlu2 %3937, %v2962_v29  }
 0x5b9   : > { %v3164_v60 = vmul.f32 %v3107_v8, %v2361_v25  ;;  %v2321_v5 = vpop.f32.mrf.mxu3  ;;  %v3361_v25 = vld [vmem:[%s5903_s10 + $0x88] sm:$0xff] }
 0x5ba   : > { %3415 = vst [vmem:[%s5916_s14 + $0x38] sm:$0xff] %v3383_v6  ;;  %v1939_v62 = vpop.permute.xlu2 %1938  ;;  %v2322_v35 = vadd.f32 %v2321_v5, %v6354_v28  ;;  %v6357_v28 = vld [vmem:[#allocation15_spill] sm:$0xff] }
 0x5bb   : > { %v3183_v53 = vpack.c.bf16 %v3164_v60, %v3163_v0  ;;  %v1992_v32 = vmul.f32 0.0, %v1939_v62  ;;  %v3362_v60 = vld [vmem:[%s5903_s10 + $0x90] sm:$0xff] }
 0x5bc   : > { %v3117_v9 = vpop.permute.xlu1 %3116 }
 0x5bd   : > { %v3284_v22 = vpop.f32.mrf.mxu2  ;;  %3323 = vmatmul.bf16.gmra.mxu2 %v3183_v53  ;;  %v2362_v1 = vadd.f32 %v2322_v35, %v1992_v32 }
 0x5be   : > { %v3285_v58 = vadd.f32 %v5908_v45, %v3284_v22 }
 0x5bf   : > { %v3112_v11 = vpop.permute.xlu0 %3111 }
 0x5c0   : > { %v3384_v16 = vadd.f32 %v3352_v49, %v3285_v58  ;;  %v3165_v27 = vmul.f32 %v3112_v11, %v2362_v1  ;;  %v6356_v49 = vld [vmem:[#allocation10_spill] sm:$0xff] }
 0x5c1   : > { %v2323_v34 = vpop.f32.mrf.mxu3 }
 0x5c2   : > { %3416 = vst [vmem:[%s5916_s14 + $0x40] sm:$0xff] %v3384_v16  ;;  %v2324_v40 = vadd.f32 %v2323_v34, %v6355_v38  ;;  %v1944_v52 = vpop.permute.xlu2 %1943 }
 0x5c3   : > { %v1993_v55 = vmul.f32 0.0, %v1944_v52  ;;  %v3363_v52 = vld [vmem:[%s5903_s10 + $0x98] sm:$0xff] }
 0x5c5   : > { %v2363_v42 = vadd.f32 %v2324_v40, %v1993_v55  ;;  %v3286_v2 = vpop.f32.mrf.mxu2 }
 0x5c6   : > { %v3287_v61 = vadd.f32 %v5908_v45, %v3286_v2 }
 0x5c7   : > { %v3166_v59 = vmul.f32 %v3117_v9, %v2363_v42  ;;  %v1954_v53 = vpop.permute.xlu0 %1953 }
 0x5c8   : > { %v3385_v3 = vadd.f32 %v3353_v47, %v3287_v61  ;;  %v1995_v16 = vmul.f32 0.0, %v1954_v53 }
 0x5c9   : > { %v3184_v39 = vpack.c.bf16 %v3166_v59, %v3165_v27  ;;  %v2326_v23 = vpop.f32.mrf.mxu3 }
 0x5ca   : > { %3417 = vst [vmem:[%s5916_s14 + $0x48] sm:$0xff] %v3385_v3  ;;  %v1949_v5 = vpop.permute.xlu2 %1948  ;;  %v2327_v35 = vadd.f32 %v2326_v23, %v6357_v28  ;;  %v3368_v23 = vld [vmem:[%s5903_s10 + $0xc0] sm:$0xff] }
 0x5cb   : > { %v1994_v32 = vmul.f32 0.0, %v1949_v5  ;;  %v3372_v28 = vld [vmem:[%s5903_s10 + $0xe0] sm:$0xff] }
 0x5cd   : > { %v3289_v17 = vpop.f32.mrf.mxu2  ;;  %3328 = vmatmul.bf16.gmra.mxu2 %v3184_v39  ;;  %v2364_v1 = vadd.f32 %v2327_v35, %v1994_v32  ;;  %v3364_v39 = vld [vmem:[%s5903_s10 + $0xa0] sm:$0xff] }
 0x5ce   : > { %v3290_v13 = vadd.f32 %v5908_v45, %v3289_v17 }
 0x5cf   : > { %v1959_v61 = vpop.permute.xlu0 %1958 }
 0x5d0   : > { %v3386_v46 = vadd.f32 %v3354_v56, %v3290_v13 }
 0x5d1   : > { %v2328_v6 = vpop.f32.mrf.mxu3 }
 0x5d2   : > { %3418 = vst [vmem:[%s5916_s14 + $0x50] sm:$0xff] %v3386_v46  ;;  %v2329_v58 = vadd.f32 %v2328_v6, %v6356_v49  ;;  %v3127_v42 = vpop.permute.xlu2 %3126 }
 0x5d4   : > { %v2365_v38 = vadd.f32 %v2329_v58, %v1995_v16 }
 0x5d5   : > { %v3291_v12 = vpop.f32.mrf.mxu2 }
 0x5d6   : > { %v3292_v31 = vadd.f32 %v5908_v45, %v3291_v12  ;;  %v3168_v9 = vmul.f32 %v3127_v42, %v2365_v38  ;;  %v3373_v38 = vld [vmem:[%s5903_s10 + $0xe8] sm:$0xff] }
 0x5d8   : > { %v3387_v14 = vadd.f32 %v3355_v15, %v3292_v31  ;;  %v6358_v15 = vld [vmem:[#allocation11_spill] sm:$0xff] }
 0x5d9   : > { %v2331_v34 = vpop.f32.mrf.mxu3 }
 0x5da   : > { %3419 = vst [vmem:[%s5916_s14 + $0x58] sm:$0xff] %v3387_v14  ;;  %v2332_v31 = vadd.f32 %v2331_v34, %v6358_v15 }
 0x5dd   : > { %v3294_v63 = vpop.f32.mrf.mxu2 }
 0x5de   : > { %v3295_v10 = vadd.f32 %v5908_v45, %v3294_v63  ;;  %v1996_v63 = vmul.f32 0.0, %v1959_v61 }
 0x5e0   : > { %v3388_v26 = vadd.f32 %v3356_v44, %v3295_v10  ;;  %v3137_v44 = vpop.permute.xlu0 %3136 }
 0x5e1   : > { %v2333_v3 = vpop.f32.mrf.mxu3 }
 0x5e2   : > { %3420 = vst [vmem:[%s5916_s14 + $0x60] sm:$0xff] %v3388_v26  ;;  %v2334_v13 = vadd.f32 %v2333_v3, %v5659_v30 }
 0x5e5   : > { %v3296_v50 = vpop.f32.mrf.mxu2 }
 0x5e6   : > { %v3297_v19 = vadd.f32 %v5908_v45, %v3296_v50  ;;  %v3365_v50 = vld [vmem:[%s5903_s10 + $0xa8] sm:$0xff] }
 0x5e8   : > { %v3389_v7 = vadd.f32 %v3357_v18, %v3297_v19  ;;  %v2366_v18 = vadd.f32 %v2332_v31, %v1996_v63 }
 0x5ea   : > { %3421 = vst [vmem:[%s5916_s14 + $0x68] sm:$0xff] %v3389_v7 }
 0x5ed   : > { %v3299_v8 = vpop.f32.mrf.mxu2 }
 0x5ee   : > { %v3300_v43 = vadd.f32 %v5908_v45, %v3299_v8 }
 0x5f0   : > { %v3390_v51 = vadd.f32 %v3358_v54, %v3300_v43 }
 0x5f2   : > { %3422 = vst [vmem:[%s5916_s14 + $0x70] sm:$0xff] %v3390_v51  ;;  %v3366_v51 = vld [vmem:[%s5903_s10 + $0xb0] sm:$0xff] }
 0x5f5   : > { %v3301_v36 = vpop.f32.mrf.mxu2 }
 0x5f6   : > { %v3302_v4 = vadd.f32 %v5908_v45, %v3301_v36 }
 0x5f8   : > { %v3391_v21 = vadd.f32 %v3359_v57, %v3302_v4 }
 0x5fa   : > { %3423 = vst [vmem:[%s5916_s14 + $0x78] sm:$0xff] %v3391_v21  ;;  %v3367_v21 = vld [vmem:[%s5903_s10 + $0xb8] sm:$0xff] }
 0x5fd   : > { %v3304_v24 = vpop.f32.mrf.mxu2 }
 0x5fe   : > { %v3305_v37 = vadd.f32 %v5908_v45, %v3304_v24 }
 0x600   : > { %v3392_v20 = vadd.f32 %v3360_v41, %v3305_v37 }
 0x602   : > { %3424 = vst [vmem:[%s5916_s14 + $0x80] sm:$0xff] %v3392_v20 }
 0x605   : > { %v3306_v33 = vpop.f32.mrf.mxu2 }
 0x606   : > { %v3307_v29 = vadd.f32 %v5908_v45, %v3306_v33 }
 0x608   : > { %v3393_v48 = vadd.f32 %v3361_v25, %v3307_v29  ;;  %v3369_v29 = vld [vmem:[%s5903_s10 + $0xc8] sm:$0xff] }
 0x60a   : > { %3425 = vst [vmem:[%s5916_s14 + $0x88] sm:$0xff] %v3393_v48 }
 0x60d   : > { %v3309_v0 = vpop.f32.mrf.mxu2 }
 0x60e   : > { %v3310_v62 = vadd.f32 %v5908_v45, %v3309_v0 }
 0x610   : > { %v3394_v22 = vadd.f32 %v3362_v60, %v3310_v62  ;;  %v3370_v60 = vld [vmem:[%s5903_s10 + $0xd0] sm:$0xff] }
 0x612   : > { %3426 = vst [vmem:[%s5916_s14 + $0x90] sm:$0xff] %v3394_v22  ;;  %v3132_v10 = vpop.permute.xlu2 %3131  ;;  %v3371_v22 = vld [vmem:[%s5903_s10 + $0xd8] sm:$0xff] }
 0x613   : > { %v3169_v7 = vmul.f32 %v3132_v10, %v2366_v18 }
 0x615   : > { %v3311_v40 = vpop.f32.mrf.mxu2 }
 0x616   : > { %v3312_v55 = vadd.f32 %v5908_v45, %v3311_v40 }
 0x618   : > { %v3395_v2 = vadd.f32 %v3363_v52, %v3312_v55  ;;  %v3122_v47 = vpop.permute.xlu1 %3121 }
 0x619   : > { %v3167_v11 = vmul.f32 %v3122_v47, %v2364_v1  ;;  %v3374_v1 = vld [vmem:[%s5903_s10 + $0xf0] sm:$0xff] }
 0x61a   : > { %3427 = vst [vmem:[%s5916_s14 + $0x98] sm:$0xff] %v3395_v2 }
 0x61b   : > { %v3185_v59 = vpack.c.bf16 %v3168_v9, %v3167_v11  ;;  %v3375_v9 = vld [vmem:[%s5903_s10 + $0xf8] sm:$0xff] }
 0x61d   : > { %3333 = vmatmul.bf16.gmra.mxu2 %v3185_v59 }
 0x61e   : > { %v3314_v27 = vpop.f32.mrf.mxu2 }
 0x61f   : > { %v3315_v17 = vadd.f32 %v5908_v45, %v3314_v27 }
 0x620   : > { %v1964_v56 = vpop.permute.xlu1 %1963 }
 0x621   : > { %v3396_v46 = vadd.f32 %v3364_v39, %v3315_v17  ;;  %v1997_v12 = vmul.f32 0.0, %v1964_v56 }
 0x623   : > { %3428 = vst [vmem:[%s5916_s14 + $0xa0] sm:$0xff] %v3396_v46  ;;  %v2367_v14 = vadd.f32 %v2334_v13, %v1997_v12 }
 0x625   : > { %v3170_v19 = vmul.f32 %v3137_v44, %v2367_v14 }
 0x626   : > { %v3316_v26 = vpop.f32.mrf.mxu2 }
 0x627   : > { %v3317_v30 = vadd.f32 %v5908_v45, %v3316_v26  ;;  %v3186_v54 = vpack.c.bf16 %v3170_v19, %v3169_v7 }
 0x629   : > { %v3397_v8 = vadd.f32 %v3365_v50, %v3317_v30 }
 0x62b   : > { %3429 = vst [vmem:[%s5916_s14 + $0xa8] sm:$0xff] %v3397_v8 }
 0x62d   : > { %3338 = vmatmul.bf16.gmra.mxu2 %v3186_v54 }
 0x62e   : > { %v3319_v43 = vpop.f32.mrf.mxu2 }
 0x62f   : > { %v3320_v36 = vadd.f32 %v5908_v45, %v3319_v43 }
 0x631   : > { %v3398_v57 = vadd.f32 %v3366_v51, %v3320_v36 }
 0x633   : > { %3430 = vst [vmem:[%s5916_s14 + $0xb0] sm:$0xff] %v3398_v57 }
 0x636   : > { %v3321_v4 = vpop.f32.mrf.mxu2 }
 0x637   : > { %v3322_v24 = vadd.f32 %v5908_v45, %v3321_v4 }
 0x639   : > { %v3399_v41 = vadd.f32 %v3367_v21, %v3322_v24 }
 0x63b   : > { %3431 = vst [vmem:[%s5916_s14 + $0xb8] sm:$0xff] %v3399_v41 }
 0x640   : > { %v3324_v37 = vpop.f32.mrf.mxu2 }
 0x641   : > { %v3325_v20 = vadd.f32 %v5908_v45, %v3324_v37 }
 0x643   : > { %v3400_v33 = vadd.f32 %v3368_v23, %v3325_v20 }
 0x645   : > { %3432 = vst [vmem:[%s5916_s14 + $0xc0] sm:$0xff] %v3400_v33 }
 0x648   : > { %v3326_v25 = vpop.f32.mrf.mxu2 }
 0x649   : > { %v3327_v48 = vadd.f32 %v5908_v45, %v3326_v25 }
 0x64b   : > { %v3401_v6 = vadd.f32 %v3369_v29, %v3327_v48 }
 0x64d   : > { %3433 = vst [vmem:[%s5916_s14 + $0xc8] sm:$0xff] %v3401_v6 }
 0x650   : > { %v3329_v0 = vpop.f32.mrf.mxu2 }
 0x651   : > { %v3330_v5 = vadd.f32 %v5908_v45, %v3329_v0 }
 0x653   : > { %v3402_v62 = vadd.f32 %v3370_v60, %v3330_v5 }
 0x655   : > { %3434 = vst [vmem:[%s5916_s14 + $0xd0] sm:$0xff] %v3402_v62 }
 0x658   : > { %v3331_v53 = vpop.f32.mrf.mxu2 }
 0x659   : > { %v3332_v49 = vadd.f32 %v5908_v45, %v3331_v53 }
 0x65b   : > { %v3403_v58 = vadd.f32 %v3371_v22, %v3332_v49 }
 0x65d   : > { %3435 = vst [vmem:[%s5916_s14 + $0xd8] sm:$0xff] %v3403_v58 }
 0x6a0   : > { %v3334_v16 = vpop.f32.mrf.mxu2 }
 0x6a1   : > { %v3335_v35 = vadd.f32 %v5908_v45, %v3334_v16 }
 0x6a3   : > { %v3404_v32 = vadd.f32 %v3372_v28, %v3335_v35 }
 0x6a5   : > { %3436 = vst [vmem:[%s5916_s14 + $0xe0] sm:$0xff] %v3404_v32 }
 0x6a8   : > { %v3336_v34 = vpop.f32.mrf.mxu2 }
 0x6a9   : > { %v3337_v40 = vadd.f32 %v5908_v45, %v3336_v34 }
 0x6ab   : > { %v3405_v52 = vadd.f32 %v3373_v38, %v3337_v40 }
 0x6ad   : > { %3437 = vst [vmem:[%s5916_s14 + $0xe8] sm:$0xff] %v3405_v52 }
 0x6b0   : > { %v3339_v55 = vpop.f32.mrf.mxu2 }
 0x6b1   : > { %v3340_v42 = vadd.f32 %v5908_v45, %v3339_v55 }
 0x6b3   : > { %v3406_v2 = vadd.f32 %v3374_v1, %v3340_v42 }
 0x6b5   : > { %3438 = vst [vmem:[%s5916_s14 + $0xf0] sm:$0xff] %v3406_v2 }
 0x6b8   : > { %v3341_v47 = vpop.f32.mrf.mxu2 }
 0x6b9   : > { %v3342_v11 = vadd.f32 %v5908_v45, %v3341_v47 }
 0x6bb   : > { %v3407_v61 = vadd.f32 %v3375_v9, %v3342_v11 }
 0x6bd   : > { %3439 = vst [vmem:[%s5916_s14 + $0xf8] sm:$0xff] %v3407_v61 }
 0x6be PF: > { %s16_s23 = sadd.s32 1, %s4219_s23   ;;  %s6359_s21 = smov %s4215_s22 }
 0x6bf   : > { %p13_p5 = scmp.ge.s32.totalorder %s16_s23, 4   ;;  %s6360_s22 = smov %s6362_s24 }
 0x6c1   :  { %15 = sbr.rel (!%p13_p5) target bundleno = 2 (0x2), region = 91 }

</bundles_post_ra>
